<compile_context>
chip_gen: v7x
topology: tpu7x:2x2x1
jax: 0.10.0
libtpu: 0.0.40
codegen_flags: <defaults>
</compile_context>

<pallas_src>
import functools

import jax
import jax.numpy as jnp
from jax import lax
from jax.experimental import pallas as pl
from jax.experimental.pallas import tpu as pltpu

BN_EPS = 1e-5
VMEM_LIMIT_BYTES = 48 * 1024 * 1024  # <= v7x's 64 MiB per-TC VMEM, headroom for 2x buffering


# ----------------------------- Pallas kernels --------------------------------
def _conv_stats_kernel(x_ref, w_ref, b_ref, y_ref, stat_ref, *, kh, kw, dil, th, wo):
    """One output row-block: conv via tap accumulation + per-tile BN partial stats.

    x_ref    : (th + dil*(kh-1), wo + dil*(kw-1), cin)  bf16   padded-input tile (with halo)
    w_ref    : (kh*kw, cin, cout)                       bf16   per-tap weight slabs
    b_ref    : (1, cout)                                f32    conv bias
    y_ref    : (th*wo, cout)                            f32    pre-BN conv output tile
    stat_ref : (2, cout)                                f32    per-tile [sum, sum_of_squares]
    """
    cin = x_ref.shape[-1]
    cout = w_ref.shape[-1]

    acc = jnp.zeros((th * wo, cout), jnp.float32)
    for ki in range(kh):                      # static unrolled 3x3 tap loop
        for kj in range(kw):
            di, dj = ki * dil, kj * dil
            tap = x_ref[di:di + th, dj:dj + wo, :]          # (th, wo, cin), VMEM-local
            acc = acc + jnp.dot(tap.reshape(th * wo, cin),  # bf16 x bf16 -> f32 on MXU
                                w_ref[ki * kw + kj],
                                preferred_element_type=jnp.float32)

    # Conv bias (exactly cancelled by batch-stat BN, kept for semantic fidelity).
    acc = acc + b_ref[...]

    y_ref[...] = acc
    # Partial statistics for the global (training-mode) BatchNorm.
    stat_ref[0:1, :] = jnp.sum(acc, axis=0, keepdims=True)
    stat_ref[1:2, :] = jnp.sum(acc * acc, axis=0, keepdims=True)


def _bn_apply_kernel(y_ref, scale_ref, shift_ref, o_ref):
    """Folded BatchNorm: out = y * scale + shift  (single FMA, f32)."""
    o_ref[...] = (y_ref[...] * scale_ref[...] + shift_ref[...]).astype(o_ref.dtype)


# ------------------------------- wrapper --------------------------------------
def conv_batch_block(x_nchw, params, *, stride=1, padding=1, dilation=1, target_rows=256):
    """ConvBatchBlock forward: Conv2d(k, s=1, p, d) -> BatchNorm2d (batch statistics)."""
    assert stride == 1  # TODO(synk): stride>1 path not needed by the module defaults.

    w = params["w"]                     # (cout, cin, kh, kw)  PyTorch Conv2d layout
    b = params["b"]                     # (cout,)
    gamma, beta = params["gamma"], params["beta"]
    cout, cin, kh, kw = w.shape

    n, c, h, wdt = x_nchw.shape
    assert c == cin
    ho = h + 2 * padding - dilation * (kh - 1)
    wo = wdt + 2 * padding - dilation * (kw - 1)
    wp = wdt + 2 * padding
    halo = dilation * (kh - 1)

    # NHWC + spatial zero pad; cast activations to bf16 for the MXU (f32 accumulate).
    x = jnp.transpose(x_nchw, (0, 2, 3, 1)).astype(jnp.bfloat16)
    xp = jnp.pad(x, ((0, 0), (padding, padding), (padding, padding), (0, 0)))

    # Row-block tiling of the output (M dimension).  Halo rows are duplicated when
    # stacking blocks: only (kh-1)*dil extra rows per block (vs the old 9x im2col blowup).
    th = max(1, min(ho, target_rows // max(wo, 1)))
    while ho % th:
        th -= 1
    num_rb = ho // th
    nb = n * num_rb
    r = th * wo                                   # rows of the output tile handled per step
    blocks = jnp.stack([xp[:, rb * th: rb * th + th + halo] for rb in range(num_rb)], axis=1)
    x_blk = blocks.reshape(nb, th + halo, wp, cin)

    # Weights as (kh*kw, cin, cout) bf16 tap slabs (matches tap order in the kernel).
    w_taps = jnp.transpose(w, (2, 3, 1, 0)).reshape(kh * kw, cin, cout).astype(jnp.bfloat16)
    b2 = b.reshape(1, cout).astype(jnp.float32)

    # ---- pass 1: conv + per-tile stats (grid over M tiles, fully parallel) ----
    kern = functools.partial(_conv_stats_kernel, kh=kh, kw=kw, dil=dilation, th=th, wo=wo)
    y, stats = pl.pallas_call(
        kern,
        grid=(nb,),
        in_specs=[
            pl.BlockSpec((None, th + halo, wp, cin), lambda i: (i, 0, 0, 0)),
            pl.BlockSpec((kh * kw, cin, cout), lambda i: (0, 0, 0)),
            pl.BlockSpec((1, cout), lambda i: (0, 0)),
        ],
        out_specs=(
            pl.BlockSpec((None, r, cout), lambda i: (i, 0, 0)),
            pl.BlockSpec((None, 2, cout), lambda i: (i, 0, 0)),
        ),
        out_shape=(
            jax.ShapeDtypeStruct((nb, r, cout), jnp.float32),
            jax.ShapeDtypeStruct((nb, 2, cout), jnp.float32),
        ),
        compiler_params=pltpu.CompilerParams(
            dimension_semantics=("parallel",),
            vmem_limit_bytes=VMEM_LIMIT_BYTES,
        ),
    )(x_blk, w_taps, b2)

    # ---- tiny cross-tile reduction + fold BN into one scale/shift (plain JAX) ----
    # Training-mode BatchNorm2d: biased variance over all N*Ho*Wo rows, per channel.
    # One-pass E[x^2]-E[x]^2 in f32 (sums accumulated in f32; variance clamped >= 0).
    m_total = float(nb * r)
    s1 = jnp.sum(stats[:, 0, :], axis=0)
    s2 = jnp.sum(stats[:, 1, :], axis=0)
    mean = s1 / m_total
    var = jnp.maximum(s2 / m_total - mean * mean, 0.0)
    scale = gamma * lax.rsqrt(var + BN_EPS)
    shift = beta - mean * scale
    scale = scale.reshape(1, cout).astype(jnp.float32)
    shift = shift.reshape(1, cout).astype(jnp.float32)

    # ---- pass 2: normalize (single FMA per element, fully parallel) ----
    out = pl.pallas_call(
        _bn_apply_kernel,
        grid=(nb,),
        in_specs=[
            pl.BlockSpec((None, r, cout), lambda i: (i, 0, 0)),
            pl.BlockSpec((1, cout), lambda i: (0, 0)),
            pl.BlockSpec((1, cout), lambda i: (0, 0)),
        ],
        out_specs=pl.BlockSpec((None, r, cout), lambda i: (i, 0, 0)),
        out_shape=jax.ShapeDtypeStruct((nb, r, cout), jnp.float32),
        compiler_params=pltpu.CompilerParams(
            dimension_semantics=("parallel",),
            vmem_limit_bytes=VMEM_LIMIT_BYTES,
        ),
    )(y, scale, shift)

    # TODO(synk): BatchNorm running-mean/var buffer updates are stateful training
    # bookkeeping with no effect on this forward output, so they are not modeled.
    out = out.reshape(n, ho, wo, cout)
    return jnp.transpose(out, (0, 3, 1, 2))  # back to NCHW


# --------------------------- plain-JAX reference -------------------------------
def _reference(x_nchw, params, *, padding=1, dilation=1):
    w, b, gamma, beta = params["w"], params["b"], params["gamma"], params["beta"]
    x = jnp.transpose(x_nchw, (0, 2, 3, 1)).astype(jnp.bfloat16)
    wf = jnp.transpose(w, (2, 3, 1, 0)).astype(jnp.bfloat16)   # HWIO
    y = lax.conv_general_dilated(
        x, wf, window_strides=(1, 1), padding=[(padding, padding)] * 2,
        rhs_dilation=(dilation, dilation),
        dimension_numbers=("NHWC", "HWIO", "NHWC"),
        preferred_element_type=jnp.float32)
    y = y + b.reshape(1, 1, 1, -1)
    mean = jnp.mean(y, axis=(0, 1, 2))
    var = jnp.mean((y - mean) ** 2, axis=(0, 1, 2))
    y = (y - mean) * lax.rsqrt(var + BN_EPS) * gamma + beta
    return jnp.transpose(y, (0, 3, 1, 2))


# ----------------------------------- main --------------------------------------
if __name__ == "__main__":
    key = jax.random.PRNGKey(0)
    k_w, k_b, k_g, k_be, k_x = jax.random.split(key, 5)

    in_c, out_c = 4, 32
    params = {
        "w": jax.random.normal(k_w, (out_c, in_c, 3, 3), jnp.float32) * (2.0 / (in_c * 9)) ** 0.5,
        "b": 0.1 * jax.random.normal(k_b, (out_c,), jnp.float32),
        "gamma": 1.0 + 0.1 * jax.random.normal(k_g, (out_c,), jnp.float32),
        "beta": 0.1 * jax.random.normal(k_be, (out_c,), jnp.float32),
    }
    x = jax.random.normal(k_x, (2, in_c, 16, 16), jnp.float32)   # NCHW

    fwd = jax.jit(conv_batch_block)
    out = jax.block_until_ready(fwd(x, params))

    ref = _reference(x, params)
    max_err = float(jnp.max(jnp.abs(out - ref)))

    assert out.shape == (2, out_c, 16, 16), out.shape
    assert bool(jnp.all(jnp.isfinite(out)))
    assert max_err < 2e-2, f"max abs err vs reference: {max_err}"
    print("KERNEL_OK")
</pallas_src>

<mosaic_0001>
module attributes {stable_mosaic.version = 11 : i64} {
  func.func @_conv_stats_kernel(%arg0: i32, %arg1: memref<1x18x18x4xbf16, #tpu.memory_space<vmem>>, %arg2: memref<9x4x32xbf16, #tpu.memory_space<vmem>>, %arg3: memref<1x32xf32, #tpu.memory_space<vmem>>, %arg4: memref<1x256x32xf32, #tpu.memory_space<vmem>>, %arg5: memref<1x2x32xf32, #tpu.memory_space<vmem>>) attributes {dimension_semantics = [#tpu.dimension_semantics<parallel>], iteration_bounds = array<i64: 2>, scalar_prefetch = 0 : i64, scratch_operands = 0 : i64, tpu.core_type = #tpu.core_type<tc>, window_params = [{transform_indices = @transform_0, window_bounds = array<i64: 1, 18, 18, 4>}, {pipeline_mode = #tpu.pipeline_mode<synchronous>, transform_indices = @transform_1, window_bounds = array<i64: 9, 4, 32>}, {pipeline_mode = #tpu.pipeline_mode<synchronous>, transform_indices = @transform_2, window_bounds = array<i64: 1, 32>}, {transform_indices = @transform_3, window_bounds = array<i64: 1, 256, 32>}, {transform_indices = @transform_4, window_bounds = array<i64: 1, 2, 32>}]} {
    %cst = arith.constant 0.000000e+00 : f32
    %0 = vector.broadcast %cst : f32 to vector<256x32xf32>
    %c0 = arith.constant 0 : index
    %c0_0 = arith.constant 0 : index
    %c0_1 = arith.constant 0 : index
    %c0_2 = arith.constant 0 : index
    %1 = vector.load %arg1[%c0, %c0_0, %c0_1, %c0_2] : memref<1x18x18x4xbf16, #tpu.memory_space<vmem>>, vector<1x16x16x4xbf16>
    %2 = vector.shape_cast %1 : vector<1x16x16x4xbf16> to vector<16x16x4xbf16>
    %3 = vector.shape_cast %2 : vector<16x16x4xbf16> to vector<256x4xbf16>
    %c0_3 = arith.constant 0 : index
    %c0_4 = arith.constant 0 : index
    %c0_5 = arith.constant 0 : index
    %4 = vector.load %arg2[%c0_3, %c0_4, %c0_5] : memref<9x4x32xbf16, #tpu.memory_space<vmem>>, vector<1x4x32xbf16>
    %5 = vector.shape_cast %4 : vector<1x4x32xbf16> to vector<4x32xbf16>
    %cst_6 = arith.constant dense<0.000000e+00> : vector<256x32xf32>
    %6 = tpu.matmul %3, %5, %cst_6 {dimension_numbers = #tpu.dot_dimension_numbers<[1], [0], [0], [1], [0, 0, 1, 1], [], []>} : vector<256x4xbf16>, vector<4x32xbf16>, vector<256x32xf32> -> vector<256x32xf32>
    %7 = arith.addf %0, %6 : vector<256x32xf32>
    %c0_7 = arith.constant 0 : index
    %c0_8 = arith.constant 0 : index
    %c1 = arith.constant 1 : index
    %c0_9 = arith.constant 0 : index
    %8 = vector.load %arg1[%c0_7, %c0_8, %c1, %c0_9] : memref<1x18x18x4xbf16, #tpu.memory_space<vmem>>, vector<1x16x16x4xbf16>
    %9 = vector.shape_cast %8 : vector<1x16x16x4xbf16> to vector<16x16x4xbf16>
    %10 = vector.shape_cast %9 : vector<16x16x4xbf16> to vector<256x4xbf16>
    %c1_10 = arith.constant 1 : index
    %c0_11 = arith.constant 0 : index
    %c0_12 = arith.constant 0 : index
    %11 = vector.load %arg2[%c1_10, %c0_11, %c0_12] : memref<9x4x32xbf16, #tpu.memory_space<vmem>>, vector<1x4x32xbf16>
    %12 = vector.shape_cast %11 : vector<1x4x32xbf16> to vector<4x32xbf16>
    %cst_13 = arith.constant dense<0.000000e+00> : vector<256x32xf32>
    %13 = tpu.matmul %10, %12, %cst_13 {dimension_numbers = #tpu.dot_dimension_numbers<[1], [0], [0], [1], [0, 0, 1, 1], [], []>} : vector<256x4xbf16>, vector<4x32xbf16>, vector<256x32xf32> -> vector<256x32xf32>
    %14 = arith.addf %7, %13 : vector<256x32xf32>
    %c0_14 = arith.constant 0 : index
    %c0_15 = arith.constant 0 : index
    %c2 = arith.constant 2 : index
    %c0_16 = arith.constant 0 : index
    %15 = vector.load %arg1[%c0_14, %c0_15, %c2, %c0_16] : memref<1x18x18x4xbf16, #tpu.memory_space<vmem>>, vector<1x16x16x4xbf16>
    %16 = vector.shape_cast %15 : vector<1x16x16x4xbf16> to vector<16x16x4xbf16>
    %17 = vector.shape_cast %16 : vector<16x16x4xbf16> to vector<256x4xbf16>
    %c2_17 = arith.constant 2 : index
    %c0_18 = arith.constant 0 : index
    %c0_19 = arith.constant 0 : index
    %18 = vector.load %arg2[%c2_17, %c0_18, %c0_19] : memref<9x4x32xbf16, #tpu.memory_space<vmem>>, vector<1x4x32xbf16>
    %19 = vector.shape_cast %18 : vector<1x4x32xbf16> to vector<4x32xbf16>
    %cst_20 = arith.constant dense<0.000000e+00> : vector<256x32xf32>
    %20 = tpu.matmul %17, %19, %cst_20 {dimension_numbers = #tpu.dot_dimension_numbers<[1], [0], [0], [1], [0, 0, 1, 1], [], []>} : vector<256x4xbf16>, vector<4x32xbf16>, vector<256x32xf32> -> vector<256x32xf32>
    %21 = arith.addf %14, %20 : vector<256x32xf32>
    %c0_21 = arith.constant 0 : index
    %c1_22 = arith.constant 1 : index
    %c0_23 = arith.constant 0 : index
    %c0_24 = arith.constant 0 : index
    %22 = vector.load %arg1[%c0_21, %c1_22, %c0_23, %c0_24] : memref<1x18x18x4xbf16, #tpu.memory_space<vmem>>, vector<1x16x16x4xbf16>
    %23 = vector.shape_cast %22 : vector<1x16x16x4xbf16> to vector<16x16x4xbf16>
    %24 = vector.shape_cast %23 : vector<16x16x4xbf16> to vector<256x4xbf16>
    %c3 = arith.constant 3 : index
    %c0_25 = arith.constant 0 : index
    %c0_26 = arith.constant 0 : index
    %25 = vector.load %arg2[%c3, %c0_25, %c0_26] : memref<9x4x32xbf16, #tpu.memory_space<vmem>>, vector<1x4x32xbf16>
    %26 = vector.shape_cast %25 : vector<1x4x32xbf16> to vector<4x32xbf16>
    %cst_27 = arith.constant dense<0.000000e+00> : vector<256x32xf32>
    %27 = tpu.matmul %24, %26, %cst_27 {dimension_numbers = #tpu.dot_dimension_numbers<[1], [0], [0], [1], [0, 0, 1, 1], [], []>} : vector<256x4xbf16>, vector<4x32xbf16>, vector<256x32xf32> -> vector<256x32xf32>
    %28 = arith.addf %21, %27 : vector<256x32xf32>
    %c0_28 = arith.constant 0 : index
    %c1_29 = arith.constant 1 : index
    %c1_30 = arith.constant 1 : index
    %c0_31 = arith.constant 0 : index
    %29 = vector.load %arg1[%c0_28, %c1_29, %c1_30, %c0_31] : memref<1x18x18x4xbf16, #tpu.memory_space<vmem>>, vector<1x16x16x4xbf16>
    %30 = vector.shape_cast %29 : vector<1x16x16x4xbf16> to vector<16x16x4xbf16>
    %31 = vector.shape_cast %30 : vector<16x16x4xbf16> to vector<256x4xbf16>
    %c4 = arith.constant 4 : index
    %c0_32 = arith.constant 0 : index
    %c0_33 = arith.constant 0 : index
    %32 = vector.load %arg2[%c4, %c0_32, %c0_33] : memref<9x4x32xbf16, #tpu.memory_space<vmem>>, vector<1x4x32xbf16>
    %33 = vector.shape_cast %32 : vector<1x4x32xbf16> to vector<4x32xbf16>
    %cst_34 = arith.constant dense<0.000000e+00> : vector<256x32xf32>
    %34 = tpu.matmul %31, %33, %cst_34 {dimension_numbers = #tpu.dot_dimension_numbers<[1], [0], [0], [1], [0, 0, 1, 1], [], []>} : vector<256x4xbf16>, vector<4x32xbf16>, vector<256x32xf32> -> vector<256x32xf32>
    %35 = arith.addf %28, %34 : vector<256x32xf32>
    %c0_35 = arith.constant 0 : index
    %c1_36 = arith.constant 1 : index
    %c2_37 = arith.constant 2 : index
    %c0_38 = arith.constant 0 : index
    %36 = vector.load %arg1[%c0_35, %c1_36, %c2_37, %c0_38] : memref<1x18x18x4xbf16, #tpu.memory_space<vmem>>, vector<1x16x16x4xbf16>
    %37 = vector.shape_cast %36 : vector<1x16x16x4xbf16> to vector<16x16x4xbf16>
    %38 = vector.shape_cast %37 : vector<16x16x4xbf16> to vector<256x4xbf16>
    %c5 = arith.constant 5 : index
    %c0_39 = arith.constant 0 : index
    %c0_40 = arith.constant 0 : index
    %39 = vector.load %arg2[%c5, %c0_39, %c0_40] : memref<9x4x32xbf16, #tpu.memory_space<vmem>>, vector<1x4x32xbf16>
    %40 = vector.shape_cast %39 : vector<1x4x32xbf16> to vector<4x32xbf16>
    %cst_41 = arith.constant dense<0.000000e+00> : vector<256x32xf32>
    %41 = tpu.matmul %38, %40, %cst_41 {dimension_numbers = #tpu.dot_dimension_numbers<[1], [0], [0], [1], [0, 0, 1, 1], [], []>} : vector<256x4xbf16>, vector<4x32xbf16>, vector<256x32xf32> -> vector<256x32xf32>
    %42 = arith.addf %35, %41 : vector<256x32xf32>
    %c0_42 = arith.constant 0 : index
    %c2_43 = arith.constant 2 : index
    %c0_44 = arith.constant 0 : index
    %c0_45 = arith.constant 0 : index
    %43 = vector.load %arg1[%c0_42, %c2_43, %c0_44, %c0_45] : memref<1x18x18x4xbf16, #tpu.memory_space<vmem>>, vector<1x16x16x4xbf16>
    %44 = vector.shape_cast %43 : vector<1x16x16x4xbf16> to vector<16x16x4xbf16>
    %45 = vector.shape_cast %44 : vector<16x16x4xbf16> to vector<256x4xbf16>
    %c6 = arith.constant 6 : index
    %c0_46 = arith.constant 0 : index
    %c0_47 = arith.constant 0 : index
    %46 = vector.load %arg2[%c6, %c0_46, %c0_47] : memref<9x4x32xbf16, #tpu.memory_space<vmem>>, vector<1x4x32xbf16>
    %47 = vector.shape_cast %46 : vector<1x4x32xbf16> to vector<4x32xbf16>
    %cst_48 = arith.constant dense<0.000000e+00> : vector<256x32xf32>
    %48 = tpu.matmul %45, %47, %cst_48 {dimension_numbers = #tpu.dot_dimension_numbers<[1], [0], [0], [1], [0, 0, 1, 1], [], []>} : vector<256x4xbf16>, vector<4x32xbf16>, vector<256x32xf32> -> vector<256x32xf32>
    %49 = arith.addf %42, %48 : vector<256x32xf32>
    %c0_49 = arith.constant 0 : index
    %c2_50 = arith.constant 2 : index
    %c1_51 = arith.constant 1 : index
    %c0_52 = arith.constant 0 : index
    %50 = vector.load %arg1[%c0_49, %c2_50, %c1_51, %c0_52] : memref<1x18x18x4xbf16, #tpu.memory_space<vmem>>, vector<1x16x16x4xbf16>
    %51 = vector.shape_cast %50 : vector<1x16x16x4xbf16> to vector<16x16x4xbf16>
    %52 = vector.shape_cast %51 : vector<16x16x4xbf16> to vector<256x4xbf16>
    %c7 = arith.constant 7 : index
    %c0_53 = arith.constant 0 : index
    %c0_54 = arith.constant 0 : index
    %53 = vector.load %arg2[%c7, %c0_53, %c0_54] : memref<9x4x32xbf16, #tpu.memory_space<vmem>>, vector<1x4x32xbf16>
    %54 = vector.shape_cast %53 : vector<1x4x32xbf16> to vector<4x32xbf16>
    %cst_55 = arith.constant dense<0.000000e+00> : vector<256x32xf32>
    %55 = tpu.matmul %52, %54, %cst_55 {dimension_numbers = #tpu.dot_dimension_numbers<[1], [0], [0], [1], [0, 0, 1, 1], [], []>} : vector<256x4xbf16>, vector<4x32xbf16>, vector<256x32xf32> -> vector<256x32xf32>
    %56 = arith.addf %49, %55 : vector<256x32xf32>
    %c0_56 = arith.constant 0 : index
    %c2_57 = arith.constant 2 : index
    %c2_58 = arith.constant 2 : index
    %c0_59 = arith.constant 0 : index
    %57 = vector.load %arg1[%c0_56, %c2_57, %c2_58, %c0_59] : memref<1x18x18x4xbf16, #tpu.memory_space<vmem>>, vector<1x16x16x4xbf16>
    %58 = vector.shape_cast %57 : vector<1x16x16x4xbf16> to vector<16x16x4xbf16>
    %59 = vector.shape_cast %58 : vector<16x16x4xbf16> to vector<256x4xbf16>
    %c8 = arith.constant 8 : index
    %c0_60 = arith.constant 0 : index
    %c0_61 = arith.constant 0 : index
    %60 = vector.load %arg2[%c8, %c0_60, %c0_61] : memref<9x4x32xbf16, #tpu.memory_space<vmem>>, vector<1x4x32xbf16>
    %61 = vector.shape_cast %60 : vector<1x4x32xbf16> to vector<4x32xbf16>
    %cst_62 = arith.constant dense<0.000000e+00> : vector<256x32xf32>
    %62 = tpu.matmul %59, %61, %cst_62 {dimension_numbers = #tpu.dot_dimension_numbers<[1], [0], [0], [1], [0, 0, 1, 1], [], []>} : vector<256x4xbf16>, vector<4x32xbf16>, vector<256x32xf32> -> vector<256x32xf32>
    %63 = arith.addf %56, %62 : vector<256x32xf32>
    %c0_63 = arith.constant 0 : index
    %c0_64 = arith.constant 0 : index
    %64 = vector.load %arg3[%c0_63, %c0_64] : memref<1x32xf32, #tpu.memory_space<vmem>>, vector<1x32xf32>
    %65 = vector.broadcast %64 : vector<1x32xf32> to vector<256x32xf32>
    %66 = arith.addf %63, %65 : vector<256x32xf32>
    %c0_65 = arith.constant 0 : index
    %c0_66 = arith.constant 0 : index
    %c0_67 = arith.constant 0 : index
    %67 = vector.load %arg4[%c0_65, %c0_66, %c0_67] : memref<1x256x32xf32, #tpu.memory_space<vmem>>, vector<1x256x32xf32>
    %68 = vector.shape_cast %67 : vector<1x256x32xf32> to vector<256x32xf32>
    %69 = vector.shape_cast %66 : vector<256x32xf32> to vector<1x256x32xf32>
    tpu.vector_store %arg4[%c0_65, %c0_66, %c0_67], %69 {strides = array<i32>} : memref<1x256x32xf32, #tpu.memory_space<vmem>>, vector<1x256x32xf32>,
    %cst_68 = arith.constant dense<0.000000e+00> : vector<32xf32>
    %70 = vector.multi_reduction <add>, %66, %cst_68 [0] : vector<256x32xf32> to vector<32xf32>
    %71 = vector.shape_cast %70 : vector<32xf32> to vector<1x32xf32>
    %c0_69 = arith.constant 0 : index
    %c0_70 = arith.constant 0 : index
    %c0_71 = arith.constant 0 : index
    %72 = vector.load %arg5[%c0_69, %c0_70, %c0_71] : memref<1x2x32xf32, #tpu.memory_space<vmem>>, vector<1x1x32xf32>
    %73 = vector.shape_cast %72 : vector<1x1x32xf32> to vector<1x32xf32>
    %74 = vector.shape_cast %71 : vector<1x32xf32> to vector<1x1x32xf32>
    tpu.vector_store %arg5[%c0_69, %c0_70, %c0_71], %74 {strides = array<i32>} : memref<1x2x32xf32, #tpu.memory_space<vmem>>, vector<1x1x32xf32>,
    %75 = arith.mulf %66, %66 : vector<256x32xf32>
    %cst_72 = arith.constant dense<0.000000e+00> : vector<32xf32>
    %76 = vector.multi_reduction <add>, %75, %cst_72 [0] : vector<256x32xf32> to vector<32xf32>
    %77 = vector.shape_cast %76 : vector<32xf32> to vector<1x32xf32>
    %c0_73 = arith.constant 0 : index
    %c1_74 = arith.constant 1 : index
    %c0_75 = arith.constant 0 : index
    %78 = vector.load %arg5[%c0_73, %c1_74, %c0_75] : memref<1x2x32xf32, #tpu.memory_space<vmem>>, vector<1x1x32xf32>
    %79 = vector.shape_cast %78 : vector<1x1x32xf32> to vector<1x32xf32>
    %80 = vector.shape_cast %77 : vector<1x32xf32> to vector<1x1x32xf32>
    tpu.vector_store %arg5[%c0_73, %c1_74, %c0_75], %80 {strides = array<i32>} : memref<1x2x32xf32, #tpu.memory_space<vmem>>, vector<1x1x32xf32>,
    return
  }
  func.func @transform_0(%arg0: i32) -> (i32, i32, i32, i32) {
    %c0_i32 = arith.constant 0 : i32
    %c0_i32_0 = arith.constant 0 : i32
    %c0_i32_1 = arith.constant 0 : i32
    %c0_i32_2 = arith.constant 0 : i32
    return %arg0, %c0_i32, %c0_i32_0, %c0_i32_1 : i32, i32, i32, i32
  }
  func.func @transform_1(%arg0: i32) -> (i32, i32, i32) {
    %c0_i32 = arith.constant 0 : i32
    %c0_i32_0 = arith.constant 0 : i32
    %c0_i32_1 = arith.constant 0 : i32
    %c0_i32_2 = arith.constant 0 : i32
    return %c0_i32, %c0_i32_0, %c0_i32_1 : i32, i32, i32
  }
  func.func @transform_2(%arg0: i32) -> (i32, i32) {
    %c0_i32 = arith.constant 0 : i32
    %c0_i32_0 = arith.constant 0 : i32
    %c0_i32_1 = arith.constant 0 : i32
    return %c0_i32, %c0_i32_0 : i32, i32
  }
  func.func @transform_3(%arg0: i32) -> (i32, i32, i32) {
    %c0_i32 = arith.constant 0 : i32
    %c0_i32_0 = arith.constant 0 : i32
    %c0_i32_1 = arith.constant 0 : i32
    return %arg0, %c0_i32, %c0_i32_0 : i32, i32, i32
  }
  func.func @transform_4(%arg0: i32) -> (i32, i32, i32) {
    %c0_i32 = arith.constant 0 : i32
    %c0_i32_0 = arith.constant 0 : i32
    %c0_i32_1 = arith.constant 0 : i32
    return %arg0, %c0_i32, %c0_i32_0 : i32, i32, i32
  }
}

module attributes {stable_mosaic.version = 11 : i64} {
  func.func @_bn_apply_kernel(%arg0: i32, %arg1: memref<1x256x32xf32, #tpu.memory_space<vmem>>, %arg2: memref<1x32xf32, #tpu.memory_space<vmem>>, %arg3: memref<1x32xf32, #tpu.memory_space<vmem>>, %arg4: memref<1x256x32xf32, #tpu.memory_space<vmem>>) attributes {dimension_semantics = [#tpu.dimension_semantics<parallel>], iteration_bounds = array<i64: 2>, scalar_prefetch = 0 : i64, scratch_operands = 0 : i64, tpu.core_type = #tpu.core_type<tc>, window_params = [{transform_indices = @transform_0, window_bounds = array<i64: 1, 256, 32>}, {pipeline_mode = #tpu.pipeline_mode<synchronous>, transform_indices = @transform_1, window_bounds = array<i64: 1, 32>}, {pipeline_mode = #tpu.pipeline_mode<synchronous>, transform_indices = @transform_2, window_bounds = array<i64: 1, 32>}, {transform_indices = @transform_3, window_bounds = array<i64: 1, 256, 32>}]} {
    %c0 = arith.constant 0 : index
    %c0_0 = arith.constant 0 : index
    %c0_1 = arith.constant 0 : index
    %0 = vector.load %arg1[%c0, %c0_0, %c0_1] : memref<1x256x32xf32, #tpu.memory_space<vmem>>, vector<1x256x32xf32>
    %1 = vector.shape_cast %0 : vector<1x256x32xf32> to vector<256x32xf32>
    %c0_2 = arith.constant 0 : index
    %c0_3 = arith.constant 0 : index
    %2 = vector.load %arg2[%c0_2, %c0_3] : memref<1x32xf32, #tpu.memory_space<vmem>>, vector<1x32xf32>
    %3 = vector.broadcast %2 : vector<1x32xf32> to vector<256x32xf32>
    %4 = arith.mulf %1, %3 : vector<256x32xf32>
    %c0_4 = arith.constant 0 : index
    %c0_5 = arith.constant 0 : index
    %5 = vector.load %arg3[%c0_4, %c0_5] : memref<1x32xf32, #tpu.memory_space<vmem>>, vector<1x32xf32>
    %6 = vector.broadcast %5 : vector<1x32xf32> to vector<256x32xf32>
    %7 = arith.addf %4, %6 : vector<256x32xf32>
    %c0_6 = arith.constant 0 : index
    %c0_7 = arith.constant 0 : index
    %c0_8 = arith.constant 0 : index
    %8 = vector.load %arg4[%c0_6, %c0_7, %c0_8] : memref<1x256x32xf32, #tpu.memory_space<vmem>>, vector<1x256x32xf32>
    %9 = vector.shape_cast %8 : vector<1x256x32xf32> to vector<256x32xf32>
    %10 = vector.shape_cast %7 : vector<256x32xf32> to vector<1x256x32xf32>
    tpu.vector_store %arg4[%c0_6, %c0_7, %c0_8], %10 {strides = array<i32>} : memref<1x256x32xf32, #tpu.memory_space<vmem>>, vector<1x256x32xf32>,
    return
  }
  func.func @transform_0(%arg0: i32) -> (i32, i32, i32) {
    %c0_i32 = arith.constant 0 : i32
    %c0_i32_0 = arith.constant 0 : i32
    %c0_i32_1 = arith.constant 0 : i32
    return %arg0, %c0_i32, %c0_i32_0 : i32, i32, i32
  }
  func.func @transform_1(%arg0: i32) -> (i32, i32) {
    %c0_i32 = arith.constant 0 : i32
    %c0_i32_0 = arith.constant 0 : i32
    %c0_i32_1 = arith.constant 0 : i32
    return %c0_i32, %c0_i32_0 : i32, i32
  }
  func.func @transform_2(%arg0: i32) -> (i32, i32) {
    %c0_i32 = arith.constant 0 : i32
    %c0_i32_0 = arith.constant 0 : i32
    %c0_i32_1 = arith.constant 0 : i32
    return %c0_i32, %c0_i32_0 : i32, i32
  }
  func.func @transform_3(%arg0: i32) -> (i32, i32, i32) {
    %c0_i32 = arith.constant 0 : i32
    %c0_i32_0 = arith.constant 0 : i32
    %c0_i32_1 = arith.constant 0 : i32
    return %arg0, %c0_i32, %c0_i32_0 : i32, i32, i32
  }
}

</mosaic_0001>

<bundles_post_ra>
// kernel: conv_batch_block.3
= control target key start
LH: loop header
LB: loop body
LE: loop exit
PB: predicated region body
PF: predicated region fallthrough
CT: control target
= control target key end

     0   :  { %8 = vsyncpa [#allocation3], 0  ;;  %s817_s0 = inlined_call_operand.vmem [shape: f32[2,256,32], index: 0, kind: input, shape index: {}]   ;;  %s818_s1 = inlined_call_operand.vmem [shape: f32[1,32], index: 1, kind: input, shape index: {}]   ;;  %s819_s2 = inlined_call_operand.vmem [shape: f32[1,32], index: 2, kind: input, shape index: {}]   ;;  %s820_s3 = inlined_call_operand.hbm [shape: f32[2,256,32], index: 3, kind: output, shape index: {}]  }
   0x1   :  { %10 = vsyncpa [#allocation3 + $0x1], 0  ;;  %s532_s12 = smov 0   ;;  %s534_s13 = smov 0  }
   0x2   :  { %s536_s14 = smov 0   ;;  %s538_s15 = smov 0  }
   0x3 LB: > { %s553_s16 = sadd.s32 4294967295, %s507_s15   ;;  %s388_s17 = sadd.s32 4294967294, %s507_s15   ;;  %s507_s15 = sphi %s538_s15, %s826_s15   ;;  %s503_s14 = sphi %s536_s14, %s825_s14   ;;  %s499_s13 = sphi %s534_s13, %s824_s13   ;;  %s495_s12 = sphi %s532_s12, %s823_s12  }
   0x4   : > { %s557_s18 = sadd.s32 1, %s507_s15   ;;  %s91_s19 = sadd.s32 1, %s503_s14 }
   0x5   : > { %s88_s20 = ssub.s32 %s507_s15, %s557_s18  ;;  %p101_p0 = scmp.ne.s32.totalorder %s503_s14, %s499_s13 }
   0x6   : > { %p89_p1 = scmp.eq.s32.totalorder %s88_s20, 0  ;;  %p102_p2 = scmp.eq.s32.totalorder %s553_s16, 1 }
   0x7   : > { %p107_p3 = scmp.ne.s32.totalorder %s499_s13, %s495_s12  ;;  %p108_p4 = scmp.eq.s32.totalorder %s388_s17, 1 }
   0x8   : > { %s568_s21 = scalar_select %p89_p1, %s503_s14, %s91_s19  }
   0x9   : > { %p570_p5 = por %p102_p2, %p101_p0  ;;  %p574_p6 = por %p108_p4, %p107_p3 }
   0xa   : > { %p391_p7 = scmp.ge.s32.totalorder %s507_s15, 1  ;;  %p140_p8 = scmp.lt.s32.totalorder %s507_s15, 3 }
   0xc   : > { %p141_p9 = pnand %p391_p7, %p140_p8 }
   0xd   : > { %p164_p10 = scmp.lt.s32.totalorder (!%p141_p9), %s553_s16, 1  ;;  %s161_s24 = sand.u32 (!%p141_p9), 1, %s499_s13   ;;  %v586_v0 = vld [vmem:[%s818_s1] ss:$0 sm:$0xff] (!%p141_p9)  ;;  %vm279_vm0 = vcmask (!%p141_p9), 261120  }
   0xe   : > { %144 = sbr.rel (%p141_p9) target bundleno = 63 (0x3f), region = 32  ;;  %s590_s29 = sshll.u32 (!%p141_p9), %s161_s24, 8  ;;  %v600_v1 = vld [vmem:[%s819_s2] ss:$0 sm:$0xff] (!%p141_p9) }
   0xf   : > { %s632_s8 = scalar_lea.vmem (!%p141_p9), [#allocation2], %s590_s29  ;;  %s403_s9 = sshll.u32 (!%p141_p9), %s553_s16, 12 }
  0x10   : > { %s326_s10 = sshll.u32 (!%p141_p9), %s632_s8, 4  ;;  %s759_s17 = scalar_lea.hbm (!%p141_p9), %s820_s3, %s403_s9  ;;  %s761_s10 = int_to_ptr.vmem [resolvable:$true] %s326_s10 }
  0x11   : > { %s776_s19 = scalar_lea.sflag (!%p141_p9), [#allocation3], %s161_s24  ;;  %s445_s20 = scalar_lea.vmem (!%p141_p9), %s761_s10, 4096 }
  0x12   : > { %p446_p11 = scmp.ne.s32.totalorder (!%p141_p9), %s761_s10, %s445_s20 }
  0x14   : > { %p447_p12 = pnand (!%p141_p9), %p446_p11, %p570_p5 }
  0x15   : > { %s165_s25 = scalar_select %p164_p10, %s553_s16, 1 }
  0x16   : > { %p448_p13 = pneg %p447_p12 }
  0x17   : > { %s402_s26 = sshll.u32 %s165_s25, 8  ;;  %s509_s25 = smov [#allocation2]  }
  0x18   : > { %s595_s5 = scalar_lea.vmem %s817_s0, %s402_s26  ;;  %s449_s26 = sshll.u32 %s509_s25, 4  ;;  %s450_s26 = int_to_ptr.vmem [resolvable:$false] %s449_s26 }
  0x19   : > { %v169_v2 = vld [vmem:[%s595_s5] sm:$0xff]  ;;  %v170_v3 = vld [vmem:[%s595_s5 + $0x8] sm:$0xff]  ;;  %v171_v4 = vld [vmem:[%s595_s5 + $0x10] sm:$0xff]  ;;  %s451_s27 = scalar_lea.vmem %s450_s26, 8192  ;;  %p452_p0 = scmp.lt.s32.totalorder %s761_s10, %s450_s26 }
  0x1a   : > { %v208_v5 = vmul.f32 %v586_v0, %v169_v2  ;;  %v209_v6 = vmul.f32 %v586_v0, %v170_v3  ;;  %v210_v7 = vmul.f32 %v586_v0, %v171_v4  ;;  %v172_v8 = vld [vmem:[%s595_s5 + $0x18] sm:$0xff]  ;;  %v173_v9 = vld [vmem:[%s595_s5 + $0x20] sm:$0xff]  ;;  %v174_v10 = vld [vmem:[%s595_s5 + $0x28] sm:$0xff]  ;;  %p453_p1 = scmp.lt.s32.totalorder %s451_s27, %s445_s20 }
  0x1b   : > { %v211_v11 = vmul.f32 %v586_v0, %v172_v8  ;;  %v212_v12 = vmul.f32 %v586_v0, %v173_v9  ;;  %v213_v13 = vmul.f32 %v586_v0, %v174_v10  ;;  %v175_v14 = vld [vmem:[%s595_s5 + $0x30] sm:$0xff]  ;;  %v176_v15 = vld [vmem:[%s595_s5 + $0x38] sm:$0xff]  ;;  %v177_v16 = vld [vmem:[%s595_s5 + $0x40] sm:$0xff] }
  0x1c   : > { %v247_v17 = vadd.f32 %v600_v1, %v208_v5  ;;  %v248_v18 = vadd.f32 %v600_v1, %v209_v6  ;;  %v249_v19 = vadd.f32 %v600_v1, %v210_v7  ;;  %v214_v20 = vmul.f32 %v586_v0, %v175_v14  ;;  %v178_v21 = vld [vmem:[%s595_s5 + $0x48] sm:$0xff]  ;;  %v179_v22 = vld [vmem:[%s595_s5 + $0x50] sm:$0xff]  ;;  %v180_v23 = vld [vmem:[%s595_s5 + $0x58] sm:$0xff]  ;;  %p454_p2 = por %p453_p1, %p452_p0 }
  0x1d   : > { %v250_v24 = vadd.f32 %v600_v1, %v211_v11  ;;  %v251_v25 = vadd.f32 %v600_v1, %v212_v12  ;;  %v252_v26 = vadd.f32 %v600_v1, %v213_v13  ;;  %v215_v27 = vmul.f32 %v586_v0, %v176_v15  ;;  %v181_v28 = vld [vmem:[%s595_s5 + $0x60] sm:$0xff]  ;;  %v182_v29 = vld [vmem:[%s595_s5 + $0x68] sm:$0xff]  ;;  %v183_v30 = vld [vmem:[%s595_s5 + $0x70] sm:$0xff] }
  0x1e   : > { %280 = vst.msk [vmem:[%s632_s8] sm:$0xff] %vm279_vm0, %v247_v17  ;;  %281 = vst.msk [vmem:[%s632_s8 + $0x8] sm:$0xff] %vm279_vm0, %v248_v18  ;;  %v253_v31 = vadd.f32 %v600_v1, %v214_v20  ;;  %v216_v32 = vmul.f32 %v586_v0, %v177_v16  ;;  %v217_v33 = vmul.f32 %v586_v0, %v178_v21  ;;  %v184_v35 = vld [vmem:[%s595_s5 + $0x78] sm:$0xff]  ;;  %v185_v40 = vld [vmem:[%s595_s5 + $0x80] sm:$0xff]  ;;  %p455_p3 = pnand %p454_p2, %p448_p13 }
  0x1f   : > { %282 = vst.msk [vmem:[%s632_s8 + $0x10] sm:$0xff] %vm279_vm0, %v249_v19  ;;  %v218_v34 = vmul.f32 %v586_v0, %v179_v22  ;;  %283 = vst.msk [vmem:[%s632_s8 + $0x18] sm:$0xff] %vm279_vm0, %v250_v24  ;;  %v254_v36 = vadd.f32 %v600_v1, %v215_v27  ;;  %v219_v37 = vmul.f32 %v586_v0, %v180_v23  ;;  %v186_v41 = vld [vmem:[%s595_s5 + $0x88] sm:$0xff]  ;;  %v187_v42 = vld [vmem:[%s595_s5 + $0x90] sm:$0xff] }
  0x20   : > { %284 = vst.msk [vmem:[%s632_s8 + $0x20] sm:$0xff] %vm279_vm0, %v251_v25  ;;  %285 = vst.msk [vmem:[%s632_s8 + $0x28] sm:$0xff] %vm279_vm0, %v252_v26  ;;  %v220_v38 = vmul.f32 %v586_v0, %v181_v28  ;;  %v221_v39 = vmul.f32 %v586_v0, %v182_v29  ;;  %v255_v43 = vadd.f32 %v600_v1, %v216_v32  ;;  %v188_v47 = vld [vmem:[%s595_s5 + $0x98] sm:$0xff]  ;;  %v189_v48 = vld [vmem:[%s595_s5 + $0xa0] sm:$0xff] }
  0x21   : > { %286 = vst.msk [vmem:[%s632_s8 + $0x30] sm:$0xff] %vm279_vm0, %v253_v31  ;;  %v256_v44 = vadd.f32 %v600_v1, %v217_v33  ;;  %v257_v45 = vadd.f32 %v600_v1, %v218_v34  ;;  %v222_v46 = vmul.f32 %v586_v0, %v183_v30  ;;  %v190_v49 = vld [vmem:[%s595_s5 + $0xa8] sm:$0xff]  ;;  %287 = vst.msk [vmem:[%s632_s8 + $0x38] sm:$0xff] %vm279_vm0, %v254_v36  ;;  %v191_v54 = vld [vmem:[%s595_s5 + $0xb0] sm:$0xff] }
  0x22   : > { %v258_v50 = vadd.f32 %v600_v1, %v219_v37  ;;  %v259_v51 = vadd.f32 %v600_v1, %v220_v38  ;;  %v260_v52 = vadd.f32 %v600_v1, %v221_v39  ;;  %v223_v53 = vmul.f32 %v586_v0, %v184_v35  ;;  %288 = vst.msk [vmem:[%s632_s8 + $0x40] sm:$0xff] %vm279_vm0, %v255_v43  ;;  %v192_v59 = vld [vmem:[%s595_s5 + $0xb8] sm:$0xff]  ;;  %v193_v2 = vld [vmem:[%s595_s5 + $0xc0] sm:$0xff]  ;;  %v194_v3 = vld [vmem:[%s595_s5 + $0xc8] sm:$0xff] }
  0x23   : > { %289 = vst.msk [vmem:[%s632_s8 + $0x48] sm:$0xff] %vm279_vm0, %v256_v44  ;;  %290 = vst.msk [vmem:[%s632_s8 + $0x50] sm:$0xff] %vm279_vm0, %v257_v45  ;;  %v261_v55 = vadd.f32 %v600_v1, %v222_v46  ;;  %v224_v56 = vmul.f32 %v586_v0, %v185_v40  ;;  %v225_v57 = vmul.f32 %v586_v0, %v186_v41  ;;  %v195_v4 = vld [vmem:[%s595_s5 + $0xd0] sm:$0xff]  ;;  %v196_v9 = vld [vmem:[%s595_s5 + $0xd8] sm:$0xff] }
  0x24   : > { %v226_v58 = vmul.f32 %v586_v0, %v187_v42  ;;  %291 = vst.msk [vmem:[%s632_s8 + $0x58] sm:$0xff] %vm279_vm0, %v258_v50  ;;  %292 = vst.msk [vmem:[%s632_s8 + $0x60] sm:$0xff] %vm279_vm0, %v259_v51  ;;  %v262_v60 = vadd.f32 %v600_v1, %v223_v53  ;;  %v227_v61 = vmul.f32 %v586_v0, %v188_v47  ;;  %v197_v10 = vld [vmem:[%s595_s5 + $0xe0] sm:$0xff]  ;;  %v198_v11 = vld [vmem:[%s595_s5 + $0xe8] sm:$0xff] }
  0x25   : > { %293 = vst.msk [vmem:[%s632_s8 + $0x68] sm:$0xff] %vm279_vm0, %v260_v52  ;;  %v228_v62 = vmul.f32 %v586_v0, %v189_v48  ;;  %v229_v63 = vmul.f32 %v586_v0, %v190_v49  ;;  %294 = vst.msk [vmem:[%s632_s8 + $0x70] sm:$0xff] %vm279_vm0, %v261_v55  ;;  %v263_v5 = vadd.f32 %v600_v1, %v224_v56  ;;  %v199_v16 = vld [vmem:[%s595_s5 + $0xf0] sm:$0xff]  ;;  %v200_v21 = vld [vmem:[%s595_s5 + $0xf8] sm:$0xff] }
  0x26   : > { %v264_v6 = vadd.f32 %v600_v1, %v225_v57  ;;  %v265_v7 = vadd.f32 %v600_v1, %v226_v58  ;;  %v230_v8 = vmul.f32 %v586_v0, %v191_v54  ;;  %295 = vst.msk [vmem:[%s632_s8 + $0x78] sm:$0xff] %vm279_vm0, %v262_v60  ;;  %v266_v12 = vadd.f32 %v600_v1, %v227_v61 }
  0x27   : > { %v267_v13 = vadd.f32 %v600_v1, %v228_v62  ;;  %v268_v14 = vadd.f32 %v600_v1, %v229_v63  ;;  %v231_v15 = vmul.f32 %v586_v0, %v192_v59  ;;  %296 = vst.msk [vmem:[%s632_s8 + $0x80] sm:$0xff] %vm279_vm0, %v263_v5  ;;  %v232_v18 = vmul.f32 %v586_v0, %v193_v2 }
  0x28   : > { %297 = vst.msk [vmem:[%s632_s8 + $0x88] sm:$0xff] %vm279_vm0, %v264_v6  ;;  %298 = vst.msk [vmem:[%s632_s8 + $0x90] sm:$0xff] %vm279_vm0, %v265_v7  ;;  %v269_v17 = vadd.f32 %v600_v1, %v230_v8  ;;  %v233_v19 = vmul.f32 %v586_v0, %v194_v3  ;;  %v234_v20 = vmul.f32 %v586_v0, %v195_v4 }
  0x29   : > { %299 = vst.msk [vmem:[%s632_s8 + $0x98] sm:$0xff] %vm279_vm0, %v266_v12  ;;  %300 = vst.msk [vmem:[%s632_s8 + $0xa0] sm:$0xff] %vm279_vm0, %v267_v13  ;;  %v270_v22 = vadd.f32 %v600_v1, %v231_v15  ;;  %v235_v23 = vmul.f32 %v586_v0, %v196_v9  ;;  %v236_v24 = vmul.f32 %v586_v0, %v197_v10 }
  0x2a   : > { %301 = vst.msk [vmem:[%s632_s8 + $0xa8] sm:$0xff] %vm279_vm0, %v268_v14  ;;  %v237_v25 = vmul.f32 %v586_v0, %v198_v11  ;;  %302 = vst.msk [vmem:[%s632_s8 + $0xb0] sm:$0xff] %vm279_vm0, %v269_v17  ;;  %v271_v26 = vadd.f32 %v600_v1, %v232_v18  ;;  %v272_v27 = vadd.f32 %v600_v1, %v233_v19 }
  0x2b   : > { %v273_v28 = vadd.f32 %v600_v1, %v234_v20  ;;  %v238_v29 = vmul.f32 %v586_v0, %v199_v16  ;;  %303 = vst.msk [vmem:[%s632_s8 + $0xb8] sm:$0xff] %vm279_vm0, %v270_v22  ;;  %v274_v30 = vadd.f32 %v600_v1, %v235_v23  ;;  %v275_v31 = vadd.f32 %v600_v1, %v236_v24 }
  0x2c   : > { %v276_v32 = vadd.f32 %v600_v1, %v237_v25  ;;  %v239_v33 = vmul.f32 %v586_v0, %v200_v21  ;;  %304 = vst.msk [vmem:[%s632_s8 + $0xc0] sm:$0xff] %vm279_vm0, %v271_v26  ;;  %305 = vst.msk [vmem:[%s632_s8 + $0xc8] sm:$0xff] %vm279_vm0, %v272_v27 }
  0x2d   : > { %306 = vst.msk [vmem:[%s632_s8 + $0xd0] sm:$0xff] %vm279_vm0, %v273_v28  ;;  %v277_v34 = vadd.f32 %v600_v1, %v238_v29  ;;  %307 = vst.msk [vmem:[%s632_s8 + $0xd8] sm:$0xff] %vm279_vm0, %v274_v30 }
  0x2e   : > { %308 = vst.msk [vmem:[%s632_s8 + $0xe0] sm:$0xff] %vm279_vm0, %v275_v31  ;;  %309 = vst.msk [vmem:[%s632_s8 + $0xe8] sm:$0xff] %vm279_vm0, %v276_v32  ;;  %v278_v0 = vadd.f32 %v600_v1, %v239_v33 }
  0x2f   : > { %310 = vst.msk [vmem:[%s632_s8 + $0xf0] sm:$0xff] %vm279_vm0, %v277_v34 }
  0x30   : > { %311 = vst.msk [vmem:[%s632_s8 + $0xf8] sm:$0xff] %vm279_vm0, %v278_v0 }
  0x31   : > { %458 = shalt.err (!%p455_p3)
}
  0x32   : > { %s459_s24 = scalar_lea.hbm %s759_s17, 4096  ;;  %s463_s30 = scalar_lea.hbm %s820_s3, 8192 }
  0x33   : > { %p460_p4 = scmp.ne.s32.totalorder %s759_s17, %s459_s24  ;;  %p464_p9 = scmp.lt.u32.totalorder %s759_s17, %s820_s3 }
  0x34   : > { %p465_p10 = scmp.lt.u32.totalorder %s463_s30, %s459_s24  ;;  %p467_p12 = scmp.lt.u32.totalorder %s459_s24, %s759_s17 }
  0x35   : > { %p461_p7 = pnand %p460_p4, %p570_p5 }
  0x36   : > { %p466_p11 = por %p465_p10, %p464_p9 }
  0x37   : > { %p462_p8 = pneg %p461_p7 }
  0x38   : > { %p468_p13 = por %p467_p12, %p466_p11 }
  0x3a   : > { %p469_p0 = pnand %p468_p13, %p462_p8 }
  0x3c   : > { %472 = shalt.err (!%p469_p0)
}
  0x3d   : > { %s510_s6 = smov 128   ;;  %s511_s7 = smov 8  }
  0x3e   : > { %404 = dma.vmem_to_hbm [thread:$0]  (%p570_p5), %s761_s10, 4096, %s759_s17, %s776_s19, %s510_s6, %s510_s6, %s511_s7  }
  0x3f PF: > { %p410_p1 = scmp.ge.s32.totalorder %s507_s15, 2  ;;  %s341_s8 = sand.u32 1, %s495_s12  }
  0x40   : > { %s342_s9 = scalar_lea.sflag [#allocation3], %s341_s8 }
  0x41   : > { %p407_p2 = pnand %p410_p1, %p574_p6 }
  0x43   : > { %490 = dma.done.wait (!%p407_p2), %s342_s9, 4096  }
  0x44   : > { %492 = vsyncadd (!%p407_p2), %s342_s9, 4294963200  ;;  %p13_p3 = scmp.ge.s32.totalorder %s557_s18, 4   ;;  %s823_s12 = smov %s499_s13 }
  0x45   : > { %s824_s13 = smov %s503_s14  ;;  %s825_s14 = smov %s568_s21 }
  0x46   : > { %s826_s15 = smov %s557_s18  ;;  %15 = sbr.rel (!%p13_p3) target bundleno = 3 (0x3), region = 67 }
  0x4d   :  { %347 = vsyncpa [#allocation3], 1 }
  0x4e   :  { %349 = vsyncpa [#allocation3 + $0x1], 1 }

// kernel: conv_batch_block.2
= control target key start
LH: loop header
LB: loop body
LE: loop exit
PB: predicated region body
PF: predicated region fallthrough
CT: control target
= control target key end

     0   :  { %s6523_s15 = smov 0   ;;  %s8436_s0 = inlined_call_operand.vmem [shape: bf16[2,18,18,4], index: 0, kind: input, shape index: {}]   ;;  %s8437_s1 = inlined_call_operand.vmem [shape: bf16[9,4,32], index: 1, kind: input, shape index: {}]   ;;  %s8438_s2 = inlined_call_operand.vmem [shape: f32[1,32], index: 2, kind: input, shape index: {}]   ;;  %s8439_s3 = inlined_call_operand.vmem [shape: f32[2,256,32], index: 3, kind: output, shape index: {0}]   ;;  %s8440_s4 = inlined_call_operand.vmem [shape: f32[2,2,32], index: 4, kind: output, shape index: {1}]  }
   0x1 LB: > { %s5100_s16 = sadd.s32 4294967295, %s6496_s15   ;;  %p5104_p0 = scmp.ge.s32.totalorder %s6496_s15, 1  ;;  %s6496_s15 = sphi %s6523_s15, %s15_s15  }
   0x2   : > { %p165_p1 = scmp.lt.s32.totalorder %s6496_s15, 3 }
   0x4   : > { %p166_p2 = pnand %p5104_p0, %p165_p1 }
   0x6   : > { %169 = sbr.rel (%p166_p2) target bundleno = 607 (0x25f), region = 32 }
   0xd   : > { %v5109_v0 = vld [vmem:[%s8437_s1 + $0x2] sm:$0x3]  ;;  %vm745_vm0 = vcmask 1041408   ;;  %v5336_v1 = vld [vmem:[%s8437_s1 + $0x8] sm:$0x3]  ;;  %p195_p3 = scmp.lt.s32.totalorder %s5100_s16, 1 }
   0xe   : > { %6366 = vmatprep.subr.msk.bf16.mxu1 %vm745_vm0, %v5109_v0  ;;  %6370 = vmatprep.subr.msk.bf16.mxu0 %vm745_vm0, %v5336_v1  ;;  %v747_v2 = vsel %vm745_vm0, %v5109_v0, 0  ;;  %v6541_v3 = vsel %vm745_vm0, %v5336_v1, 0  ;;  %v242_v4 = vld [vmem:[%s8437_s1] sm:$0x3]  ;;  %v5401_v5 = vld [vmem:[%s8437_s1 + $0xa] sm:$0x3] }
   0xf   : > { %8454 = vst [vmem:[#allocation2_spill] sm:$0xff] %v6541_v3  ;;  %5803 = vmatpush3.bf16.msra.mxu1 %v747_v2  ;;  %5939 = vmatpush3.bf16.msra.mxu0 %v6541_v3  ;;  %s8509_s16 = smov (!%p195_p3, %s5100_s16), 1  ;;  %vm259_vm1 = vsmask.f32 3328  ;;  %vm260_vm2 = vsmask.f32 7440 }
  0x10   : > { %6367 = vmatprep.subr.msk.bf16.mxu1 %vm745_vm0, %v242_v4  ;;  %6372 = vmatprep.subr.msk.bf16.mxu0 %vm745_vm0, %v5401_v5  ;;  %s6376_s25 = smul.u32 216, %s8509_s16  ;;  %vm696_vm3 = vcmask 31744   ;;  %v6571_v17 = vsel %vm745_vm0, %v242_v4, 0  ;;  %v6577_v26 = vld [vmem:[%s8437_s1 + $0xc] sm:$0x3]  ;;  %vm6584_vm4 = vmor %vm259_vm1, %vm260_vm2  ;;  %v6590_v37 = vsel %vm745_vm0, %v5401_v5, 0 }
  0x11   : > { %v6594_v41 = vsel %vm745_vm0, %v6577_v26, 0  ;;  %vm1250_vm5 = vcmask 1042432   ;;  %vm1251_vm6 = vcmask 1046532   ;;  %s5648_s19 = sshll.u32 %s8509_s16, 8  ;;  %vm4808_vm8 = vcmask 261120  }
  0x12   : > { %s6558_s28 = scalar_lea.vmem %s8436_s0, %s6376_s25  ;;  %vm6810_vm7 = vmor %vm1250_vm5, %vm1251_vm6  ;;  %s8259_s24 = scalar_lea.vmem %s8439_s3, %s5648_s19  ;;  %vm4910_vm9 = vcmask 253952  }
  0x13   : > { %v210_v6 = vld [vmem:[%s6558_s28] sm:$0xf]  ;;  %v211_v7 = vld [vmem:[%s6558_s28 + $0x4] sm:$0xf]  ;;  %v243_v8 = vld [vmem:[%s6558_s28 + $0x8] sm:$0x1] }
  0x14   : > { %v263_v9 = vshrl.u32 %v210_v6, 16  ;;  %v266_v10 = vshll.u32 %v210_v6, 16  ;;  %v272_v11 = vshll.u32 %v211_v7, 16  ;;  %v276_v12 = vshrl.u32 %v211_v7, 16  ;;  %v5288_v13 = vld [vmem:[%s6558_s28 + $0xc] sm:$0xf] }
  0x15   : > { %v282_v14 = vshll.u32 %v243_v8, 16  ;;  %v6565_v15 = vld [vmem:[%s6558_s28 + $0x10] sm:$0xf]  ;;  %v6568_v16 = vld [vmem:[%s6558_s28 + $0x14] sm:$0x1]  ;;  %v2067_v23 = vshrl.u32 %v5288_v13, 16 }
  0x16   : > { %v265_v18 = vrot.slane %v263_v9, 4  ;;  %v268_v19 = vrot.slane %v266_v10, 5  ;;  %v274_v20 = vrot.slane %v272_v11, 5  ;;  %v278_v21 = vrot.slane %v276_v12, 4  ;;  %v212_v31 = vld [vmem:[%s6558_s28 + $0xc] sm:$0xf] }
  0x17   : > { %v284_v22 = vrot.slane %v282_v14, 5  ;;  %v2070_v24 = vshll.u32 %v5288_v13, 16  ;;  %v2076_v25 = vshll.u32 %v6565_v15, 16  ;;  %v2080_v29 = vshrl.u32 %v6565_v15, 16  ;;  %v213_v36 = vld [vmem:[%s6558_s28 + $0x10] sm:$0xf] }
  0x18   : > { %v269_v27 = vor.u32 %v268_v19, %v265_v18  ;;  %v279_v28 = vor.u32 %v278_v21, %v274_v20  ;;  %v2086_v30 = vshll.u32 %v6568_v16, 16  ;;  %v2069_v33 = vrot.slane %v2067_v23, 4  ;;  %v244_v44 = vld [vmem:[%s6558_s28 + $0x14] sm:$0x1]  ;;  %v5291_v55 = vld [vmem:[%s6558_s28 + $0x18] sm:$0xf] }
  0x19   : > { %v2072_v34 = vrot.slane %v2070_v24, 5  ;;  %v2078_v35 = vrot.slane %v2076_v25, 5  ;;  %v2082_v40 = vrot.slane %v2080_v29, 4  ;;  %v287_v45 = vshrl.u32 %v212_v31, 16  ;;  %v6603_v60 = vld [vmem:[%s6558_s28 + $0x1c] sm:$0xf] }
  0x1a   : > { %v270_v38 = vrot.slane %v269_v27, 4  ;;  %v280_v39 = vrot.slane %v279_v28, 4  ;;  %v2088_v43 = vrot.slane %v2086_v30, 5  ;;  %v290_v46 = vshll.u32 %v212_v31, 16  ;;  %v6611_v1 = vld [vmem:[%s6558_s28 + $0x20] sm:$0x1] }
  0x1b   : > { %v2073_v42 = vor.u32 %v2072_v34, %v2069_v33  ;;  %v2083_v49 = vor.u32 %v2082_v40, %v2078_v35  ;;  %v296_v50 = vshll.u32 %v213_v36, 16  ;;  %v289_v53 = vrot.slane %v287_v45, 4  ;;  %v214_v18 = vld [vmem:[%s6558_s28 + $0x18] sm:$0xf]  ;;  %v215_v23 = vld [vmem:[%s6558_s28 + $0x1c] sm:$0xf] }
  0x1c   : > { %v275_v47 = vsel %vm6584_vm4, %v270_v38, %v274_v20  ;;  %v285_v48 = vsel %vm6584_vm4, %v280_v39, %v284_v22  ;;  %v292_v54 = vrot.slane %v290_v46, 5  ;;  %v300_v58 = vshrl.u32 %v213_v36, 16  ;;  %v245_v31 = vld [vmem:[%s6558_s28 + $0x20] sm:$0x1]  ;;  %v5294_v40 = vld [vmem:[%s6558_s28 + $0x24] sm:$0xf] }
  0x1d   : > { %v5110_v51 = vcombine.low %v275_v47, %v285_v48  ;;  %v2074_v52 = vrot.slane %v2073_v42, 4  ;;  %v2084_v56 = vrot.slane %v2083_v49, 4  ;;  %v298_v57 = vrot.slane %v296_v50, 5  ;;  %v6634_v46 = vld [vmem:[%s6558_s28 + $0x28] sm:$0xf]  ;;  %s5108_s25 = sshll.u32 %s8509_s16, 1 }
  0x1e   : > { %v306_v59 = vshll.u32 %v244_v44, 16  ;;  %v2810_v62 = vrot.slane %v6565_v15, 5  ;;  %v2813_v63 = vrot.slane %v6568_v16, 5  ;;  %v293_v0 = vor.u32 %v292_v54, %v289_v53  ;;  %v6643_v54 = vld [vmem:[%s6558_s28 + $0x2c] sm:$0x1] }
  0x1f   : > { %5804 = vmatprep.mubr.msk.bf16.mxu1 %vm696_vm3, %v5110_v51  ;;  %v2079_v61 = vsel %vm6584_vm4, %v2074_v52, %v2078_v35  ;;  %v2089_v2 = vsel %vm6584_vm4, %v2084_v56, %v2088_v43  ;;  %v302_v4 = vrot.slane %v300_v58, 4  ;;  %v2091_v6 = vshrl.u32 %v5291_v55, 16  ;;  %v5190_v51 = vld [vmem:[%s8437_s1 + $0x4] sm:$0x3]  ;;  %v6843_v16 = vld [vmem:[%s6558_s28 + $0x7c] sm:$0xf] }
  0x20   : > { %v308_v5 = vrot.slane %v306_v59, 5  ;;  %v5337_v7 = vcombine.low %v2079_v61, %v2089_v2  ;;  %v294_v8 = vrot.slane %v293_v0, 4  ;;  %v2094_v9 = vshll.u32 %v5291_v55, 16  ;;  %v216_v0 = vld [vmem:[%s6558_s28 + $0x24] sm:$0xf] }
  0x21   : > { %v2100_v10 = vshll.u32 %v6603_v60, 16  ;;  %v303_v11 = vor.u32 %v302_v4, %v298_v57  ;;  %v2093_v12 = vrot.slane %v2091_v6, 4  ;;  %v2104_v13 = vshrl.u32 %v6603_v60, 16 }
  0x22   : > { %v2110_v14 = vshll.u32 %v6611_v1, 16  ;;  %5940 = vmatprep.mubr.msk.bf16.mxu0 %vm696_vm3, %v5337_v7  ;;  %v299_v19 = vsel %vm6584_vm4, %v294_v8, %v298_v57  ;;  %v2096_v20 = vrot.slane %v2094_v9, 5  ;;  %v2817_v22 = vrot.slane %v6603_v60, 5  ;;  %v217_v7 = vld [vmem:[%s6558_s28 + $0x28] sm:$0xf] }
  0x23   : > { %v2102_v21 = vrot.slane %v2100_v10, 5  ;;  %v304_v24 = vrot.slane %v303_v11, 4  ;;  %v2106_v25 = vrot.slane %v2104_v13, 4  ;;  %v2820_v28 = vrot.slane %v6611_v1, 5  ;;  %v246_v13 = vld [vmem:[%s6558_s28 + $0x2c] sm:$0x1] }
  0x24   : > { %v2112_v27 = vrot.slane %v2110_v14, 5  ;;  %v2097_v29 = vor.u32 %v2096_v20, %v2093_v12  ;;  %v6627_v30 = vrot.slane %v2817_v22, 4  ;;  %v311_v33 = vshrl.u32 %v214_v18, 16 }
  0x25   : > { %v314_v34 = vshll.u32 %v214_v18, 16  ;;  %v309_v35 = vsel %vm6584_vm4, %v304_v24, %v308_v5  ;;  %v2107_v36 = vor.u32 %v2106_v25, %v2102_v21  ;;  %v320_v38 = vshll.u32 %v215_v23, 16  ;;  %v5297_v24 = vld [vmem:[%s6558_s28 + $0x30] sm:$0xf] }
  0x26   : > { %v324_v39 = vshrl.u32 %v215_v23, 16  ;;  %v5111_v42 = vcombine.low %v299_v19, %v309_v35  ;;  %v2098_v43 = vrot.slane %v2097_v29, 4  ;;  %v313_v44 = vrot.slane %v311_v33, 4  ;;  %v6663_v33 = vld [vmem:[%s6558_s28 + $0x34] sm:$0xf] }
  0x27   : > { %v316_v45 = vrot.slane %v314_v34, 5  ;;  %v2108_v47 = vrot.slane %v2107_v36, 4  ;;  %v322_v48 = vrot.slane %v320_v38, 5  ;;  %v330_v50 = vshll.u32 %v245_v31, 16 }
  0x28   : > { %v326_v49 = vrot.slane %v324_v39, 4  ;;  %5805 = vmatmul.mubr.msk.bf16.vlgmr.msra.gmra.mrb[0].mxu1 %vm696_vm3, %v5111_v42  ;;  %v2103_v52 = vsel %vm6584_vm4, %v2098_v43, %v2102_v21  ;;  %v2115_v55 = vshrl.u32 %v5294_v40, 16  ;;  %v2118_v56 = vshll.u32 %v5294_v40, 16  ;;  %v6671_v40 = vld [vmem:[%s6558_s28 + $0x38] sm:$0x1] }
  0x29   : > { %v317_v53 = vor.u32 %v316_v45, %v313_v44  ;;  %5837 = vmatpush3.bf16.msra.mxu1 %v6571_v17  ;;  %v2113_v57 = vsel %vm6584_vm4, %v2108_v47, %v2112_v27  ;;  %v332_v59 = vrot.slane %v330_v50, 5  ;;  %v2124_v61 = vshll.u32 %v6634_v46, 16 }
  0x2a   : > { %v327_v58 = vor.u32 %v326_v49, %v322_v48  ;;  %v5338_v2 = vcombine.low %v2103_v52, %v2113_v57  ;;  %v2117_v5 = vrot.slane %v2115_v55, 4  ;;  %v2120_v6 = vrot.slane %v2118_v56, 5  ;;  %6368 = vmatprep.subr.msk.bf16.mxu1 %vm745_vm0, %v5190_v51  ;;  %v218_v52 = vld [vmem:[%s6558_s28 + $0x30] sm:$0xf] }
  0x2b   : > { %v318_v4 = vrot.slane %v317_v53, 4  ;;  %v2126_v9 = vrot.slane %v2124_v61, 5  ;;  %v2128_v17 = vshrl.u32 %v6634_v46, 16  ;;  %v2134_v10 = vshll.u32 %v6643_v54, 16 }
  0x2c   : > { %v328_v8 = vrot.slane %v327_v58, 4  ;;  %5941 = vmatmul.mubr.msk.bf16.vlgmr.msra.gmra.mrb[0].mxu0 %vm696_vm3, %v5338_v2  ;;  %v2121_v12 = vor.u32 %v2120_v6, %v2117_v5  ;;  %v335_v14 = vshrl.u32 %v216_v0, 16  ;;  %v338_v18 = vshll.u32 %v216_v0, 16  ;;  %v219_v58 = vld [vmem:[%s6558_s28 + $0x34] sm:$0xf] }
  0x2d   : > { %v323_v11 = vsel %vm6584_vm4, %v318_v4, %v322_v48  ;;  %5973 = vmatpush3.bf16.msra.mxu0 %v6590_v37  ;;  %v2130_v20 = vrot.slane %v2128_v17, 4  ;;  %v2136_v21 = vrot.slane %v2134_v10, 5  ;;  %v344_v23 = vshll.u32 %v217_v7, 16  ;;  %v247_v4 = vld [vmem:[%s6558_s28 + $0x38] sm:$0x1] }
  0x2e   : > { %v333_v19 = vsel %vm6584_vm4, %v328_v8, %v332_v59  ;;  %v2122_v27 = vrot.slane %v2121_v12, 4  ;;  %v337_v29 = vrot.slane %v335_v14, 4  ;;  %v340_v31 = vrot.slane %v338_v18, 5  ;;  %6373 = vmatprep.subr.msk.bf16.mxu0 %vm745_vm0, %v6577_v26  ;;  %v5300_v12 = vld [vmem:[%s6558_s28 + $0x3c] sm:$0xf] }
  0x2f   : > { %v5112_v25 = vcombine.low %v323_v11, %v333_v19  ;;  %v2131_v34 = vor.u32 %v2130_v20, %v2126_v9  ;;  %v346_v35 = vrot.slane %v344_v23, 5  ;;  %v348_v37 = vshrl.u32 %v217_v7, 16  ;;  %v6688_v20 = vld [vmem:[%s6558_s28 + $0x40] sm:$0xf] }
  0x30   : > { %v354_v36 = vshll.u32 %v246_v13, 16  ;;  %v2127_v38 = vsel %vm6584_vm4, %v2122_v27, %v2126_v9  ;;  %v341_v39 = vor.u32 %v340_v31, %v337_v29  ;;  %v2139_v42 = vshrl.u32 %v5297_v24, 16 }
  0x31   : > { %5808 = vmatprep.mubr.msk.bf16.mxu1 %vm696_vm3, %v5112_v25  ;;  %v2142_v43 = vshll.u32 %v5297_v24, 16  ;;  %v2132_v44 = vrot.slane %v2131_v34, 4  ;;  %v350_v45 = vrot.slane %v348_v37, 4  ;;  %v2148_v26 = vshll.u32 %v6663_v33, 16  ;;  %v6693_v34 = vld [vmem:[%s6558_s28 + $0x44] sm:$0x1] }
  0x32   : > { %v356_v47 = vrot.slane %v354_v36, 5  ;;  %v342_v48 = vrot.slane %v341_v39, 4  ;;  %v2141_v49 = vrot.slane %v2139_v42, 4  ;;  %v2152_v51 = vshrl.u32 %v6663_v33, 16  ;;  %v220_v42 = vld [vmem:[%s6558_s28 + $0x3c] sm:$0xf] }
  0x33   : > { %v2144_v50 = vrot.slane %v2142_v43, 5  ;;  %v2137_v53 = vsel %vm6584_vm4, %v2132_v44, %v2136_v21  ;;  %v351_v55 = vor.u32 %v350_v45, %v346_v35  ;;  %v2150_v56 = vrot.slane %v2148_v26, 5  ;;  %v221_v26 = vld [vmem:[%s6558_s28 + $0x40] sm:$0xf] }
  0x34   : > { %v2158_v57 = vshll.u32 %v6671_v40, 16  ;;  %v5339_v59 = vcombine.low %v2127_v38, %v2137_v53  ;;  %v347_v61 = vsel %vm6584_vm4, %v342_v48, %v346_v35  ;;  %v2154_v2 = vrot.slane %v2152_v51, 4 }
  0x35   : > { %v2145_v0 = vor.u32 %v2144_v50, %v2141_v49  ;;  %v352_v5 = vrot.slane %v351_v55, 4  ;;  %v359_v7 = vshrl.u32 %v218_v52, 16  ;;  %v362_v8 = vshll.u32 %v218_v52, 16 }
  0x36   : > { %v2160_v6 = vrot.slane %v2158_v57, 5  ;;  %5944 = vmatprep.mubr.msk.bf16.mxu0 %vm696_vm3, %v5339_v59  ;;  %v2155_v17 = vor.u32 %v2154_v2, %v2150_v56  ;;  %v368_v10 = vshll.u32 %v219_v58, 16  ;;  %v372_v11 = vshrl.u32 %v219_v58, 16  ;;  %v5303_v2 = vld [vmem:[%s6558_s28 + $0x48] sm:$0xf] }
  0x37   : > { %v2146_v9 = vrot.slane %v2145_v0, 4  ;;  %v357_v13 = vsel %vm6584_vm4, %v352_v5, %v356_v47  ;;  %v361_v14 = vrot.slane %v359_v7, 4  ;;  %v364_v18 = vrot.slane %v362_v8, 5  ;;  %v6711_v8 = vld [vmem:[%s6558_s28 + $0x4c] sm:$0xf] }
  0x38   : > { %v378_v19 = vshll.u32 %v247_v4, 16  ;;  %v5113_v21 = vcombine.low %v347_v61, %v357_v13  ;;  %v2156_v24 = vrot.slane %v2155_v17, 4  ;;  %v370_v25 = vrot.slane %v368_v10, 5  ;;  %v248_v61 = vld [vmem:[%s6558_s28 + $0x44] sm:$0x1] }
  0x39   : > { %v2151_v23 = vsel %vm6584_vm4, %v2146_v9, %v2150_v56  ;;  %v365_v27 = vor.u32 %v364_v18, %v361_v14  ;;  %v374_v29 = vrot.slane %v372_v11, 4  ;;  %v2163_v35 = vshrl.u32 %v5300_v12, 16 }
  0x3a   : > { %v380_v31 = vrot.slane %v378_v19, 5  ;;  %5809 = vmatmul.mubr.msk.bf16.gmra.mrb[4].mxu1 %vm696_vm3, %v5113_v21  ;;  %v2161_v37 = vsel %vm6584_vm4, %v2156_v24, %v2160_v6  ;;  %v2166_v36 = vshll.u32 %v5300_v12, 16  ;;  %v2172_v38 = vshll.u32 %v6688_v20, 16 }
  0x3b   : > { %v2176_v39 = vshrl.u32 %v6688_v20, 16  ;;  %v5340_v43 = vcombine.low %v2151_v23, %v2161_v37  ;;  %v366_v44 = vrot.slane %v365_v27, 4  ;;  %v375_v45 = vor.u32 %v374_v29, %v370_v25  ;;  %v6719_v23 = vld [vmem:[%s6558_s28 + $0x50] sm:$0x1]  ;;  %v6723_v27 = vld [vmem:[%s6558_s28 + $0x48] sm:$0xf] }
  0x3c   : > { %v2165_v47 = vrot.slane %v2163_v35, 4  ;;  %v2168_v48 = vrot.slane %v2166_v36, 5  ;;  %v2174_v49 = vrot.slane %v2172_v38, 5  ;;  %v2182_v51 = vshll.u32 %v6693_v34, 16  ;;  %v6726_v36 = vld [vmem:[%s6558_s28 + $0x4c] sm:$0xf] }
  0x3d   : > { %v2178_v50 = vrot.slane %v2176_v39, 4  ;;  %5945 = vmatmul.mubr.msk.bf16.gmra.mrb[4].mxu0 %vm696_vm3, %v5340_v43  ;;  %v371_v52 = vsel %vm6584_vm4, %v366_v44, %v370_v25  ;;  %v376_v53 = vrot.slane %v375_v45, 4  ;;  %v383_v55 = vshrl.u32 %v220_v42, 16 }
  0x3e   : > { %v386_v56 = vshll.u32 %v220_v42, 16  ;;  %v2169_v57 = vor.u32 %v2168_v48, %v2165_v47  ;;  %v2184_v59 = vrot.slane %v2182_v51, 5  ;;  %v392_v0 = vshll.u32 %v221_v26, 16 }
  0x3f   : > { %v2179_v58 = vor.u32 %v2178_v50, %v2174_v49  ;;  %v381_v4 = vsel %vm6584_vm4, %v376_v53, %v380_v31  ;;  %v385_v5 = vrot.slane %v383_v55, 4  ;;  %v396_v7 = vshrl.u32 %v221_v26, 16  ;;  %v249_v26 = vld [vmem:[%s6558_s28 + $0x50] sm:$0x1]  ;;  %v5306_v53 = vld [vmem:[%s6558_s28 + $0x54] sm:$0xf] }
  0x40   : > { %v388_v6 = vrot.slane %v386_v56, 5  ;;  %v5114_v9 = vcombine.low %v371_v52, %v381_v4  ;;  %v2170_v17 = vrot.slane %v2169_v57, 4  ;;  %v394_v11 = vrot.slane %v392_v0, 5  ;;  %v6742_v4 = vld [vmem:[%s6558_s28 + $0x58] sm:$0xf] }
  0x41   : > { %v2180_v10 = vrot.slane %v2179_v58, 4  ;;  %v398_v13 = vrot.slane %v396_v7, 4  ;;  %v402_v14 = vshll.u32 %v248_v61, 16  ;;  %v2187_v18 = vshrl.u32 %v5303_v2, 16 }
  0x42   : > { %v389_v12 = vor.u32 %v388_v6, %v385_v5  ;;  %5812 = vmatprep.mubr.msk.bf16.mxu1 %vm696_vm3, %v5114_v9  ;;  %v2175_v19 = vsel %vm6584_vm4, %v2170_v17, %v2174_v49  ;;  %v2190_v24 = vshll.u32 %v5303_v2, 16  ;;  %v2196_v25 = vshll.u32 %v6711_v8, 16 }
  0x43   : > { %v2185_v21 = vsel %vm6584_vm4, %v2180_v10, %v2184_v59  ;;  %v399_v35 = vor.u32 %v398_v13, %v394_v11  ;;  %v404_v37 = vrot.slane %v402_v14, 5  ;;  %v2189_v38 = vrot.slane %v2187_v18, 4 }
  0x44   : > { %v5341_v29 = vcombine.low %v2175_v19, %v2185_v21  ;;  %v390_v31 = vrot.slane %v389_v12, 4  ;;  %v2192_v39 = vrot.slane %v2190_v24, 5  ;;  %v2198_v42 = vrot.slane %v2196_v25, 5  ;;  %v6748_v12 = vld [vmem:[%s6558_s28 + $0x5c] sm:$0x1] }
  0x45   : > { %v2200_v43 = vshrl.u32 %v6711_v8, 16  ;;  %v400_v45 = vrot.slane %v399_v35, 4  ;;  %v2206_v47 = vshll.u32 %v6719_v23, 16  ;;  %v407_v48 = vshrl.u32 %v6723_v27, 16  ;;  %v6752_v24 = vld [vmem:[%s6558_s28 + $0x54] sm:$0xf] }
  0x46   : > { %5948 = vmatprep.mubr.msk.bf16.mxu0 %vm696_vm3, %v5341_v29  ;;  %v395_v44 = vsel %vm6584_vm4, %v390_v31, %v394_v11  ;;  %v2193_v49 = vor.u32 %v2192_v39, %v2189_v38  ;;  %v410_v51 = vshll.u32 %v6723_v27, 16  ;;  %v416_v52 = vshll.u32 %v6726_v36, 16 }
  0x47   : > { %v2202_v50 = vrot.slane %v2200_v43, 4  ;;  %v405_v55 = vsel %vm6584_vm4, %v400_v45, %v404_v37  ;;  %v2208_v56 = vrot.slane %v2206_v47, 5  ;;  %v409_v57 = vrot.slane %v407_v48, 4  ;;  %v6758_v37 = vld [vmem:[%s6558_s28 + $0x58] sm:$0xf] }
  0x48   : > { %v420_v58 = vshrl.u32 %v6726_v36, 16  ;;  %v5115_v59 = vcombine.low %v395_v44, %v405_v55  ;;  %v2194_v61 = vrot.slane %v2193_v49, 4  ;;  %v412_v2 = vrot.slane %v410_v51, 5 }
  0x49   : > { %v2203_v0 = vor.u32 %v2202_v50, %v2198_v42  ;;  %v418_v5 = vrot.slane %v416_v52, 5  ;;  %v426_v7 = vshll.u32 %v249_v26, 16  ;;  %v2211_v9 = vshrl.u32 %v5306_v53, 16  ;;  %v250_v26 = vld [vmem:[%s6558_s28 + $0x5c] sm:$0x1] }
  0x4a   : > { %v422_v6 = vrot.slane %v420_v58, 4  ;;  %5813 = vmatmul.mubr.msk.bf16.gmra.mrb[8].mxu1 %vm696_vm3, %v5115_v59  ;;  %v2199_v17 = vsel %vm6584_vm4, %v2194_v61, %v2198_v42  ;;  %v413_v11 = vor.u32 %v412_v2, %v409_v57  ;;  %v2214_v13 = vshll.u32 %v5306_v53, 16  ;;  %v5309_v53 = vld [vmem:[%s6558_s28 + $0x60] sm:$0xf]  ;;  %v6772_v59 = vld [vmem:[%s6558_s28 + $0x64] sm:$0xf] }
  0x4b   : > { %v2204_v10 = vrot.slane %v2203_v0, 4  ;;  %v428_v18 = vrot.slane %v426_v7, 5  ;;  %v2213_v19 = vrot.slane %v2211_v9, 4  ;;  %v2220_v21 = vshll.u32 %v6742_v4, 16  ;;  %v6779_v9 = vld [vmem:[%s6558_s28 + $0x68] sm:$0x1] }
  0x4c   : > { %v423_v14 = vor.u32 %v422_v6, %v418_v5  ;;  %v414_v29 = vrot.slane %v413_v11, 4  ;;  %v2216_v31 = vrot.slane %v2214_v13, 5  ;;  %v2224_v35 = vshrl.u32 %v6742_v4, 16 }
  0x4d   : > { %v2209_v25 = vsel %vm6584_vm4, %v2204_v10, %v2208_v56  ;;  %v2222_v42 = vrot.slane %v2220_v21, 5  ;;  %v2230_v43 = vshll.u32 %v6748_v12, 16  ;;  %v431_v48 = vshrl.u32 %v6752_v24, 16 }
  0x4e   : > { %v5342_v38 = vcombine.low %v2199_v17, %v2209_v25  ;;  %v424_v39 = vrot.slane %v423_v14, 4  ;;  %v419_v44 = vsel %vm6584_vm4, %v414_v29, %v418_v5  ;;  %v2217_v45 = vor.u32 %v2216_v31, %v2213_v19  ;;  %v6783_v19 = vld [vmem:[%s6558_s28 + $0x60] sm:$0xf] }
  0x4f   : > { %v2226_v47 = vrot.slane %v2224_v35, 4  ;;  %v2232_v50 = vrot.slane %v2230_v43, 5  ;;  %v434_v51 = vshll.u32 %v6752_v24, 16  ;;  %v440_v52 = vshll.u32 %v6758_v37, 16  ;;  %v6789_v35 = vld [vmem:[%s6558_s28 + $0x64] sm:$0xf] }
  0x50   : > { %5949 = vmatmul.mubr.msk.bf16.gmra.mrb[8].mxu0 %vm696_vm3, %v5342_v38  ;;  %v429_v49 = vsel %vm6584_vm4, %v424_v39, %v428_v18  ;;  %v2218_v56 = vrot.slane %v2217_v45, 4  ;;  %v433_v58 = vrot.slane %v431_v48, 4  ;;  %v444_v2 = vshrl.u32 %v6758_v37, 16 }
  0x51   : > { %v5116_v55 = vcombine.low %v419_v44, %v429_v49  ;;  %v2227_v57 = vor.u32 %v2226_v47, %v2222_v42  ;;  %v436_v61 = vrot.slane %v434_v51, 5  ;;  %v442_v0 = vrot.slane %v440_v52, 5 }
  0x52   : > { %v450_v5 = vshll.u32 %v250_v26, 16  ;;  %v2223_v6 = vsel %vm6584_vm4, %v2218_v56, %v2222_v42  ;;  %v2235_v17 = vshrl.u32 %v5309_v53, 16  ;;  %v2238_v10 = vshll.u32 %v5309_v53, 16 }
  0x53   : > { %5816 = vmatprep.mubr.msk.bf16.mxu1 %vm696_vm3, %v5116_v55  ;;  %v2228_v7 = vrot.slane %v2227_v57, 4  ;;  %v437_v11 = vor.u32 %v436_v61, %v433_v58  ;;  %v446_v13 = vrot.slane %v444_v2, 4  ;;  %v2244_v18 = vshll.u32 %v6772_v59, 16  ;;  %v5369_v58 = vld [vmem:[%s6558_s28 + $0xc] sm:$0xe] }
  0x54   : > { %v452_v14 = vrot.slane %v450_v5, 5  ;;  %v2237_v25 = vrot.slane %v2235_v17, 4  ;;  %v2240_v29 = vrot.slane %v2238_v10, 5  ;;  %v2248_v31 = vshrl.u32 %v6772_v59, 16 }
  0x55   : > { %v2233_v21 = vsel %vm6584_vm4, %v2228_v7, %v2232_v50  ;;  %v438_v39 = vrot.slane %v437_v11, 4  ;;  %v447_v42 = vor.u32 %v446_v13, %v442_v0  ;;  %v2246_v43 = vrot.slane %v2244_v18, 5  ;;  %v251_v50 = vld [vmem:[%s6558_s28 + $0x68] sm:$0x1] }
  0x56   : > { %v5343_v38 = vcombine.low %v2223_v6, %v2233_v21  ;;  %v2241_v44 = vor.u32 %v2240_v29, %v2237_v25  ;;  %v2250_v45 = vrot.slane %v2248_v31, 4  ;;  %v2254_v47 = vshll.u32 %v6779_v9, 16  ;;  %v6817_v29 = vld [vmem:[%s6558_s28 + $0x70] sm:$0xf] }
  0x57   : > { %v455_v26 = vshrl.u32 %v6783_v19, 16  ;;  %v443_v48 = vsel %vm6584_vm4, %v438_v39, %v442_v0  ;;  %v448_v49 = vrot.slane %v447_v42, 4  ;;  %v458_v51 = vshll.u32 %v6783_v19, 16  ;;  %v6804_v0 = vld [vmem:[%s6558_s28 + $0x6c] sm:$0xf] }
  0x58   : > { %5952 = vmatprep.mubr.msk.bf16.mxu0 %vm696_vm3, %v5343_v38  ;;  %v464_v52 = vshll.u32 %v6789_v35, 16  ;;  %v2242_v53 = vrot.slane %v2241_v44, 4  ;;  %v2251_v55 = vor.u32 %v2250_v45, %v2246_v43  ;;  %v2256_v56 = vrot.slane %v2254_v47, 5 }
  0x59   : > { %v457_v57 = vrot.slane %v455_v26, 4  ;;  %v453_v61 = vsel %vm6584_vm4, %v448_v49, %v452_v14  ;;  %v460_v2 = vrot.slane %v458_v51, 5  ;;  %v468_v6 = vshrl.u32 %v6789_v35, 16  ;;  %v252_v26 = vld [vmem:[%s6558_s28 + $0x74] sm:$0x1] }
  0x5a   : > { %v466_v5 = vrot.slane %v464_v52, 5  ;;  %v5117_v7 = vcombine.low %v443_v48, %v453_v61  ;;  %v2247_v17 = vsel %vm6584_vm4, %v2242_v53, %v2246_v43  ;;  %v2252_v10 = vrot.slane %v2251_v55, 4  ;;  %v5370_v48 = vld [vmem:[%s6558_s28 + $0x18] sm:$0xe] }
  0x5b   : > { %v474_v11 = vshll.u32 %v251_v50, 16  ;;  %v461_v14 = vor.u32 %v460_v2, %v457_v57  ;;  %v470_v18 = vrot.slane %v468_v6, 4  ;;  %v5385_v21 = vrot.slane %v5369_v58, 9  ;;  %v6836_v53 = vld [vmem:[%s6558_s28 + $0x78] sm:$0xf] }
  0x5c   : > { %v2812_v25 = vrot.slane %v2810_v62, 4  ;;  %5817 = vmatmul.mubr.msk.bf16.gmra.mrb[12].mxu1 %vm696_vm3, %v5117_v7  ;;  %v2257_v31 = vsel %vm6584_vm4, %v2252_v10, %v2256_v56  ;;  %v479_v39 = vshrl.u32 %v6804_v0, 16  ;;  %v482_v42 = vshll.u32 %v6804_v0, 16  ;;  %v253_v57 = vld [vmem:[%s6558_s28 + $0x80] sm:$0x1] }
  0x5d   : > { %v476_v38 = vrot.slane %v474_v11, 5  ;;  %v5344_v43 = vcombine.low %v2247_v17, %v2257_v31  ;;  %v462_v44 = vrot.slane %v461_v14, 4  ;;  %v471_v45 = vor.u32 %v470_v18, %v466_v5  ;;  %v5371_v10 = vld [vmem:[%s6558_s28 + $0x24] sm:$0xe] }
  0x5e   : > { %v2811_v47 = vsel %vm6810_vm7, %v5385_v21, %v2810_v62  ;;  %v2814_v49 = vsel %vm6810_vm7, %v2812_v25, %v2813_v63  ;;  %v481_v50 = vrot.slane %v479_v39, 4  ;;  %v484_v51 = vrot.slane %v482_v42, 5  ;;  %v6862_v39 = vld [vmem:[%s6558_s28 + $0x84] sm:$0xf] }
  0x5f   : > { %v488_v52 = vshll.u32 %v6817_v29, 16  ;;  %5953 = vmatmul.mubr.msk.bf16.gmra.mrb[12].mxu0 %vm696_vm3, %v5344_v43  ;;  %v467_v15 = vsel %vm6584_vm4, %v462_v44, %v466_v5  ;;  %v472_v62 = vrot.slane %v471_v45, 4  ;;  %v5402_v55 = vcombine.low %v2811_v47, %v2814_v49  ;;  %v6870_v43 = vld [vmem:[%s6558_s28 + $0x88] sm:$0xf] }
  0x60   : > { %v492_v56 = vshrl.u32 %v6817_v29, 16  ;;  %v485_v63 = vor.u32 %v484_v51, %v481_v50  ;;  %v498_v61 = vshll.u32 %v252_v26, 16  ;;  %v5386_v2 = vrot.slane %v5370_v48, 9 }
  0x61   : > { %v490_v58 = vrot.slane %v488_v52, 5  ;;  %v477_v6 = vsel %vm6584_vm4, %v472_v62, %v476_v38  ;;  %5974 = vmatprep.mubr.msk.bf16.mxu0 %vm696_vm3, %v5402_v55  ;;  %v2821_v5 = vsel %vm6810_vm7, %v6627_v30, %v2820_v28  ;;  %v503_v17 = vshrl.u32 %v6836_v53, 16  ;;  %v254_v52 = vld [vmem:[%s6558_s28 + $0x8c] sm:$0x1] }
  0x62   : > { %v494_v7 = vrot.slane %v492_v56, 4  ;;  %v5118_v11 = vcombine.low %v467_v15, %v477_v6  ;;  %v486_v14 = vrot.slane %v485_v63, 4  ;;  %v500_v18 = vrot.slane %v498_v61, 5 }
  0x63   : > { %v2818_v21 = vsel %vm6810_vm7, %v5386_v2, %v2817_v22  ;;  %v505_v38 = vrot.slane %v503_v17, 4  ;;  %v506_v1 = vshll.u32 %v6836_v53, 16  ;;  %v512_v30 = vshll.u32 %v6843_v16, 16  ;;  %v6875_v22 = vld [vmem:[%s8437_s1 + $0xe] sm:$0x3] }
  0x64   : > { %v495_v25 = vor.u32 %v494_v7, %v490_v58  ;;  %v5403_v31 = vcombine.low %v2818_v21, %v2821_v5  ;;  %5820 = vmatprep.mubr.msk.bf16.mxu1 %vm696_vm3, %v5118_v11  ;;  %v491_v28 = vsel %vm6584_vm4, %v486_v14, %v490_v58  ;;  %v516_v60 = vshrl.u32 %v6843_v16, 16  ;;  %v6894_v5 = vld [vmem:[%s6558_s28 + $0x90] sm:$0xf] }
  0x65   : > { %v522_v42 = vshll.u32 %v253_v57, 16  ;;  %v508_v45 = vrot.slane %v506_v1, 5  ;;  %v5387_v47 = vrot.slane %v5371_v10, 9  ;;  %v2824_v26 = vrot.slane %v6634_v46, 5  ;;  %v5372_v57 = vld [vmem:[%s6558_s28 + $0x30] sm:$0xe] }
  0x66   : > { %v496_v44 = vrot.slane %v495_v25, 4  ;;  %v514_v48 = vrot.slane %v512_v30, 5  ;;  %v518_v49 = vrot.slane %v516_v60, 4  ;;  %v2827_v51 = vrot.slane %v6643_v54, 5  ;;  %v6906_v30 = vld [vmem:[%s6558_s28 + $0x94] sm:$0xf] }
  0x67   : > { %v524_v50 = vrot.slane %v522_v42, 5  ;;  %5975 = vmatmul.mubr.msk.bf16.vlgmr.msra.gmra.mrb[0].mxu0 %vm696_vm3, %v5403_v31  ;;  %v509_v62 = vor.u32 %v508_v45, %v505_v38  ;;  %v2825_v55 = vsel %vm6810_vm7, %v5387_v47, %v2824_v26  ;;  %v2826_v56 = vrot.slane %v2824_v26, 4  ;;  %v255_v60 = vld [vmem:[%s6558_s28 + $0x98] sm:$0x1]  ;;  %v5373_v26 = vld [vmem:[%s6558_s28 + $0x3c] sm:$0xe] }
  0x68   : > { %v501_v15 = vsel %vm6584_vm4, %v496_v44, %v500_v18  ;;  %6007 = vmatpush3.bf16.msra.mxu0 %v6594_v41  ;;  %v519_v46 = vor.u32 %v518_v49, %v514_v48  ;;  %v527_v58 = vshrl.u32 %v6862_v39, 16  ;;  %v530_v54 = vshll.u32 %v6862_v39, 16 }
  0x69   : > { %v5119_v63 = vcombine.low %v491_v28, %v501_v15  ;;  %v510_v61 = vrot.slane %v509_v62, 4  ;;  %v2828_v2 = vsel %vm6810_vm7, %v2826_v56, %v2827_v51  ;;  %v536_v6 = vshll.u32 %v6870_v43, 16  ;;  %6374 = vmatprep.subr.msk.bf16.mxu0 %vm745_vm0, %v6875_v22 }
  0x6a   : > { %v540_v7 = vshrl.u32 %v6870_v43, 16  ;;  %v520_v41 = vrot.slane %v519_v46, 4  ;;  %v5404_v17 = vcombine.low %v2825_v55, %v2828_v2  ;;  %v529_v10 = vrot.slane %v527_v58, 4  ;;  %v6926_v46 = vld [vmem:[%s6558_s28 + $0xa0] sm:$0xf] }
  0x6b   : > { %5821 = vmatmul.mubr.msk.bf16.gmra.mrb[16].mxu1 %vm696_vm3, %v5119_v63  ;;  %v532_v11 = vrot.slane %v530_v54, 5  ;;  %v515_v14 = vsel %vm6584_vm4, %v510_v61, %v514_v48  ;;  %v538_v18 = vrot.slane %v536_v6, 5  ;;  %v546_v25 = vshll.u32 %v254_v52, 16  ;;  %v6915_v52 = vld [vmem:[%s6558_s28 + $0x9c] sm:$0xf] }
  0x6c   : > { %v542_v21 = vrot.slane %v540_v7, 4  ;;  %v525_v31 = vsel %vm6584_vm4, %v520_v41, %v524_v50  ;;  %5978 = vmatprep.mubr.msk.bf16.mxu0 %vm696_vm3, %v5404_v17  ;;  %v5388_v1 = vrot.slane %v5372_v57, 9  ;;  %v2831_v28 = vrot.slane %v6663_v33, 5 }
  0x6d   : > { %v533_v38 = vor.u32 %v532_v11, %v529_v10  ;;  %v5120_v42 = vcombine.low %v515_v14, %v525_v31  ;;  %v548_v45 = vrot.slane %v546_v25, 5  ;;  %v2834_v47 = vrot.slane %v6671_v40, 5  ;;  %v256_v10 = vld [vmem:[%s6558_s28 + $0xa4] sm:$0x1]  ;;  %v5374_v11 = vld [vmem:[%s6558_s28 + $0x48] sm:$0xe] }
  0x6e   : > { %v543_v44 = vor.u32 %v542_v21, %v538_v18  ;;  %v2832_v49 = vsel %vm6810_vm7, %v5388_v1, %v2831_v28  ;;  %v2833_v50 = vrot.slane %v2831_v28, 4  ;;  %v551_v51 = vshrl.u32 %v6894_v5, 16 }
  0x6f   : > { %v534_v48 = vrot.slane %v533_v38, 4  ;;  %5824 = vmatprep.mubr.msk.bf16.mxu1 %vm696_vm3, %v5120_v42  ;;  %v554_v15 = vshll.u32 %v6894_v5, 16  ;;  %v560_v62 = vshll.u32 %v6906_v30, 16  ;;  %v564_v40 = vshrl.u32 %v6906_v30, 16 }
  0x70   : > { %v544_v33 = vrot.slane %v543_v44, 4  ;;  %v2835_v56 = vsel %vm6810_vm7, %v2833_v50, %v2834_v47  ;;  %v553_v57 = vrot.slane %v551_v51, 4  ;;  %v570_v63 = vshll.u32 %v255_v60, 16 }
  0x71   : > { %v539_v55 = vsel %vm6584_vm4, %v534_v48, %v538_v18  ;;  %v5405_v54 = vcombine.low %v2832_v49, %v2835_v56  ;;  %v556_v61 = vrot.slane %v554_v15, 5  ;;  %v562_v2 = vrot.slane %v560_v62, 5  ;;  %v6952_v56 = vld [vmem:[%s6558_s28 + $0xac] sm:$0xf] }
  0x72   : > { %v549_v58 = vsel %vm6584_vm4, %v544_v33, %v548_v45  ;;  %v566_v7 = vrot.slane %v564_v40, 4  ;;  %v572_v41 = vrot.slane %v570_v63, 5  ;;  %v5389_v17 = vrot.slane %v5373_v26, 9  ;;  %v6947_v33 = vld [vmem:[%s6558_s28 + $0xa8] sm:$0xf] }
  0x73   : > { %v5121_v6 = vcombine.low %v539_v55, %v549_v58  ;;  %5979 = vmatmul.mubr.msk.bf16.gmra.mrb[4].mxu0 %vm696_vm3, %v5405_v54  ;;  %v557_v14 = vor.u32 %v556_v61, %v553_v57  ;;  %v2838_v18 = vrot.slane %v6688_v20, 5  ;;  %v2841_v21 = vrot.slane %v6693_v34, 5  ;;  %v257_v61 = vld [vmem:[%s6558_s28 + $0xb0] sm:$0x1] }
  0x74   : > { %v575_v25 = vshrl.u32 %v6915_v52, 16  ;;  %v567_v31 = vor.u32 %v566_v7, %v562_v2  ;;  %v578_v38 = vshll.u32 %v6915_v52, 16  ;;  %v584_v1 = vshll.u32 %v6926_v46, 16 }
  0x75   : > { %5825 = vmatmul.mubr.msk.bf16.gmra.mrb[20].mxu1 %vm696_vm3, %v5121_v6  ;;  %v588_v28 = vshrl.u32 %v6926_v46, 16  ;;  %v558_v60 = vrot.slane %v557_v14, 4  ;;  %v2839_v42 = vsel %vm6810_vm7, %v5389_v17, %v2838_v18  ;;  %v2840_v20 = vrot.slane %v2838_v18, 4  ;;  %v6967_v14 = vld [vmem:[%s6558_s28 + $0xb4] sm:$0xf] }
  0x76   : > { %v577_v44 = vrot.slane %v575_v25, 4  ;;  %v568_v34 = vrot.slane %v567_v31, 4  ;;  %v580_v45 = vrot.slane %v578_v38, 5  ;;  %v586_v47 = vrot.slane %v584_v1, 5 }
  0x77   : > { %v590_v26 = vrot.slane %v588_v28, 4  ;;  %v563_v48 = vsel %vm6584_vm4, %v558_v60, %v562_v2  ;;  %v2842_v49 = vsel %vm6810_vm7, %v2840_v20, %v2841_v21  ;;  %v594_v50 = vshll.u32 %v256_v10, 16  ;;  %v5375_v2 = vld [vmem:[%s6558_s28 + $0x54] sm:$0xe] }
  0x78   : > { %v5390_v51 = vrot.slane %v5374_v11, 9  ;;  %v573_v15 = vsel %vm6584_vm4, %v568_v34, %v572_v41  ;;  %v5406_v62 = vcombine.low %v2839_v42, %v2842_v49  ;;  %v581_v40 = vor.u32 %v580_v45, %v577_v44  ;;  %v6976_v42 = vld [vmem:[%s6558_s28 + $0xb8] sm:$0xf]  ;;  %v258_v49 = vld [vmem:[%s6558_s28 + $0xbc] sm:$0x1] }
  0x79   : > { %v591_v55 = vor.u32 %v590_v26, %v586_v47  ;;  %v5122_v57 = vcombine.low %v563_v48, %v573_v15  ;;  %v596_v63 = vrot.slane %v594_v50, 5  ;;  %v2845_v58 = vrot.slane %v6711_v8, 5 }
  0x7a   : > { %v2848_v54 = vrot.slane %v6719_v23, 5  ;;  %5982 = vmatprep.mubr.msk.bf16.mxu0 %vm696_vm3, %v5406_v62  ;;  %v582_v6 = vrot.slane %v581_v40, 4  ;;  %v599_v41 = vshrl.u32 %v6947_v33, 16  ;;  %v602_v17 = vshll.u32 %v6947_v33, 16 }
  0x7b   : > { %v592_v7 = vrot.slane %v591_v55, 4  ;;  %5828 = vmatprep.mubr.msk.bf16.mxu1 %vm696_vm3, %v5122_v57  ;;  %v2846_v10 = vsel %vm6810_vm7, %v5390_v51, %v2845_v58  ;;  %v2847_v11 = vrot.slane %v2845_v58, 4  ;;  %v608_v8 = vshll.u32 %v6952_v56, 16  ;;  %v5376_v55 = vld [vmem:[%s6558_s28 + $0x60] sm:$0xe] }
  0x7c   : > { %v612_v23 = vshrl.u32 %v6952_v56, 16  ;;  %v587_v18 = vsel %vm6584_vm4, %v582_v6, %v586_v47  ;;  %v601_v25 = vrot.slane %v599_v41, 4  ;;  %v604_v31 = vrot.slane %v602_v17, 5  ;;  %v5377_v6 = vld [vmem:[%s6558_s28 + $0x6c] sm:$0xe] }
  0x7d   : > { %v597_v21 = vsel %vm6584_vm4, %v592_v7, %v596_v63  ;;  %v2849_v1 = vsel %vm6810_vm7, %v2847_v11, %v2848_v54  ;;  %v610_v28 = vrot.slane %v608_v8, 5  ;;  %v618_v34 = vshll.u32 %v257_v61, 16  ;;  %v5313_v11 = vld [vmem:[%s6558_s28 + $0x70] sm:$0xf]  ;;  %v5314_v8 = vld [vmem:[%s6558_s28 + $0x74] sm:$0x1] }
  0x7e   : > { %v5123_v38 = vcombine.low %v587_v18, %v597_v21  ;;  %v614_v60 = vrot.slane %v612_v23, 4  ;;  %v5407_v20 = vcombine.low %v2846_v10, %v2849_v1  ;;  %v605_v44 = vor.u32 %v604_v31, %v601_v25 }
  0x7f   : > { %v5391_v45 = vrot.slane %v5375_v2, 9  ;;  %v2852_v26 = vrot.slane %v6742_v4, 5  ;;  %v2855_v48 = vrot.slane %v6748_v12, 5  ;;  %v623_v50 = vshrl.u32 %v6967_v14, 16 }
  0x80   : > { %5829 = vmatmul.mubr.msk.bf16.gmra.mrb[24].mxu1 %vm696_vm3, %v5123_v38  ;;  %v615_v47 = vor.u32 %v614_v60, %v610_v28  ;;  %5983 = vmatmul.mubr.msk.bf16.gmra.mrb[8].mxu0 %vm696_vm3, %v5407_v20  ;;  %v606_v51 = vrot.slane %v605_v44, 4  ;;  %v620_v15 = vrot.slane %v618_v34, 5  ;;  %v626_v62 = vshll.u32 %v6967_v14, 16 }
  0x81   : > { %v632_v40 = vshll.u32 %v6976_v42, 16  ;;  %v2853_v4 = vsel %vm6810_vm7, %v5391_v45, %v2852_v26  ;;  %v2854_v12 = vrot.slane %v2852_v26, 4  ;;  %v625_v63 = vrot.slane %v623_v50, 4 }
  0x82   : > { %v616_v57 = vrot.slane %v615_v47, 4  ;;  %v611_v58 = vsel %vm6584_vm4, %v606_v51, %v610_v28  ;;  %v628_v54 = vrot.slane %v626_v62, 5  ;;  %v636_v2 = vshrl.u32 %v6976_v42, 16  ;;  %v5378_v47 = vld [vmem:[%s6558_s28 + $0x78] sm:$0xe] }
  0x83   : > { %v634_v61 = vrot.slane %v632_v40, 5  ;;  %v2856_v41 = vsel %vm6810_vm7, %v2854_v12, %v2855_v48  ;;  %v642_v17 = vshll.u32 %v258_v49, 16  ;;  %v5392_v10 = vrot.slane %v5376_v55, 9  ;;  %v6433_v51 = vld [vmem:[%s6558_s28] sm:$0xf] }
  0x84   : > { %v621_v7 = vsel %vm6584_vm4, %v616_v57, %v620_v15  ;;  %v5408_v18 = vcombine.low %v2853_v4, %v2856_v41  ;;  %v629_v21 = vor.u32 %v628_v54, %v625_v63  ;;  %v638_v25 = vrot.slane %v636_v2, 4  ;;  %v7014_v15 = vld [vmem:[%s6558_s28 + $0x4] sm:$0xf]  ;;  %v7018_v40 = vld [vmem:[%s6558_s28 + $0x7c] sm:$0xf] }
  0x85   : > { %v5124_v23 = vcombine.low %v611_v58, %v621_v7  ;;  %v644_v31 = vrot.slane %v642_v17, 5  ;;  %v2859_v38 = vrot.slane %v6772_v59, 5  ;;  %v2862_v1 = vrot.slane %v6779_v9, 5  ;;  %v7021_v55 = vld [vmem:[%s6558_s28 + $0x80] sm:$0x1] }
  0x86   : > { %v5393_v28 = vrot.slane %v5377_v6, 9  ;;  %5986 = vmatprep.mubr.msk.bf16.mxu0 %vm696_vm3, %v5408_v18  ;;  %v630_v60 = vrot.slane %v629_v21, 4  ;;  %v639_v20 = vor.u32 %v638_v25, %v634_v61  ;;  %v2866_v44 = vrot.slane %v5313_v11, 5  ;;  %v5319_v57 = vld [vmem:[%s6558_s28 + $0x88] sm:$0xf] }
  0x87   : > { %5832 = vmatprep.mubr.msk.bf16.mxu1 %vm696_vm3, %v5124_v23  ;;  %v2869_v34 = vrot.slane %v5314_v8, 5  ;;  %v2860_v45 = vsel %vm6810_vm7, %v5392_v10, %v2859_v38  ;;  %v2861_v59 = vrot.slane %v2859_v38, 4  ;;  %v5142_v62 = vcombine.low %v6433_v51, %v7014_v15  ;;  %v5320_v54 = vld [vmem:[%s6558_s28 + $0x8c] sm:$0x1]  ;;  %v5322_v17 = vld [vmem:[%s6558_s28 + $0x94] sm:$0xf] }
  0x88   : > { %v635_v9 = vsel %vm6584_vm4, %v630_v60, %v634_v61  ;;  %v640_v26 = vrot.slane %v639_v20, 4  ;;  %v2867_v48 = vsel %vm6810_vm7, %v5393_v28, %v2866_v44  ;;  %v2868_v49 = vrot.slane %v2866_v44, 4  ;;  %v5379_v61 = vld [vmem:[%s6558_s28 + $0x84] sm:$0xe]  ;;  %v5380_v23 = vld [vmem:[%s6558_s28 + $0x90] sm:$0xe] }
  0x89   : > { %v2863_v50 = vsel %vm6810_vm7, %v2861_v59, %v2862_v1  ;;  %v5394_v58 = vrot.slane %v5378_v47, 9  ;;  %v2873_v7 = vrot.slane %v7018_v40, 5  ;;  %v2876_v41 = vrot.slane %v7021_v55, 5  ;;  %v5323_v25 = vld [vmem:[%s6558_s28 + $0x98] sm:$0x1] }
  0x8a   : > { %v645_v4 = vsel %vm6584_vm4, %v640_v26, %v644_v31  ;;  %v5409_v12 = vcombine.low %v2860_v45, %v2863_v50  ;;  %v2870_v63 = vsel %vm6810_vm7, %v2868_v49, %v2869_v34  ;;  %v5395_v10 = vrot.slane %v5379_v61, 9  ;;  %v5325_v31 = vld [vmem:[%s6558_s28 + $0xa0] sm:$0xf]  ;;  %v5326_v60 = vld [vmem:[%s6558_s28 + $0xa4] sm:$0x1] }
  0x8b   : > { %v5125_v2 = vcombine.low %v635_v9, %v645_v4  ;;  %v5410_v6 = vcombine.low %v2867_v48, %v2870_v63  ;;  %v2880_v11 = vrot.slane %v5319_v57, 5  ;;  %v2883_v8 = vrot.slane %v5320_v54, 5  ;;  %v5381_v20 = vld [vmem:[%s6558_s28 + $0x9c] sm:$0xe]  ;;  %v6435_v44 = vld [vmem:[%s6558_s28 + $0xc] sm:$0xf] }
  0x8c   : > { %5987 = vmatmul.mubr.msk.bf16.gmra.mrb[12].mxu0 %vm696_vm3, %v5409_v12  ;;  %v2874_v18 = vsel %vm6810_vm7, %v5394_v58, %v2873_v7  ;;  %v2875_v21 = vrot.slane %v2873_v7, 4  ;;  %v2887_v28 = vrot.slane %v5322_v17, 5  ;;  %v7048_v34 = vld [vmem:[%s6558_s28 + $0x10] sm:$0xf]  ;;  %v6437_v47 = vld [vmem:[%s6558_s28 + $0x18] sm:$0xf] }
  0x8d   : > { %5833 = vmatmul.mubr.msk.bf16.gmra.mrb[28].mxu1 %vm696_vm3, %v5125_v2  ;;  %5990 = vmatprep.mubr.msk.bf16.mxu0 %vm696_vm3, %v5410_v6  ;;  %v2881_v38 = vsel %vm6810_vm7, %v5395_v10, %v2880_v11  ;;  %v2882_v1 = vrot.slane %v2880_v11, 4  ;;  %v5143_v45 = vcombine.low %v6435_v44, %v7048_v34  ;;  %v7055_v9 = vld [vmem:[%s6558_s28 + $0x1c] sm:$0xf]  ;;  %v5396_v48 = vrot.slane %v5380_v23, 9  ;;  %v5328_v57 = vld [vmem:[%s6558_s28 + $0xac] sm:$0xf] }
  0x8e   : > { %5838 = vmatprep.mubr.msk.bf16.mxu1 %vm696_vm3, %v5142_v62  ;;  %v2877_v59 = vsel %vm6810_vm7, %v2875_v21, %v2876_v41  ;;  %v5144_v26 = vcombine.low %v6437_v47, %v7055_v9  ;;  %v2889_v51 = vrot.slane %v2887_v28, 4  ;;  %v2890_v62 = vrot.slane %v5323_v25, 5  ;;  %v6439_v54 = vld [vmem:[%s8437_s1 + $0x4] sm:$0x3]  ;;  %v5331_v2 = vld [vmem:[%s6558_s28 + $0xb8] sm:$0xf] }
  0x8f   : > { %v5411_v49 = vcombine.low %v2874_v18, %v2877_v59  ;;  %v2884_v50 = vsel %vm6810_vm7, %v2882_v1, %v2883_v8  ;;  %v5397_v12 = vrot.slane %v5381_v20, 9  ;;  %v2894_v63 = vrot.slane %v5325_v31, 5  ;;  %v7070_v7 = vld [vmem:[%s8437_s1 + $0x6] sm:$0x3]  ;;  %v5329_v10 = vld [vmem:[%s6558_s28 + $0xb0] sm:$0x1] }
  0x90   : > { %v5412_v4 = vcombine.low %v2881_v38, %v2884_v50  ;;  %v2897_v58 = vrot.slane %v5326_v60, 5  ;;  %v1464_v61 = vsel %vm745_vm0, %v6439_v54, 0  ;;  %v2888_v41 = vsel %vm6810_vm7, %v5396_v48, %v2887_v28  ;;  %v5382_v11 = vld [vmem:[%s6558_s28 + $0xa8] sm:$0xe]  ;;  %v5332_v25 = vld [vmem:[%s6558_s28 + $0xbc] sm:$0x1] }
  0x91   : > { %v2896_v6 = vrot.slane %v2894_v63, 4  ;;  %v2891_v17 = vsel %vm6810_vm7, %v2889_v51, %v2890_v62  ;;  %v2901_v8 = vrot.slane %v5328_v57, 5  ;;  %v2895_v23 = vsel %vm6810_vm7, %v5397_v12, %v2894_v63  ;;  %v5383_v31 = vld [vmem:[%s6558_s28 + $0xb4] sm:$0xe]  ;;  %v6440_v38 = vld [vmem:[%s6558_s28 + $0x24] sm:$0xf] }
  0x92   : > { %v2908_v21 = vrot.slane %v5331_v2, 5  ;;  %v7091_v1 = vld [vmem:[%s6558_s28 + $0x28] sm:$0xf]  ;;  %v5413_v60 = vcombine.low %v2888_v41, %v2891_v17  ;;  %v5398_v44 = vrot.slane %v5382_v11, 9  ;;  %v2904_v59 = vrot.slane %v5329_v10, 5 }
  0x93   : > { %v2898_v18 = vsel %vm6810_vm7, %v2896_v6, %v2897_v58  ;;  %v5145_v28 = vcombine.low %v6440_v38, %v7091_v1  ;;  %v6442_v47 = vld [vmem:[%s6558_s28 + $0x30] sm:$0xf]  ;;  %v2911_v51 = vrot.slane %v5332_v25, 5  ;;  %v5334_v62 = vld [vmem:[%s6558_s28 + $0xc4] sm:$0xf]  ;;  %v2296_v25 = vshrl.u32 %v7018_v40, 16 }
  0x94   : > { %5991 = vmatmul.mubr.msk.bf16.gmra.mrb[16].mxu0 %vm696_vm3, %v5411_v49  ;;  %v5414_v20 = vcombine.low %v2895_v23, %v2898_v18  ;;  %v5399_v49 = vrot.slane %v5383_v31, 9  ;;  %v2910_v50 = vrot.slane %v2908_v21, 4  ;;  %v2902_v57 = vsel %vm6810_vm7, %v5398_v44, %v2901_v8  ;;  %v5384_v12 = vld [vmem:[%s6558_s28 + $0xc0] sm:$0xe]  ;;  %v6444_v41 = vld [vmem:[%s6558_s28 + $0x3c] sm:$0xf] }
  0x95   : > { %5839 = vmatmul.mubr.msk.bf16.vlgmr.msra.gmra.mrb[0].mxu1 %vm696_vm3, %v5143_v45  ;;  %5994 = vmatprep.mubr.msk.bf16.mxu0 %vm696_vm3, %v5412_v4  ;;  %v2903_v45 = vrot.slane %v2901_v8, 4  ;;  %v2915_v63 = vrot.slane %v5334_v62, 5  ;;  %v5400_v6 = vrot.slane %v5384_v12, 9  ;;  %v7116_v17 = vld [vmem:[%s6558_s28 + $0x40] sm:$0xf]  ;;  %v5148_v18 = vcombine.low %v6723_v27, %v6726_v36  ;;  %v6396_v62 = vld [vmem:[%s6558_s28 + $0x24] sm:$0xff]  }
  0x96   : > { %5871 = vmatpush3.bf16.msra.mxu1 %v1464_v61  ;;  %5842 = vmatprep.mubr.msk.bf16.mxu1 %vm696_vm3, %v5144_v26  ;;  %v7096_v26 = vld [vmem:[%s6558_s28 + $0x34] sm:$0xf]  ;;  %v2909_v58 = vsel %vm6810_vm7, %v5399_v49, %v2908_v21  ;;  %v2912_v54 = vsel %vm6810_vm7, %v2910_v50, %v2911_v51  ;;  %v5335_v61 = vld [vmem:[%s6558_s28 + $0xc8] sm:$0x1]  ;;  %v5147_v10 = vcombine.low %v6444_v41, %v7116_v17  ;;  %v2292_v21 = vshll.u32 %v7018_v40, 16 }
  0x97   : > { %6369 = vmatprep.subr.msk.bf16.mxu1 %vm745_vm0, %v7070_v7  ;;  %v5146_v48 = vcombine.low %v6442_v47, %v7096_v26  ;;  %v2905_v4 = vsel %vm6810_vm7, %v2903_v45, %v2904_v59  ;;  %v5416_v11 = vcombine.low %v2909_v58, %v2912_v54  ;;  %v2917_v8 = vrot.slane %v2915_v63, 4  ;;  %v1202_v45 = vld [vmem:[%s6558_s28] sm:$0xe]  ;;  %v1203_v59 = vld [vmem:[%s6558_s28 + $0xc] sm:$0xe] }
  0x98   : > { %v5415_v2 = vcombine.low %v2902_v57, %v2905_v4  ;;  %v2918_v23 = vrot.slane %v5335_v61, 5  ;;  %v2916_v31 = vsel %vm6810_vm7, %v5400_v6, %v2915_v63  ;;  %v7131_v27 = vrot.slane %v2292_v21, 5  ;;  %v1206_v41 = vld [vmem:[%s6558_s28 + $0x30] sm:$0xe] }
  0x99   : > { %v2298_v36 = vrot.slane %v2296_v25, 4  ;;  %v5150_v44 = vcombine.low %v6783_v19, %v6789_v35  ;;  %v2302_v47 = vshll.u32 %v7021_v55, 16  ;;  %v5174_v19 = vrot.slane %v1202_v45, 9 }
  0x9a   : > { %v2919_v38 = vsel %vm6810_vm7, %v2917_v8, %v2918_v23  ;;  %8459 = vst [vmem:[#allocation3_spill] sm:$0xff] %v7131_v27  ;;  %v5175_v35 = vrot.slane %v1203_v59, 9  ;;  %v1269_v4 = vrot.slane %v7055_v9, 5  ;;  %v1276_v12 = vrot.slane %v7091_v1, 5  ;;  %v1207_v8 = vld [vmem:[%s6558_s28 + $0x3c] sm:$0xe] }
  0x9b   : > { %v5417_v40 = vcombine.low %v2916_v31, %v2919_v38  ;;  %v2299_v49 = vor.u32 %v2298_v36, %v7131_v27  ;;  %v7151_v51 = vrot.slane %v2302_v47, 5  ;;  %v5151_v58 = vcombine.low %v6804_v0, %v6817_v29  ;;  %v1208_v31 = vld [vmem:[%s6558_s28 + $0x48] sm:$0xe]  ;;  %v6450_v59 = vld [vmem:[%s6558_s28 + $0x38] sm:$0x1] }
  0x9c   : > { %5995 = vmatmul.mubr.msk.bf16.gmra.mrb[20].mxu0 %vm696_vm3, %v5413_v60  ;;  %v5149_v60 = vcombine.low %v6752_v24, %v6758_v37  ;;  %v6447_v24 = vld [vmem:[%s6558_s28 + $0x14] sm:$0x1]  ;;  %v4104_v54 = vsel %vm745_vm0, %v6875_v22, 0  ;;  %v5152_v61 = vcombine.low %v6836_v53, %v6843_v16  ;;  %v5153_v6 = vcombine.low %v6862_v39, %v6870_v43  ;;  %v6448_v16 = vld [vmem:[%s6558_s28 + $0x20] sm:$0x1] }
  0x9d   : > { %5843 = vmatmul.mubr.msk.bf16.gmra.mrb[4].mxu1 %vm696_vm3, %v5145_v28  ;;  %5998 = vmatprep.mubr.msk.bf16.mxu0 %vm696_vm3, %v5414_v20  ;;  %v1262_v28 = vrot.slane %v7048_v34, 5  ;;  %v6394_v20 = vld [vmem:[%s6558_s28 + $0x18] sm:$0xff]   ;;  %v6446_v34 = vld [vmem:[%s6558_s28 + $0x8] sm:$0x1]  ;;  %v1265_v37 = vrot.slane %v6447_v24, 5  ;;  %8460 = vst [vmem:[#allocation4_spill] sm:$0xff] %v7151_v51  ;;  %v5154_v9 = vcombine.low %v6894_v5, %v6906_v30 }
  0x9e   : > { %5846 = vmatprep.mubr.msk.bf16.mxu1 %vm696_vm3, %v5146_v48  ;;  %v1255_v48 = vrot.slane %v7014_v15, 5  ;;  %v1258_v50 = vrot.slane %v6446_v34, 5  ;;  %v1204_v15 = vld [vmem:[%s6558_s28 + $0x18] sm:$0xe]  ;;  %v7156_v63 = vrot.slane %v2299_v49, 4  ;;  %v1272_v22 = vrot.slane %v6448_v16, 5 }
  0x9f   : > { %v1264_v55 = vrot.slane %v1262_v28, 4  ;;  %v5176_v1 = vrot.slane %v1204_v15, 9  ;;  %v7178_v29 = vsel %vm6810_vm7, %v5175_v35, %v1262_v28  ;;  %v1278_v25 = vrot.slane %v1276_v12, 4  ;;  %v5499_v24 = vld [vmem:[%s6558_s28 + $0x18] sm:$0xf] }
  0xa0   : > { %v1257_v57 = vrot.slane %v1255_v48, 4  ;;  %8461 = vst [vmem:[#allocation5_spill] sm:$0xff] %v7156_v63  ;;  %v7174_v0 = vsel %vm6810_vm7, %v5174_v19, %v1255_v48  ;;  %v1286_v47 = vrot.slane %v6450_v59, 5  ;;  %v7215_v49 = vsel %vm745_vm0, %v7070_v7, 0  ;;  %v5500_v7 = vld [vmem:[%s6558_s28 + $0x1c] sm:$0xf] }
  0xa1   : > { %v7182_v53 = vsel %vm6810_vm7, %v1264_v55, %v1265_v37  ;;  %v7219_v34 = vsel %vm6810_vm7, %v5176_v1, %v1269_v4  ;;  %v6400_v37 = vld [vmem:[%s6558_s28 + $0x3c] sm:$0xff]   ;;  %v5179_v35 = vrot.slane %v1207_v8, 9  ;;  %v6451_v55 = vld [vmem:[%s6558_s28 + $0x44] sm:$0x1]  ;;  %v3625_v8 = vshll.u32 %v5499_v24, 16 }
  0xa2   : > { %v7193_v23 = vsel %vm6810_vm7, %v1257_v57, %v1258_v50  ;;  %v1209_v50 = vld [vmem:[%s6558_s28 + $0x54] sm:$0xe]  ;;  %v1293_v15 = vrot.slane %v6451_v55, 5  ;;  %v5503_v39 = vld [vmem:[%s6558_s28 + $0x28] sm:$0xf] }
  0xa3   : > { %v6458_v5 = vld [vmem:[%s6558_s28 + $0x70] sm:$0xf] }
  0xa4   : > { %5999 = vmatmul.mubr.msk.bf16.gmra.mrb[24].mxu0 %vm696_vm3, %v5415_v2  ;;  %v1205_v2 = vld [vmem:[%s6558_s28 + $0x24] sm:$0xe]  ;;  %v1318_v30 = vrot.slane %v6458_v5, 5 }
  0xa5   : > { %5847 = vmatmul.mubr.msk.bf16.gmra.mrb[8].mxu1 %vm696_vm3, %v5147_v10  ;;  %6002 = vmatprep.mubr.msk.bf16.mxu0 %vm696_vm3, %v5416_v11  ;;  %v1283_v10 = vrot.slane %v7096_v26, 5  ;;  %v6398_v11 = vld [vmem:[%s6558_s28 + $0x30] sm:$0xff]   ;;  %v5177_v21 = vrot.slane %v1205_v2, 9 }
  0xa6   : > { %5850 = vmatprep.mubr.msk.bf16.mxu1 %vm696_vm3, %v5148_v18  ;;  %v7189_v26 = vld [vmem:[%s8437_s1 + $0x10] sm:$0x3]  ;;  %v1271_v18 = vrot.slane %v1269_v4, 4  ;;  %v1320_v48 = vrot.slane %v1318_v30, 4 }
  0xa7   : > { %v1285_v45 = vrot.slane %v1283_v10, 4  ;;  %v7226_v19 = vsel %vm6810_vm7, %v5177_v21, %v1276_v12  ;;  %v3635_v21 = vshrl.u32 %v5500_v7, 16 }
  0xa8   : > { %v7235_v4 = vsel %vm6810_vm7, %v1271_v18, %v1272_v22  ;;  %v3622_v22 = vshrl.u32 %v5499_v24, 16  ;;  %v3631_v18 = vshll.u32 %v5500_v7, 16  ;;  %v5502_v24 = vld [vmem:[%s6558_s28 + $0x24] sm:$0xf] }
  0xa9   : > { %v7248_v1 = vsel %vm6810_vm7, %v1285_v45, %v1286_v47 }
  0xaa   : > { %v3624_v43 = vrot.slane %v3622_v22, 4  ;;  %v7290_v7 = vrot.slane %v3631_v18, 5  ;;  %v3649_v22 = vshll.u32 %v5502_v24, 16  ;;  %v3659_v18 = vshrl.u32 %v5503_v39, 16 }
  0xac   : > { %6003 = vmatmul.mubr.msk.bf16.gmra.mrb[28].mxu0 %vm696_vm3, %v5417_v40  ;;  %v6449_v40 = vld [vmem:[%s6558_s28 + $0x2c] sm:$0x1]  ;;  %v3651_v27 = vrot.slane %v3649_v22, 5 }
  0xad   : > { %5851 = vmatmul.mubr.msk.bf16.gmra.mrb[12].mxu1 %vm696_vm3, %v5149_v60  ;;  %6008 = vmatprep.mubr.msk.bf16.mxu0 %vm696_vm3, %v6394_v20  ;;  %v1279_v28 = vrot.slane %v6449_v40, 5  ;;  %v1290_v60 = vrot.slane %v7116_v17, 5  ;;  %v6454_v40 = vld [vmem:[%s6558_s28 + $0x50] sm:$0x1]  ;;  %v6459_v17 = vld [vmem:[%s6558_s28 + $0x74] sm:$0x1] }
  0xae   : > { %5854 = vmatprep.mubr.msk.bf16.mxu1 %vm696_vm3, %v5150_v44  ;;  %v5178_v44 = vrot.slane %v1206_v41, 9  ;;  %v5181_v41 = vrot.slane %v1209_v50, 9  ;;  %v1210_v50 = vld [vmem:[%s6558_s28 + $0x60] sm:$0xe]  ;;  %v5504_v20 = vld [vmem:[%s6558_s28 + $0x2c] sm:$0x1] }
  0xaf   : > { %v1292_v12 = vrot.slane %v1290_v60, 4  ;;  %v7261_v45 = vsel %vm6810_vm7, %v5179_v35, %v1290_v60  ;;  %v6455_v35 = vld [vmem:[%s6558_s28 + $0x5c] sm:$0x1] }
  0xb0   : > { %v7244_v2 = vsel %vm6810_vm7, %v5178_v44, %v1283_v10  ;;  %v1307_v55 = vrot.slane %v6455_v35, 5  ;;  %v1211_v35 = vld [vmem:[%s6558_s28 + $0x6c] sm:$0xe] }
  0xb1   : > { %v7265_v59 = vsel %vm6810_vm7, %v1292_v12, %v1293_v15  ;;  %v6456_v15 = vld [vmem:[%s6558_s28 + $0x64] sm:$0xf]  ;;  %v3637_v12 = vrot.slane %v3635_v21, 4  ;;  %v5183_v5 = vrot.slane %v1211_v35, 9 }
  0xb2   : > { %v6406_v21 = vld [vmem:[%s6558_s28 + $0x60] sm:$0xff]  }
  0xb4   : > { %6009 = vmatmul.mubr.msk.bf16.vlgmr.msra.gmra.mrb[0].mxu0 %vm696_vm3, %v6396_v62  ;;  %v6452_v62 = vld [vmem:[%s6558_s28 + $0x4c] sm:$0xf] }
  0xb5   : > { %5855 = vmatmul.mubr.msk.bf16.gmra.mrb[16].mxu1 %vm696_vm3, %v5151_v58  ;;  %6041 = vmatpush3.bf16.msra.mxu0 %v4104_v54  ;;  %v1297_v57 = vrot.slane %v6452_v62, 5  ;;  %v7239_v58 = vsel %vm6810_vm7, %v1278_v25, %v1279_v28  ;;  %v5180_v54 = vrot.slane %v1208_v31, 9  ;;  %v1300_v28 = vrot.slane %v6454_v40, 5 }
  0xb6   : > { %5858 = vmatprep.mubr.msk.bf16.mxu1 %vm696_vm3, %v5152_v61  ;;  %6012 = vmatprep.mubr.msk.bf16.mxu0 %vm696_vm3, %v6398_v11  ;;  %v6402_v61 = vld [vmem:[%s6558_s28 + $0x48] sm:$0xff]   ;;  %v6453_v11 = vld [vmem:[%s6558_s28 + $0x58] sm:$0xf]  ;;  %v1311_v62 = vrot.slane %v6456_v15, 5  ;;  %v5506_v15 = vld [vmem:[%s6558_s28 + $0x34] sm:$0xf] }
  0xb7   : > { %6375 = vmatprep.subr.msk.bf16.mxu0 %vm745_vm0, %v7189_v26  ;;  %v1304_v16 = vrot.slane %v6453_v11, 5  ;;  %v1299_v31 = vrot.slane %v1297_v57, 4  ;;  %v7269_v47 = vsel %vm6810_vm7, %v5180_v54, %v1297_v57  ;;  %v5501_v57 = vld [vmem:[%s6558_s28 + $0x20] sm:$0x1]  ;;  %v5505_v54 = vld [vmem:[%s6558_s28 + $0x30] sm:$0xf] }
  0xb8   : > { %v5182_v11 = vrot.slane %v1210_v50, 9  ;;  %v3673_v50 = vshll.u32 %v5505_v54, 16  ;;  %v3641_v25 = vshll.u32 %v5501_v57, 16  ;;  %v3679_v36 = vshll.u32 %v5506_v15, 16 }
  0xb9   : > { %v7280_v60 = vsel %vm6810_vm7, %v5181_v41, %v1304_v16  ;;  %v7296_v41 = vsel %vm6810_vm7, %v1299_v31, %v1300_v28  ;;  %v1313_v31 = vrot.slane %v1311_v62, 4  ;;  %v3670_v28 = vshrl.u32 %v5505_v54, 16 }
  0xba   : > { %v7338_v35 = vrot.slane %v3679_v36, 5 }
  0xbc   : > { %6013 = vmatmul.mubr.msk.bf16.gmra.mrb[4].mxu0 %vm696_vm3, %v6400_v37  ;;  %v1306_v37 = vrot.slane %v1304_v16, 4  ;;  %v6457_v16 = vld [vmem:[%s6558_s28 + $0x68] sm:$0x1] }
  0xbd   : > { %5859 = vmatmul.mubr.msk.bf16.gmra.mrb[20].mxu1 %vm696_vm3, %v5153_v6  ;;  %6016 = vmatprep.mubr.msk.bf16.mxu0 %vm696_vm3, %v6402_v61  ;;  %v3627_v6 = vrot.slane %v3625_v8, 5  ;;  %v6404_v61 = vld [vmem:[%s6558_s28 + $0x54] sm:$0xff]   ;;  %v1314_v40 = vrot.slane %v6457_v16, 5  ;;  %v3655_v8 = vshll.u32 %v5503_v39, 16  ;;  %v3638_v16 = vor.u32 %v3637_v12, %v7290_v7 }
  0xbe   : > { %5862 = vmatprep.mubr.msk.bf16.mxu1 %vm696_vm3, %v5154_v9  ;;  %v3646_v9 = vshrl.u32 %v5502_v24, 16  ;;  %v7305_v44 = vsel %vm6810_vm7, %v1306_v37, %v1307_v55  ;;  %v1321_v24 = vrot.slane %v6459_v17, 5  ;;  %v3683_v39 = vshrl.u32 %v5506_v15, 16 }
  0xbf   : > { %v3628_v10 = vor.u32 %v3627_v6, %v3624_v43  ;;  %v7311_v37 = vrot.slane %v3655_v8, 5  ;;  %v3661_v55 = vrot.slane %v3659_v18, 4  ;;  %v8462_v43 = vcombine.low %v6915_v52, %v6926_v46  ;;  %v6460_v8 = vld [vmem:[%s6558_s28 + $0x7c] sm:$0xf]  ;;  %v7347_v18 = vld [vmem:[%s6558_s28 + $0x38] sm:$0x1] }
  0xc0   : > { %v3648_v38 = vrot.slane %v3646_v9, 4  ;;  %v7320_v17 = vsel %vm6810_vm7, %v5182_v11, %v1311_v62  ;;  %v7324_v57 = vsel %vm6810_vm7, %v1313_v31, %v1314_v40  ;;  %v3672_v6 = vrot.slane %v3670_v28, 4  ;;  %8464 = vst [vmem:[#allocation6_spill] sm:$0xff] %v7347_v18 }
  0xc1   : > { %v3675_v12 = vrot.slane %v3673_v50, 5  ;;  %v8463_v52 = vcombine.low %v6947_v33, %v6952_v56  ;;  %v3629_v46 = vrot.slane %v3628_v10, 4  ;;  %v3639_v54 = vrot.slane %v3638_v16, 4  ;;  %v6408_v33 = vld [vmem:[%s6558_s28 + $0x6c] sm:$0xff]   ;;  %v1213_v16 = vld [vmem:[%s6558_s28 + $0x84] sm:$0xe] }
  0xc2   : > { %v3665_v62 = vshll.u32 %v5504_v20, 16  ;;  %v7332_v11 = vsel %vm6810_vm7, %v5183_v5, %v1318_v30  ;;  %v7336_v40 = vsel %vm6810_vm7, %v1320_v48, %v1321_v24  ;;  %v3685_v9 = vrot.slane %v3683_v39, 4  ;;  %v6409_v48 = vld [vmem:[%s6558_s28 + $0x78] sm:$0xff]  }
  0xc3   : > { %v3652_v10 = vor.u32 %v3651_v27, %v3648_v38  ;;  %v3662_v20 = vor.u32 %v3661_v55, %v7311_v37  ;;  %v1325_v30 = vrot.slane %v6460_v8, 5  ;;  %v3676_v38 = vor.u32 %v3675_v12, %v3672_v6  ;;  %v5508_v5 = vld [vmem:[%s6558_s28 + $0x3c] sm:$0xf] }
  0xc4   : > { %6017 = vmatmul.mubr.msk.bf16.gmra.mrb[8].mxu0 %vm696_vm3, %v6404_v61  ;;  %v3643_v61 = vrot.slane %v3641_v25, 5  ;;  %v1212_v25 = vld [vmem:[%s6558_s28 + $0x78] sm:$0xe]  ;;  %v7363_v50 = vrot.slane %v3665_v62, 5  ;;  %v3686_v39 = vor.u32 %v3685_v9, %v7338_v35  ;;  %v3689_v55 = vshll.u32 %v7347_v18, 16 }
  0xc5   : > { %5863 = vmatmul.mubr.msk.bf16.gmra.mrb[24].mxu1 %vm696_vm3, %v8462_v43  ;;  %6020 = vmatprep.mubr.msk.bf16.mxu0 %vm696_vm3, %v6406_v21  ;;  %v3634_v21 = vsel %vm6584_vm4, %v3629_v46, %v7290_v7  ;;  %v5184_v24 = vrot.slane %v1212_v25, 9  ;;  %v6461_v43 = vld [vmem:[%s6558_s28 + $0x88] sm:$0xf]  ;;  %v7371_v7 = vld [vmem:[%s6558_s28 + $0x40] sm:$0xf]  ;;  %v3653_v12 = vrot.slane %v3652_v10, 4  ;;  %v8466_v62 = vcombine.low %v6967_v14, %v6976_v42 }
  0xc6   : > { %5866 = vmatprep.mubr.msk.bf16.mxu1 %vm696_vm3, %v8463_v52  ;;  %v3644_v31 = vsel %vm6584_vm4, %v3639_v54, %v3643_v61  ;;  %v1332_v6 = vrot.slane %v6461_v43, 5  ;;  %8465 = vst [vmem:[#allocation7_spill] sm:$0xff] %v7371_v7  ;;  %v3663_v52 = vrot.slane %v3662_v20, 4  ;;  %v1327_v46 = vrot.slane %v1325_v30, 4  ;;  %v6462_v54 = vld [vmem:[%s6558_s28 + $0x80] sm:$0x1] }
  0xc7   : > { %v1328_v61 = vrot.slane %v6462_v54, 5  ;;  %v3677_v9 = vrot.slane %v3676_v38, 4  ;;  %v5185_v25 = vrot.slane %v1213_v16, 9  ;;  %v3694_v8 = vshrl.u32 %v5508_v5, 16  ;;  %v6410_v10 = vld [vmem:[%s6558_s28 + $0x84] sm:$0xff]  }
  0xc8   : > { %v3697_v43 = vshll.u32 %v5508_v5, 16  ;;  %v7385_v20 = vcombine.low %v3634_v21, %v3644_v31  ;;  %v7389_v14 = vsel %vm745_vm0, %v7189_v26, 0  ;;  %v3707_v38 = vshrl.u32 %v7371_v7, 16  ;;  %v6411_v21 = vld [vmem:[%s6558_s28 + $0x90] sm:$0xff]   ;;  %v6467_v18 = vld [vmem:[%s6558_s28 + $0xa0] sm:$0xf] }
  0xc9   : > { %v3687_v16 = vrot.slane %v3686_v39, 4  ;;  %v3691_v5 = vrot.slane %v3689_v55, 5  ;;  %v1334_v54 = vrot.slane %v1332_v6, 4  ;;  %v3658_v31 = vsel %vm6584_vm4, %v3653_v12, %v7311_v37 }
  0xca   : > { %v3668_v26 = vsel %vm6584_vm4, %v3663_v52, %v7363_v50  ;;  %v7404_v39 = vsel %vm6810_vm7, %v5184_v24, %v1325_v30  ;;  %v7408_v55 = vsel %vm6810_vm7, %v1327_v46, %v1328_v61  ;;  %v3682_v37 = vsel %vm6584_vm4, %v3677_v9, %v7338_v35  ;;  %v5514_v30 = vld [vmem:[%s6558_s28 + $0x54] sm:$0xf]  ;;  %v7425_v24 = vld [vmem:[%s6558_s28 + $0x58] sm:$0xf]  ;;  %v7430_v61 = vld [vmem:[%s6558_s28 + $0x90] sm:$0xe] }
  0xcb   : > { %v7421_v12 = vsel %vm6810_vm7, %v5185_v25, %v1332_v6  ;;  %v3696_v50 = vrot.slane %v3694_v8, 4  ;;  %v3699_v52 = vrot.slane %v3697_v43, 5  ;;  %v3709_v46 = vrot.slane %v3707_v38, 4 }
  0xcc   : > { %6021 = vmatmul.mubr.msk.bf16.gmra.mrb[12].mxu0 %vm696_vm3, %v6408_v33  ;;  %v8467_v33 = vcombine.low %v7174_v0, %v7193_v23  ;;  %v6463_v0 = vld [vmem:[%s6558_s28 + $0x8c] sm:$0x1]  ;;  %v3692_v36 = vsel %vm6584_vm4, %v3687_v16, %v3691_v5  ;;  %v3742_v25 = vshrl.u32 %v5514_v30, 16  ;;  %v3745_v8 = vshll.u32 %v5514_v30, 16 }
  0xcd   : > { %5867 = vmatmul.mubr.msk.bf16.gmra.mrb[28].mxu1 %vm696_vm3, %v8466_v62  ;;  %6024 = vmatprep.mubr.msk.bf16.mxu0 %vm696_vm3, %v6409_v48  ;;  %v3703_v48 = vshll.u32 %v7371_v7, 16  ;;  %v1335_v23 = vrot.slane %v6463_v0, 5  ;;  %v5511_v62 = vld [vmem:[%s6558_s28 + $0x48] sm:$0xf]  ;;  %v7414_v0 = vld [vmem:[%s6558_s28 + $0x4c] sm:$0xf]  ;;  %v8469_v38 = vcombine.low %v7178_v29, %v7182_v53  ;;  %v7448_v16 = vcombine.low %v3658_v31, %v3668_v26 }
  0xce   : > { %5872 = vmatprep.mubr.msk.bf16.mxu1 %vm696_vm3, %v8467_v33  ;;  %v7411_v33 = vld [vmem:[%s6558_s28 + $0x44] sm:$0x1]  ;;  %v3718_v27 = vshrl.u32 %v5511_v62, 16  ;;  %v3721_v15 = vshll.u32 %v5511_v62, 16  ;;  %v3727_v6 = vshll.u32 %v7414_v0, 16  ;;  %v3731_v9 = vshrl.u32 %v7414_v0, 16 }
  0xcf   : > { %8468 = vst [vmem:[#allocation8_spill] sm:$0xff] %v7411_v33  ;;  %v7427_v28 = vrot.slane %v3703_v48, 5  ;;  %v7436_v35 = vsel %vm6810_vm7, %v1334_v54, %v1335_v23  ;;  %v3751_v43 = vshll.u32 %v7425_v24, 16  ;;  %v3755_v48 = vshrl.u32 %v7425_v24, 16  ;;  %v5517_v31 = vld [vmem:[%s6558_s28 + $0x60] sm:$0xf] }
  0xd0   : > { %v3713_v5 = vshll.u32 %v7411_v33, 16  ;;  %v5186_v54 = vrot.slane %v7430_v61, 9  ;;  %v8470_v23 = vcombine.low %v7219_v34, %v7235_v4  ;;  %v7459_v29 = vcombine.low %v3682_v37, %v3692_v36  ;;  %v6412_v26 = vld [vmem:[%s6558_s28 + $0x9c] sm:$0xff]   ;;  %v6413_v30 = vld [vmem:[%s6558_s28 + $0xa8] sm:$0xff]  }
  0xd1   : > { %v3700_v53 = vor.u32 %v3699_v52, %v3696_v50  ;;  %v3720_v62 = vrot.slane %v3718_v27, 4  ;;  %v7470_v34 = vrot.slane %v3727_v6, 5  ;;  %v3733_v4 = vrot.slane %v3731_v9, 4  ;;  %v6464_v36 = vld [vmem:[%s8437_s1 + $0x8] sm:$0x3] }
  0xd2   : > { %v3744_v27 = vrot.slane %v3742_v25, 4  ;;  %v3747_v37 = vrot.slane %v3745_v8, 5  ;;  %v7479_v50 = vrot.slane %v3751_v43, 5  ;;  %v3757_v52 = vrot.slane %v3755_v48, 4  ;;  %v6465_v6 = vld [vmem:[%s6558_s28 + $0x94] sm:$0xf] }
  0xd3   : > { %v7485_v9 = vld [vmem:[%s6558_s28 + $0x64] sm:$0xf]  ;;  %v3766_v61 = vshrl.u32 %v5517_v31, 16  ;;  %v7487_v22 = vrot.slane %v3700_v53, 4  ;;  %v1346_v25 = vrot.slane %v6467_v18, 5  ;;  %v3734_v43 = vor.u32 %v3733_v4, %v7470_v34 }
  0xd4   : > { %6025 = vmatmul.mubr.msk.bf16.gmra.mrb[16].mxu0 %vm696_vm3, %v6410_v10  ;;  %8471 = vst [vmem:[#allocation9_spill] sm:$0xff] %v7485_v9  ;;  %v3769_v10 = vshll.u32 %v5517_v31, 16  ;;  %v3748_v31 = vor.u32 %v3747_v37, %v3744_v27  ;;  %v3758_v53 = vor.u32 %v3757_v52, %v7479_v50  ;;  %v8472_v18 = vcombine.low %v7226_v19, %v7239_v58  ;;  %v6414_v37 = vld [vmem:[%s6558_s28 + $0xb4] sm:$0xff]  }
  0xd5   : > { %5873 = vmatmul.mubr.msk.bf16.vlgmr.msra.gmra.mrb[0].mxu1 %vm696_vm3, %v8469_v38  ;;  %6028 = vmatprep.mubr.msk.bf16.mxu0 %vm696_vm3, %v6411_v21  ;;  %v3723_v21 = vrot.slane %v3721_v15, 5  ;;  %v7468_v38 = vld [vmem:[%s6558_s28 + $0x50] sm:$0x1]  ;;  %v7477_v15 = vld [vmem:[%s6558_s28 + $0x5c] sm:$0x1]  ;;  %v8473_v27 = vcombine.low %v7244_v2, %v7248_v1  ;;  %v1348_v52 = vrot.slane %v1346_v25, 4 }
  0xd6   : > { %5905 = vmatpush3.bf16.msra.mxu1 %v7215_v49  ;;  %5876 = vmatprep.mubr.msk.bf16.mxu1 %vm696_vm3, %v8470_v23  ;;  %v3710_v49 = vor.u32 %v3709_v46, %v7427_v28  ;;  %v7481_v46 = vrot.slane %v3713_v5, 5  ;;  %v1339_v23 = vrot.slane %v6465_v6, 5  ;;  %v3737_v48 = vshll.u32 %v7468_v38, 16  ;;  %v1215_v5 = vld [vmem:[%s6558_s28 + $0x9c] sm:$0xe] }
  0xd7   : > { %6371 = vmatprep.subr.msk.bf16.mxu1 %vm745_vm0, %v6464_v36  ;;  %v6466_v36 = vld [vmem:[%s6558_s28 + $0x98] sm:$0x1]  ;;  %v3724_v7 = vor.u32 %v3723_v21, %v3720_v62  ;;  %v3761_v6 = vshll.u32 %v7477_v15, 16  ;;  %v3779_v62 = vshrl.u32 %v7485_v9, 16  ;;  %v3771_v4 = vrot.slane %v3769_v10, 5 }
  0xd8   : > { %v1342_v33 = vrot.slane %v6466_v36, 5  ;;  %v3711_v8 = vrot.slane %v3710_v49, 4  ;;  %v3775_v36 = vshll.u32 %v7485_v9, 16  ;;  %v7506_v21 = vsel %vm6810_vm7, %v5186_v54, %v1339_v23  ;;  %v7517_v2 = vld [vmem:[%s6558_s28 + $0x68] sm:$0x1] }
  0xd9   : > { %v3768_v49 = vrot.slane %v3766_v61, 4  ;;  %v3725_v19 = vrot.slane %v3724_v7, 4  ;;  %v5187_v58 = vrot.slane %v1215_v5, 9  ;;  %v3735_v3 = vrot.slane %v3734_v43, 4  ;;  %8474 = vst [vmem:[#allocation10_spill] sm:$0xff] %v7517_v2  ;;  %v6415_v5 = vld [vmem:[%s6558_s28 + $0xc0] sm:$0xff]  }
  0xda   : > { %v3739_v54 = vrot.slane %v3737_v48, 5  ;;  %v3763_v63 = vrot.slane %v3761_v6, 5  ;;  %v1353_v61 = vrot.slane %v6952_v56, 5  ;;  %v3749_v10 = vrot.slane %v3748_v31, 4  ;;  %v1217_v31 = vld [vmem:[%s6558_s28 + $0xb4] sm:$0xe] }
  0xdb   : > { %v3759_v51 = vrot.slane %v3758_v53, 4  ;;  %v7519_v1 = vrot.slane %v3775_v36, 5  ;;  %v3781_v7 = vrot.slane %v3779_v62, 4  ;;  %v3706_v43 = vsel %vm6584_vm4, %v7487_v22, %v7427_v28  ;;  %v6469_v62 = vld [vmem:[%s6558_s28 + $0xb0] sm:$0x1] }
  0xdc   : > { %6029 = vmatmul.mubr.msk.bf16.gmra.mrb[20].mxu0 %vm696_vm3, %v6412_v26  ;;  %v1341_v26 = vrot.slane %v1339_v23, 4  ;;  %v1216_v23 = vld [vmem:[%s6558_s28 + $0xa8] sm:$0xe]  ;;  %v3716_v48 = vsel %vm6584_vm4, %v3711_v8, %v7481_v46  ;;  %v3772_v6 = vor.u32 %v3771_v4, %v3768_v49  ;;  %v3730_v53 = vsel %vm6584_vm4, %v3725_v19, %v7470_v34  ;;  %v5520_v46 = vld [vmem:[%s6558_s28 + $0x6c] sm:$0xf] }
  0xdd   : > { %5877 = vmatmul.mubr.msk.bf16.gmra.mrb[4].mxu1 %vm696_vm3, %v8472_v18  ;;  %6032 = vmatprep.mubr.msk.bf16.mxu0 %vm696_vm3, %v6413_v30  ;;  %v6468_v18 = vld [vmem:[%s6558_s28 + $0xa4] sm:$0x1]  ;;  %v7539_v36 = vsel %vm6810_vm7, %v5187_v58, %v1346_v25  ;;  %v5188_v28 = vrot.slane %v1216_v23, 9  ;;  %v1355_v8 = vrot.slane %v1353_v61, 4  ;;  %v3785_v49 = vshll.u32 %v7517_v2, 16 }
  0xde   : > { %5880 = vmatprep.mubr.msk.bf16.mxu1 %vm696_vm3, %v8473_v27  ;;  %v1349_v30 = vrot.slane %v6468_v18, 5  ;;  %v7531_v56 = vsel %vm6810_vm7, %v1341_v26, %v1342_v33  ;;  %v3740_v33 = vsel %vm6584_vm4, %v3735_v3, %v3739_v54  ;;  %v1356_v26 = vrot.slane %v6469_v62, 5  ;;  %v5523_v18 = vld [vmem:[%s6558_s28 + $0x78] sm:$0xf]  ;;  %v7594_v54 = vld [vmem:[%s6558_s28 + $0xbc] sm:$0x1] }
  0xdf   : > { %v3754_v34 = vsel %vm6584_vm4, %v3749_v10, %v7479_v50  ;;  %v3764_v25 = vsel %vm6584_vm4, %v3759_v51, %v3763_v63  ;;  %v3782_v4 = vor.u32 %v3781_v7, %v7519_v1  ;;  %v5189_v27 = vrot.slane %v1217_v31, 9  ;;  %v7568_v51 = vld [vmem:[%s6558_s28 + $0x70] sm:$0xf]  ;;  %v7598_v10 = vld [vmem:[%s6558_s28 + $0x7c] sm:$0xf] }
  0xe0   : > { %v7543_v22 = vsel %vm6810_vm7, %v1348_v52, %v1349_v30  ;;  %v8476_v3 = vcombine.low %v7261_v45, %v7265_v59  ;;  %v7564_v19 = vrot.slane %v3772_v6, 4  ;;  %v1360_v50 = vrot.slane %v6976_v42, 5  ;;  %8477 = vst [vmem:[#allocation12_spill] sm:$0xff] %v7568_v51  ;;  %8479 = vst [vmem:[#allocation13_spill] sm:$0xff] %v7598_v10  ;;  %v5526_v7 = vld [vmem:[%s6558_s28 + $0x84] sm:$0xf] }
  0xe1   : > { %8475 = vst [vmem:[#allocation11_spill] sm:$0xff] %v7543_v22  ;;  %v3790_v63 = vshrl.u32 %v5520_v46, 16  ;;  %v8478_v45 = vcombine.low %v7269_v47, %v7296_v41  ;;  %v7576_v58 = vcombine.low %v3730_v53, %v3740_v33  ;;  %v7582_v42 = vsel %vm6810_vm7, %v5188_v28, %v1353_v61  ;;  %v6416_v61 = vld [vmem:[%s6558_s28 + $0xcc] sm:$0xff]   ;;  %v7610_v31 = vld [vmem:[%s6558_s28 + $0x88] sm:$0xf] }
  0xe2   : > { %v7585_v30 = vcombine.low %v3754_v34, %v3764_v25  ;;  %v7589_v47 = vsel %vm6810_vm7, %v1355_v8, %v1356_v26  ;;  %v7591_v41 = vrot.slane %v3785_v49, 5  ;;  %v3799_v6 = vshll.u32 %v7568_v51, 16  ;;  %8480 = vst [vmem:[#allocation14_spill] sm:$0xff] %v7610_v31  ;;  %v5529_v62 = vld [vmem:[%s6558_s28 + $0x90] sm:$0xf] }
  0xe3   : > { %v7616_v28 = vrot.slane %v1360_v50, 4  ;;  %v7618_v33 = vrot.slane %v3790_v63, 4  ;;  %v3803_v8 = vshrl.u32 %v7568_v51, 16  ;;  %v3814_v26 = vshrl.u32 %v5523_v18, 16  ;;  %v7625_v25 = vld [vmem:[%s6558_s28 + $0x94] sm:$0xf] }
  0xe4   : > { %6033 = vmatmul.mubr.msk.bf16.gmra.mrb[24].mxu0 %vm696_vm3, %v6414_v37  ;;  %v7562_v37 = vcombine.low %v3706_v43, %v3716_v48  ;;  %v7606_v43 = vsel %vm6810_vm7, %v5189_v27, %v1360_v50  ;;  %v3793_v48 = vshll.u32 %v5520_v46, 16  ;;  %v3817_v49 = vshll.u32 %v5523_v18, 16  ;;  %8481 = vst [vmem:[#allocation15_spill] sm:$0xff] %v7625_v25  ;;  %v7663_v2 = vld [vmem:[%s6558_s28 + $0x8c] sm:$0x1] }
  0xe5   : > { %5881 = vmatmul.mubr.msk.bf16.gmra.mrb[8].mxu1 %vm696_vm3, %v8476_v3  ;;  %6036 = vmatprep.mubr.msk.bf16.mxu0 %vm696_vm3, %v6415_v5  ;;  %v7602_v5 = vrot.slane %v3782_v4, 4  ;;  %v3823_v46 = vshll.u32 %v7598_v10, 16  ;;  %v3827_v34 = vshrl.u32 %v7598_v10, 16  ;;  %v3838_v4 = vshrl.u32 %v5526_v7, 16 }
  0xe6   : > { %5884 = vmatprep.mubr.msk.bf16.mxu1 %vm696_vm3, %v8478_v45  ;;  %v3841_v27 = vshll.u32 %v5526_v7, 16  ;;  %v3847_v3 = vshll.u32 %v7610_v31, 16  ;;  %v3851_v50 = vshrl.u32 %v7610_v31, 16  ;;  %v7635_v45 = vld [vmem:[%s6558_s28 + $0x74] sm:$0x1]  ;;  %v3795_v18 = vrot.slane %v3793_v48, 5 }
  0xe7   : > { %v3862_v52 = vshrl.u32 %v5529_v62, 16  ;;  %v3865_v53 = vshll.u32 %v5529_v62, 16  ;;  %v8482_v7 = vcombine.low %v7280_v60, %v7305_v44  ;;  %v3805_v59 = vrot.slane %v3803_v8, 4  ;;  %v5532_v48 = vld [vmem:[%s6558_s28 + $0x9c] sm:$0xf] }
  0xe8   : > { %v3871_v63 = vshll.u32 %v7625_v25, 16  ;;  %v3875_v23 = vshrl.u32 %v7625_v25, 16  ;;  %v8483_v62 = vcombine.low %v7320_v17, %v7324_v57  ;;  %v7653_v44 = vld [vmem:[%s6558_s28 + $0x80] sm:$0x1]  ;;  %v3816_v60 = vrot.slane %v3814_v26, 4 }
  0xe9   : > { %8484 = vst [vmem:[#allocation16_spill] sm:$0xff] %v7653_v44  ;;  %v3840_v31 = vrot.slane %v3838_v4, 4  ;;  %v3843_v8 = vrot.slane %v3841_v27, 5  ;;  %v7657_v10 = vrot.slane %v3847_v3, 5  ;;  %v3853_v51 = vrot.slane %v3851_v50, 4 }
  0xea   : > { %v7660_v25 = vld [vmem:[%s6558_s28 + $0xa0] sm:$0xf]  ;;  %v3864_v17 = vrot.slane %v3862_v52, 4  ;;  %v3867_v57 = vrot.slane %v3865_v53, 5  ;;  %v3889_v9 = vshll.u32 %v5532_v48, 16  ;;  %v3796_v26 = vor.u32 %v3795_v18, %v7618_v33 }
  0xeb   : > { %v3833_v27 = vshll.u32 %v7653_v44, 16  ;;  %v7672_v3 = vld [vmem:[%s6558_s28 + $0x98] sm:$0x1]  ;;  %v3895_v50 = vshll.u32 %v7660_v25, 16  ;;  %v3899_v52 = vshrl.u32 %v7660_v25, 16  ;;  %v3844_v22 = vor.u32 %v3843_v8, %v3840_v31 }
  0xec   : > { %6037 = vmatmul.mubr.msk.bf16.gmra.mrb[28].mxu0 %vm696_vm3, %v6416_v61  ;;  %v7643_v61 = vrot.slane %v3799_v6, 5  ;;  %v3829_v6 = vrot.slane %v3827_v34, 4  ;;  %v3877_v34 = vrot.slane %v3875_v23, 4  ;;  %v3857_v33 = vshll.u32 %v7663_v2, 16 }
  0xed   : > { %5885 = vmatmul.mubr.msk.bf16.gmra.mrb[12].mxu1 %vm696_vm3, %v8482_v7  ;;  %6042 = vmatprep.mubr.msk.bf16.mxu0 %vm696_vm3, %v7385_v20  ;;  %v3819_v7 = vrot.slane %v3817_v49, 5  ;;  %v7655_v20 = vrot.slane %v3823_v46, 5  ;;  %v3809_v49 = vshll.u32 %v7635_v45, 16  ;;  %v7667_v46 = vrot.slane %v3871_v63, 5 }
  0xee   : > { %5888 = vmatprep.mubr.msk.bf16.mxu1 %vm696_vm3, %v8483_v62  ;;  %v3886_v62 = vshrl.u32 %v5532_v48, 16  ;;  %v3806_v4 = vor.u32 %v3805_v59, %v7643_v61  ;;  %v3854_v23 = vor.u32 %v3853_v51, %v7657_v10  ;;  %v3868_v59 = vor.u32 %v3867_v57, %v3864_v17  ;;  %v7705_v57 = vld [vmem:[%s6558_s28 + $0xa4] sm:$0x1] }
  0xef   : > { %v3820_v53 = vor.u32 %v3819_v7, %v3816_v60  ;;  %v3830_v48 = vor.u32 %v3829_v6, %v7655_v20  ;;  %v3891_v18 = vrot.slane %v3889_v9, 5  ;;  %v8485_v44 = vcombine.low %v7332_v11, %v7336_v40 }
  0xf0   : > { %v3888_v63 = vrot.slane %v3886_v62, 4  ;;  %v8486_v31 = vrot.slane %v7594_v54, 5  ;;  %v3811_v51 = vrot.slane %v3809_v49, 5  ;;  %v3878_v60 = vor.u32 %v3877_v34, %v7667_v46  ;;  %v7708_v34 = vld [vmem:[%s6558_s28 + $0xac] sm:$0xf] }
  0xf1   : > { %v3881_v9 = vshll.u32 %v7672_v3, 16  ;;  %v8487_v11 = vcombine.low %v7404_v39, %v7408_v55  ;;  %v3797_v40 = vrot.slane %v3796_v26, 4  ;;  %v7701_v54 = vrot.slane %v3895_v50, 5 }
  0xf2   : > { %v3821_v7 = vrot.slane %v3820_v53, 4  ;;  %v3831_v6 = vrot.slane %v3830_v48, 4  ;;  %v3835_v8 = vrot.slane %v3833_v27, 5  ;;  %v3859_v17 = vrot.slane %v3857_v33, 5  ;;  %v7718_v48 = vld [vmem:[%s6558_s28 + $0xb0] sm:$0x1] }
  0xf3   : > { %v3845_v39 = vrot.slane %v3844_v22, 4  ;;  %v3855_v55 = vrot.slane %v3854_v23, 4  ;;  %v3869_v62 = vrot.slane %v3868_v59, 4  ;;  %v3892_v49 = vor.u32 %v3891_v18, %v3888_v63 }
  0xf4   : > { %6043 = vmatmul.mubr.msk.bf16.vlgmr.msra.gmra.mrb[0].mxu0 %vm696_vm3, %v7448_v16  ;;  %v7691_v16 = vsel %vm6810_vm7, %v7616_v28, %v8486_v31  ;;  %v3901_v28 = vrot.slane %v3899_v52, 4  ;;  %v3883_v26 = vrot.slane %v3881_v9, 5  ;;  %v3802_v52 = vsel %vm6584_vm4, %v3797_v40, %v7643_v61 }
  0xf5   : > { %5889 = vmatmul.mubr.msk.bf16.gmra.mrb[16].mxu1 %vm696_vm3, %v8485_v44  ;;  %6075 = vmatpush3.bf16.msra.mxu0 %v7389_v14  ;;  %v3807_v14 = vrot.slane %v3806_v4, 4  ;;  %v5535_v44 = vld [vmem:[%s6558_s28 + $0xa8] sm:$0xf]  ;;  %v3905_v22 = vshll.u32 %v7705_v57, 16  ;;  %v3826_v33 = vsel %vm6584_vm4, %v3821_v7, %v7655_v20  ;;  %v3836_v23 = vsel %vm6584_vm4, %v3831_v6, %v3835_v8 }
  0xf6   : > { %5892 = vmatprep.mubr.msk.bf16.mxu1 %vm696_vm3, %v8487_v11  ;;  %6046 = vmatprep.mubr.msk.bf16.mxu0 %vm696_vm3, %v7459_v29  ;;  %v3879_v29 = vrot.slane %v3878_v60, 4  ;;  %v3910_v4 = vshrl.u32 %v5535_v44, 16  ;;  %v3913_v50 = vshll.u32 %v5535_v44, 16  ;;  %v3902_v53 = vor.u32 %v3901_v28, %v7701_v54  ;;  %v5584_v11 = vld [vmem:[%s6558_s28 + $0x48] sm:$0xe] }
  0xf7   : > { %v3812_v27 = vsel %vm6584_vm4, %v3807_v14, %v3811_v51  ;;  %v3919_v59 = vshll.u32 %v7708_v34, 16  ;;  %v3923_v61 = vshrl.u32 %v7708_v34, 16  ;;  %v3850_v63 = vsel %vm6584_vm4, %v3845_v39, %v7657_v10  ;;  %v7783_v39 = vld [vmem:[%s6558_s28 + $0xb8] sm:$0xf] }
  0xf8   : > { %v3860_v18 = vsel %vm6584_vm4, %v3855_v55, %v3859_v17  ;;  %v3874_v20 = vsel %vm6584_vm4, %v3869_v62, %v7667_v46  ;;  %v3893_v31 = vrot.slane %v3892_v49, 4  ;;  %v8488_v51 = vcombine.low %v7421_v12, %v7436_v35 }
  0xf9   : > { %v3912_v10 = vrot.slane %v3910_v4, 4  ;;  %v3915_v60 = vrot.slane %v3913_v50, 5  ;;  %v3929_v9 = vshll.u32 %v7718_v48, 16  ;;  %v8489_v46 = vcombine.low %v7506_v21, %v7531_v56  ;;  %v5538_v21 = vld [vmem:[%s6558_s28 + $0xb4] sm:$0xf] }
  0xfa   : > { %v5205_v12 = vcombine.low %v7582_v42, %v7589_v47  ;;  %v8490_v35 = vsel %vm6584_vm4, %v7602_v5, %v7591_v41  ;;  %v3903_v14 = vrot.slane %v3902_v53, 4  ;;  %v3907_v28 = vrot.slane %v3905_v22, 5  ;;  %v5586_v4 = vld [vmem:[%s6558_s28 + $0x60] sm:$0xe]  ;;  %v5587_v53 = vld [vmem:[%s6558_s28 + $0x6c] sm:$0xe] }
  0xfb   : > { %v5206_v56 = vcombine.low %v7606_v43, %v7691_v16  ;;  %v7766_v44 = vcombine.low %v3802_v52, %v3812_v27  ;;  %v7768_v42 = vrot.slane %v3919_v59, 5  ;;  %v3925_v47 = vrot.slane %v3923_v61, 4  ;;  %v8499_v16 = vld [vmem:[#allocation4_spill] sm:$0xff] }
  0xfc   : > { %6047 = vmatmul.mubr.msk.bf16.gmra.mrb[4].mxu0 %vm696_vm3, %v7562_v37  ;;  %v3884_v37 = vsel %vm6584_vm4, %v3879_v29, %v3883_v26  ;;  %v7770_v41 = vcombine.low %v3826_v33, %v3836_v23  ;;  %v7772_v5 = vcombine.low %v3850_v63, %v3860_v18  ;;  %v3898_v6 = vsel %vm6584_vm4, %v3893_v31, %v7701_v54  ;;  %v8492_v23 = vld [vmem:[#allocation11_spill] sm:$0xff]  ;;  %v5541_v63 = vld [vmem:[%s6558_s28 + $0xc0] sm:$0xf]  ;;  %v8494_v18 = vld [vmem:[#allocation9_spill] sm:$0xff] }
  0xfd   : > { %5893 = vmatmul.mubr.msk.bf16.gmra.mrb[20].mxu1 %vm696_vm3, %v8488_v51  ;;  %6050 = vmatprep.mubr.msk.bf16.mxu0 %vm696_vm3, %v7576_v58  ;;  %v8491_v58 = vsel %vm6584_vm4, %v7564_v19, %v7519_v1  ;;  %v7774_v7 = vcombine.low %v3874_v20, %v3884_v37  ;;  %v5600_v1 = vrot.slane %v5584_v11, 9  ;;  %v5585_v19 = vld [vmem:[%s6558_s28 + $0x54] sm:$0xe]  ;;  %v3916_v8 = vor.u32 %v3915_v60, %v3912_v10  ;;  %v8495_v31 = vld [vmem:[#allocation10_spill] sm:$0xff] }
  0xfe   : > { %5896 = vmatprep.mubr.msk.bf16.mxu1 %vm696_vm3, %v8489_v46  ;;  %v5554_v40 = vcombine.low %v8491_v58, %v8490_v35  ;;  %v7780_v17 = vrot.slane %v3929_v9, 5  ;;  %v3934_v55 = vshrl.u32 %v5538_v21, 16  ;;  %v3908_v62 = vsel %vm6584_vm4, %v3903_v14, %v3907_v28  ;;  %v8496_v9 = vld [vmem:[#allocation12_spill] sm:$0xff]  ;;  %v7832_v35 = vld [vmem:[%s6558_s28 + $0xbc] sm:$0x1] }
  0xff   : > { %v3937_v49 = vshll.u32 %v5538_v21, 16  ;;  %v4393_v29 = vrot.slane %v7414_v0, 5  ;;  %v4396_v26 = vrot.slane %v7468_v38, 5  ;;  %v3926_v50 = vor.u32 %v3925_v47, %v7768_v42  ;;  %v7835_v58 = vld [vmem:[%s6558_s28 + $0xc4] sm:$0xf] }
 0x100   : > { %v5601_v52 = vrot.slane %v5585_v19, 9  ;;  %v4400_v54 = vrot.slane %v7425_v24, 5  ;;  %v4403_v27 = vrot.slane %v7477_v15, 5  ;;  %v3943_v22 = vshll.u32 %v7783_v39, 16  ;;  %v5588_v19 = vld [vmem:[%s6558_s28 + $0x78] sm:$0xe] }
 0x101   : > { %v3947_v33 = vshrl.u32 %v7783_v39, 16  ;;  %v7800_v0 = vsel %vm6810_vm7, %v5600_v1, %v4393_v29  ;;  %v4395_v38 = vrot.slane %v4393_v29, 4  ;;  %v8493_v59 = vcombine.low %v7539_v36, %v8492_v23  ;;  %v8497_v23 = vld [vmem:[#allocation13_spill] sm:$0xff] }
 0x102   : > { %v7807_v24 = vcombine.low %v3898_v6, %v3908_v62  ;;  %v7811_v15 = vsel %vm6810_vm7, %v5601_v52, %v4400_v54  ;;  %v5602_v61 = vrot.slane %v5586_v4, 9  ;;  %v4407_v20 = vrot.slane %v8494_v18, 5  ;;  %v6417_v6 = vld [vmem:[%s6558_s28 + $0xc] sm:$0xff]  }
 0x103   : > { %v7817_v36 = vsel %vm6810_vm7, %v4395_v38, %v4396_v26  ;;  %v4410_v51 = vrot.slane %v8495_v31, 5  ;;  %v5603_v37 = vrot.slane %v5587_v53, 9  ;;  %v4414_v11 = vrot.slane %v8496_v9, 5 }
 0x104   : > { %6051 = vmatmul.mubr.msk.bf16.gmra.mrb[8].mxu0 %vm696_vm3, %v7585_v30  ;;  %v4402_v30 = vrot.slane %v4400_v54, 4  ;;  %v5617_v10 = vcombine.low %v7800_v0, %v7817_v36  ;;  %v4417_v46 = vrot.slane %v7635_v45, 5  ;;  %v7841_v14 = vsel %vm6810_vm7, %v5602_v61, %v4407_v20 }
 0x105   : > { %5897 = vmatmul.mubr.msk.bf16.gmra.mrb[24].mxu1 %vm696_vm3, %v8493_v59  ;;  %6054 = vmatprep.mubr.msk.bf16.mxu0 %vm696_vm3, %v5554_v40  ;;  %v4409_v28 = vrot.slane %v4407_v20, 4  ;;  %v7843_v21 = vrot.slane %v3934_v55, 4  ;;  %v3958_v47 = vshrl.u32 %v5541_v63, 16  ;;  %v7847_v45 = vsel %vm6810_vm7, %v5603_v37, %v4414_v11  ;;  %v5315_v55 = vld [vmem:[%s6558_s28 + $0x78] sm:$0xf]  ;;  %v8498_v59 = vld [vmem:[#allocation16_spill] sm:$0xff] }
 0x106   : > { %5900 = vmatprep.mubr.msk.bf16.mxu1 %vm696_vm3, %v5205_v12  ;;  %v7825_v60 = vsel %vm6810_vm7, %v4402_v30, %v4403_v27  ;;  %v7829_v12 = vrot.slane %v3916_v8, 4  ;;  %v4416_v1 = vrot.slane %v4414_v11, 4  ;;  %v7851_v8 = vrot.slane %v3926_v50, 4 }
 0x107   : > { %v5618_v40 = vcombine.low %v7811_v15, %v7825_v60  ;;  %v7853_v62 = vrot.slane %v3937_v49, 5  ;;  %v3961_v29 = vshll.u32 %v5541_v63, 16  ;;  %v7857_v26 = vsel %vm6810_vm7, %v4409_v28, %v4410_v51  ;;  %v8501_v28 = vld [vmem:[#allocation14_spill] sm:$0xff] }
 0x108   : > { %v7860_v4 = vrot.slane %v3943_v22, 5  ;;  %v7862_v52 = vrot.slane %v3947_v33, 4  ;;  %v5619_v54 = vcombine.low %v7841_v14, %v7857_v26  ;;  %v7868_v27 = vsel %vm6810_vm7, %v4416_v1, %v4417_v46  ;;  %v5589_v33 = vld [vmem:[%s6558_s28 + $0x84] sm:$0xe]  ;;  %v6418_v1 = vld [vmem:[%s6558_s28 + $0x18] sm:$0xff]  }
 0x109   : > { %v3953_v49 = vshll.u32 %v7832_v35, 16  ;;  %v3967_v50 = vshll.u32 %v7835_v58, 16  ;;  %v5620_v53 = vcombine.low %v7847_v45, %v7868_v27  ;;  %v5604_v22 = vrot.slane %v5588_v19, 9  ;;  %v6480_v60 = vld [vmem:[%s6558_s28 + $0xa0] sm:$0xf] }
 0x10a   : > { %v3960_v38 = vrot.slane %v3958_v47, 4  ;;  %v4424_v30 = vrot.slane %v8498_v59, 5  ;;  %v2283_v61 = vshrl.u32 %v5315_v55, 16  ;;  %v3963_v63 = vrot.slane %v3961_v29, 5  ;;  %v5544_v29 = vld [vmem:[%s6558_s28 + $0xcc] sm:$0xf] }
 0x10b   : > { %v3971_v18 = vshrl.u32 %v7835_v58, 16  ;;  %v2286_v43 = vshll.u32 %v5315_v55, 16  ;;  %v5605_v37 = vrot.slane %v5589_v33, 9  ;;  %v3922_v9 = vsel %vm6584_vm4, %v7829_v12, %v7768_v42  ;;  %v7911_v55 = vld [vmem:[%s6558_s28 + $0xd0] sm:$0xf] }
 0x10c   : > { %6055 = vmatmul.mubr.msk.bf16.gmra.mrb[12].mxu0 %vm696_vm3, %v7766_v44  ;;  %v4421_v44 = vrot.slane %v8497_v23, 5  ;;  %v2285_v51 = vrot.slane %v2283_v61, 4  ;;  %v3940_v11 = vor.u32 %v7853_v62, %v7843_v21  ;;  %v4428_v47 = vrot.slane %v8501_v28, 5  ;;  %v6419_v21 = vld [vmem:[%s6558_s28 + $0x24] sm:$0xff]   ;;  %v6484_v27 = vld [vmem:[%s6558_s28 + $0xac] sm:$0xf] }
 0x10d   : > { %5901 = vmatmul.mubr.msk.bf16.gmra.mrb[28].mxu1 %vm696_vm3, %v5206_v56  ;;  %6058 = vmatprep.mubr.msk.bf16.mxu0 %vm696_vm3, %v7770_v41  ;;  %v8500_v56 = vld [vmem:[#allocation5_spill] sm:$0xff]  ;;  %v2288_v46 = vrot.slane %v2286_v43, 5  ;;  %v3932_v19 = vsel %vm6584_vm4, %v7851_v8, %v7780_v17  ;;  %v4431_v12 = vrot.slane %v7663_v2, 5  ;;  %v7919_v62 = vrot.slane %v3967_v50, 5  ;;  %v5590_v8 = vld [vmem:[%s6558_s28 + $0x90] sm:$0xe] }
 0x10e   : > { %5906 = vmatprep.mubr.msk.bf16.mxu1 %vm696_vm3, %v6417_v6  ;;  %v2305_v41 = vsel %vm6584_vm4, %v8500_v56, %v8499_v16  ;;  %v7893_v20 = vsel %vm6810_vm7, %v5604_v22, %v4421_v44  ;;  %v4423_v31 = vrot.slane %v4421_v44, 4  ;;  %v3950_v6 = vor.u32 %v7862_v52, %v7860_v4  ;;  %v7925_v52 = vld [vmem:[%s6558_s28 + $0xc8] sm:$0x1]  ;;  %v8503_v16 = vld [vmem:[#allocation2_spill] sm:$0xff] }
 0x10f   : > { %v3973_v22 = vrot.slane %v3971_v18, 4  ;;  %v2289_v17 = vor.u32 %v2288_v46, %v2285_v51  ;;  %v3955_v23 = vrot.slane %v3953_v49, 5  ;;  %v3964_v44 = vor.u32 %v3963_v63, %v3960_v38  ;;  %v8504_v51 = vld [vmem:[#allocation3_spill] sm:$0xff] }
 0x110   : > { %v7915_v42 = vsel %vm6810_vm7, %v4423_v31, %v4424_v30  ;;  %v7929_v59 = vsel %vm6810_vm7, %v5605_v37, %v4428_v47  ;;  %v4430_v30 = vrot.slane %v4428_v47, 4  ;;  %v3982_v2 = vshrl.u32 %v5544_v29, 16 }
 0x111   : > { %v5621_v33 = vcombine.low %v7893_v20, %v7915_v42  ;;  %v3985_v50 = vshll.u32 %v5544_v29, 16  ;;  %v3991_v61 = vshll.u32 %v7911_v55, 16  ;;  %v2290_v18 = vrot.slane %v2289_v17, 4  ;;  %v6420_v29 = vld [vmem:[%s6558_s28 + $0x30] sm:$0xff]  }
 0x112   : > { %v3995_v49 = vshrl.u32 %v7911_v55, 16  ;;  %v7940_v38 = vsel %vm6810_vm7, %v4430_v30, %v4431_v12  ;;  %v5606_v63 = vrot.slane %v5590_v8, 9  ;;  %v3974_v56 = vor.u32 %v3973_v22, %v7919_v62 }
 0x113   : > { %v3977_v31 = vshll.u32 %v7925_v52, 16  ;;  %v5622_v37 = vcombine.low %v7929_v59, %v7940_v38  ;;  %v5560_v46 = vcombine.low %v3922_v9, %v3932_v19  ;;  %v3941_v28 = vrot.slane %v3940_v11, 4  ;;  %v5591_v11 = vld [vmem:[%s6558_s28 + $0x9c] sm:$0xe] }
 0x114   : > { %6059 = vmatmul.mubr.msk.bf16.gmra.mrb[16].mxu0 %vm696_vm3, %v7772_v5  ;;  %v8502_v5 = vld [vmem:[#allocation15_spill] sm:$0xff]  ;;  %v3951_v47 = vrot.slane %v3950_v6, 4  ;;  %v3965_v12 = vrot.slane %v3964_v44, 4  ;;  %v4438_v8 = vrot.slane %v7672_v3, 5  ;;  %v3984_v30 = vrot.slane %v3982_v2, 4  ;;  %v6421_v19 = vld [vmem:[%s6558_s28 + $0x3c] sm:$0xff]  }
 0x115   : > { %5907 = vmatmul.mubr.msk.bf16.vlgmr.msra.gmra.mrb[0].mxu1 %vm696_vm3, %v6418_v1  ;;  %6062 = vmatprep.mubr.msk.bf16.mxu0 %vm696_vm3, %v7774_v7  ;;  %v4435_v43 = vrot.slane %v8502_v5, 5  ;;  %v2295_v7 = vsel %vm6584_vm4, %v2290_v18, %v8504_v51  ;;  %v3987_v18 = vrot.slane %v3985_v50, 5  ;;  %v7963_v5 = vrot.slane %v3991_v61, 5 }
 0x116   : > { %6109 = vmatpush3.bf16.msra.mxu1 %v8503_v16  ;;  %5910 = vmatprep.mubr.msk.bf16.mxu1 %vm696_vm3, %v6419_v21  ;;  %v7952_v1 = vcombine.low %v2295_v7, %v2305_v41  ;;  %v7956_v21 = vld [vmem:[%s6558_s28 + $0xd4] sm:$0x1]  ;;  %v3997_v9 = vrot.slane %v3995_v49, 4  ;;  %v3975_v41 = vrot.slane %v3974_v56, 4  ;;  %v3979_v6 = vrot.slane %v3977_v31, 5 }
 0x117   : > { %v7960_v22 = vsel %vm6810_vm7, %v5606_v63, %v4435_v43  ;;  %v4437_v17 = vrot.slane %v4435_v43, 4  ;;  %v3946_v63 = vsel %vm6584_vm4, %v3941_v28, %v7860_v4  ;;  %v3956_v2 = vsel %vm6584_vm4, %v3951_v47, %v3955_v23  ;;  %v6471_v16 = vld [vmem:[%s6558_s28 + $0x1c] sm:$0xf]  ;;  %v5592_v28 = vld [vmem:[%s6558_s28 + $0xa8] sm:$0xe] }
 0x118   : > { %v4001_v50 = vshll.u32 %v7956_v21, 16  ;;  %v5607_v61 = vrot.slane %v5591_v11, 9  ;;  %v4442_v49 = vrot.slane %v7660_v25, 5  ;;  %v3970_v4 = vsel %vm6584_vm4, %v3965_v12, %v7919_v62  ;;  %v5580_v62 = vld [vmem:[%s6558_s28 + $0x18] sm:$0xe]  ;;  %v6422_v47 = vld [vmem:[%s6558_s28 + $0x48] sm:$0xff]  }
 0x119   : > { %v7969_v44 = vsel %vm6810_vm7, %v4437_v17, %v4438_v8  ;;  %v3998_v43 = vor.u32 %v3997_v9, %v7963_v5  ;;  %v4445_v23 = vrot.slane %v7705_v57, 5  ;;  %v3980_v25 = vsel %vm6584_vm4, %v3975_v41, %v3979_v6  ;;  %v6472_v11 = vld [vmem:[%s6558_s28 + $0x20] sm:$0x1] }
 0x11a   : > { %v5623_v3 = vcombine.low %v7960_v22, %v7969_v44  ;;  %v4365_v56 = vrot.slane %v6471_v16, 5  ;;  %v7995_v31 = vsel %vm6810_vm7, %v5607_v61, %v4442_v49  ;;  %v4444_v51 = vrot.slane %v4442_v49, 4  ;;  %v5593_v49 = vld [vmem:[%s6558_s28 + $0xb4] sm:$0xe] }
 0x11b   : > { %v5561_v7 = vcombine.low %v3946_v63, %v3956_v2  ;;  %v3999_v17 = vrot.slane %v3998_v43, 4  ;;  %v5608_v41 = vrot.slane %v5592_v28, 9  ;;  %v4449_v6 = vrot.slane %v7708_v34, 5  ;;  %v5581_v2 = vld [vmem:[%s6558_s28 + $0x24] sm:$0xe] }
 0x11c   : > { %6063 = vmatmul.mubr.msk.bf16.gmra.mrb[20].mxu0 %vm696_vm3, %v7807_v24  ;;  %v3988_v24 = vor.u32 %v3987_v18, %v3984_v30  ;;  %v8000_v57 = vsel %vm6810_vm7, %v4444_v51, %v4445_v23  ;;  %v6423_v30 = vld [vmem:[%s6558_s28 + $0x54] sm:$0xff]   ;;  %v5596_v18 = vrot.slane %v5580_v62, 9  ;;  %v4367_v9 = vrot.slane %v4365_v56, 4  ;;  %v6475_v28 = vld [vmem:[%s6558_s28 + $0x2c] sm:$0x1] }
 0x11d   : > { %5911 = vmatmul.mubr.msk.bf16.gmra.mrb[4].mxu1 %vm696_vm3, %v6420_v29  ;;  %6066 = vmatprep.mubr.msk.bf16.mxu0 %vm696_vm3, %v5560_v46  ;;  %v4003_v46 = vrot.slane %v4001_v50, 5  ;;  %v5562_v29 = vcombine.low %v3970_v4, %v3980_v25  ;;  %v5624_v8 = vcombine.low %v7995_v31, %v8000_v57  ;;  %v4452_v63 = vrot.slane %v7718_v48, 5  ;;  %v6473_v50 = vld [vmem:[%s6558_s28 + $0x28] sm:$0xf]  ;;  %v5582_v25 = vld [vmem:[%s6558_s28 + $0x30] sm:$0xe] }
 0x11e   : > { %5914 = vmatprep.mubr.msk.bf16.mxu1 %vm696_vm3, %v6421_v19  ;;  %v3989_v12 = vrot.slane %v3988_v24, 4  ;;  %v4368_v19 = vrot.slane %v6472_v11, 5  ;;  %v4372_v61 = vrot.slane %v6473_v50, 5  ;;  %v8023_v48 = vsel %vm6810_vm7, %v5608_v41, %v4449_v6  ;;  %v6425_v11 = vld [vmem:[%s6558_s28 + $0x6c] sm:$0xff]   ;;  %v8505_v41 = vld [vmem:[#allocation6_spill] sm:$0xff] }
 0x11f   : > { %v4004_v34 = vsel %vm6584_vm4, %v3999_v17, %v4003_v46  ;;  %v4451_v24 = vrot.slane %v4449_v6, 4  ;;  %v4366_v43 = vsel %vm6810_vm7, %v5596_v18, %v4365_v56  ;;  %v5597_v51 = vrot.slane %v5581_v2, 9  ;;  %v5594_v50 = vld [vmem:[%s6558_s28 + $0xc0] sm:$0xe]  ;;  %v6489_v31 = vld [vmem:[%s6558_s28 + $0xc8] sm:$0x1] }
 0x120   : > { %v3994_v4 = vsel %vm6584_vm4, %v3989_v12, %v7963_v5  ;;  %v4369_v23 = vsel %vm6810_vm7, %v4367_v9, %v4368_v19  ;;  %v6474_v5 = vld [vmem:[%s6558_s28 + $0x34] sm:$0xf]  ;;  %v6424_v12 = vld [vmem:[%s6558_s28 + $0x60] sm:$0xff]   ;;  %v5598_v18 = vrot.slane %v5582_v25, 9  ;;  %v4459_v9 = vrot.slane %v7832_v35, 5 }
 0x121   : > { %v4379_v16 = vrot.slane %v6474_v5, 5  ;;  %v8034_v62 = vsel %vm6810_vm7, %v4451_v24, %v4452_v63  ;;  %v5563_v46 = vcombine.low %v3994_v4, %v4004_v34  ;;  %v5613_v17 = vcombine.low %v4366_v43, %v4369_v23  ;;  %v5583_v24 = vld [vmem:[%s6558_s28 + $0x3c] sm:$0xe] }
 0x122   : > { %v5625_v56 = vcombine.low %v8023_v48, %v8034_v62  ;;  %v4382_v6 = vrot.slane %v8505_v41, 5  ;;  %v4373_v35 = vsel %vm6810_vm7, %v5597_v51, %v4372_v61  ;;  %v5610_v5 = vrot.slane %v5594_v50, 9 }
 0x123   : > { %v4381_v19 = vrot.slane %v4379_v16, 4  ;;  %v4380_v23 = vsel %vm6810_vm7, %v5598_v18, %v4379_v16  ;;  %v4466_v51 = vrot.slane %v7925_v52, 5  ;;  %v2446_v57 = vshll.u32 %v6489_v31, 16 }
 0x124   : > { %6067 = vmatmul.mubr.msk.bf16.gmra.mrb[24].mxu0 %vm696_vm3, %v5561_v7  ;;  %v5609_v7 = vrot.slane %v5593_v49, 9 }
 0x125   : > { %5915 = vmatmul.mubr.msk.bf16.gmra.mrb[8].mxu1 %vm696_vm3, %v6422_v47  ;;  %6070 = vmatprep.mubr.msk.bf16.mxu0 %vm696_vm3, %v5562_v29  ;;  %v4375_v47 = vrot.slane %v6475_v28, 5  ;;  %v4456_v29 = vrot.slane %v7783_v39, 5  ;;  %v8506_v39 = vld [vmem:[#allocation7_spill] sm:$0xff]  ;;  %v4383_v25 = vsel %vm6810_vm7, %v4381_v19, %v4382_v6  ;;  %v5599_v28 = vrot.slane %v5583_v24, 9 }
 0x126   : > { %5918 = vmatprep.mubr.msk.bf16.mxu1 %vm696_vm3, %v6423_v30  ;;  %v4374_v30 = vrot.slane %v4372_v61, 4  ;;  %v4386_v49 = vrot.slane %v8506_v39, 5  ;;  %v4463_v61 = vrot.slane %v7835_v58, 5  ;;  %v6476_v39 = vld [vmem:[%s6558_s28 + $0x70] sm:$0xf]  ;;  %v4470_v24 = vrot.slane %v7911_v55, 5 }
 0x127   : > { %v8046_v63 = vsel %vm6810_vm7, %v5609_v7, %v4456_v29  ;;  %v4458_v2 = vrot.slane %v4456_v29, 4  ;;  %v5312_v7 = vld [vmem:[%s6558_s28 + $0x6c] sm:$0xf]  ;;  %v8507_v29 = vld [vmem:[#allocation8_spill] sm:$0xff] }
 0x128   : > { %v4376_v34 = vsel %vm6810_vm7, %v4374_v30, %v4375_v47  ;;  %v4388_v47 = vrot.slane %v4386_v49, 4  ;;  %v6426_v30 = vld [vmem:[%s6558_s28 + $0x78] sm:$0xff]   ;;  %v8077_v16 = vsel %vm6810_vm7, %v5610_v5, %v4463_v61  ;;  %v4465_v18 = vrot.slane %v4463_v61, 4 }
 0x129   : > { %v8053_v4 = vsel %vm6810_vm7, %v4458_v2, %v4459_v9  ;;  %v5615_v9 = vcombine.low %v4380_v23, %v4383_v25  ;;  %v2259_v19 = vshrl.u32 %v5312_v7, 16  ;;  %v2262_v41 = vshll.u32 %v5312_v7, 16 }
 0x12a   : > { %v5626_v43 = vcombine.low %v8046_v63, %v8053_v4  ;;  %v8082_v58 = vsel %vm6810_vm7, %v4465_v18, %v4466_v51  ;;  %v4387_v6 = vsel %vm6810_vm7, %v5599_v28, %v4386_v49  ;;  %v4473_v49 = vrot.slane %v7956_v21, 5  ;;  %v6428_v51 = vld [vmem:[%s6558_s28 + $0x90] sm:$0xff]   ;;  %v6429_v21 = vld [vmem:[%s6558_s28 + $0x9c] sm:$0xff]  }
 0x12b   : > { %v5627_v50 = vcombine.low %v8077_v16, %v8082_v58  ;;  %v2261_v23 = vrot.slane %v2259_v19, 4  ;;  %v2264_v25 = vrot.slane %v2262_v41, 5  ;;  %v4472_v7 = vrot.slane %v4470_v24, 4 }
 0x12c   : > { %6071 = vmatmul.mubr.msk.bf16.gmra.mrb[28].mxu0 %vm696_vm3, %v5563_v46  ;;  %v5614_v46 = vcombine.low %v4373_v35, %v4376_v34  ;;  %v2268_v35 = vshll.u32 %v6476_v39, 16  ;;  %v2272_v34 = vshrl.u32 %v6476_v39, 16 }
 0x12d   : > { %5919 = vmatmul.mubr.msk.bf16.gmra.mrb[12].mxu1 %vm696_vm3, %v6424_v12  ;;  %6076 = vmatprep.mubr.msk.bf16.mxu0 %vm696_vm3, %v5613_v17  ;;  %v4389_v12 = vrot.slane %v8507_v29, 5  ;;  %v5595_v17 = vld [vmem:[%s6558_s28 + $0xcc] sm:$0xe]  ;;  %v8104_v55 = vsel %vm6810_vm7, %v4472_v7, %v4473_v49 }
 0x12e   : > { %5922 = vmatprep.mubr.msk.bf16.mxu1 %vm696_vm3, %v6425_v11  ;;  %v6427_v11 = vld [vmem:[%s6558_s28 + $0x84] sm:$0xff]   ;;  %v5611_v52 = vrot.slane %v5595_v17, 9  ;;  %v2274_v28 = vrot.slane %v2272_v34, 4  ;;  %v6477_v17 = vld [vmem:[%s6558_s28 + $0x74] sm:$0x1] }
 0x12f   : > { %v4390_v2 = vsel %vm6810_vm7, %v4388_v47, %v4389_v12  ;;  %v5318_v47 = vld [vmem:[%s6558_s28 + $0x84] sm:$0xf]  ;;  %v2265_v12 = vor.u32 %v2264_v25, %v2261_v23  ;;  %v6431_v34 = vld [vmem:[%s6558_s28 + $0xb4] sm:$0xff]  }
 0x130   : > { %v8099_v5 = vsel %vm6810_vm7, %v5611_v52, %v4470_v24  ;;  %v5616_v61 = vcombine.low %v4387_v6, %v4390_v2  ;;  %v2310_v18 = vshll.u32 %v5318_v47, 16  ;;  %v5321_v6 = vld [vmem:[%s6558_s28 + $0x90] sm:$0xf]  ;;  %v6430_v2 = vld [vmem:[%s6558_s28 + $0xa8] sm:$0xff]  }
 0x131   : > { %v5628_v29 = vcombine.low %v8099_v5, %v8104_v55  ;;  %v2266_v52 = vrot.slane %v2265_v12, 4  ;;  %v2331_v23 = vshrl.u32 %v5321_v6, 16  ;;  %v2334_v25 = vshll.u32 %v5321_v6, 16 }
 0x132   : > { %v2364_v12 = vshll.u32 %v6480_v60, 16 }
 0x133   : > { %v2336_v14 = vrot.slane %v2334_v25, 5  ;;  %v6483_v25 = vld [vmem:[%s6558_s28 + $0xa4] sm:$0x1] }
 0x134   : > { %6077 = vmatmul.mubr.msk.bf16.vlgmr.msra.gmra.mrb[0].mxu0 %vm696_vm3, %v5614_v46  ;;  %v2270_v46 = vrot.slane %v2268_v35, 5  ;;  %v5324_v35 = vld [vmem:[%s6558_s28 + $0x9c] sm:$0xf]  ;;  %v8146_v6 = vrot.slane %v2364_v12, 5 }
 0x135   : > { %5923 = vmatmul.mubr.msk.bf16.gmra.mrb[16].mxu1 %vm696_vm3, %v6426_v30  ;;  %6080 = vmatprep.mubr.msk.bf16.mxu0 %vm696_vm3, %v5615_v9  ;;  %v2278_v30 = vshll.u32 %v6477_v17, 16  ;;  %v2307_v9 = vshrl.u32 %v5318_v47, 16  ;;  %v2358_v47 = vshll.u32 %v5324_v35, 16  ;;  %v6481_v17 = vld [vmem:[%s6558_s28 + $0x8c] sm:$0x1] }
 0x136   : > { %5926 = vmatprep.mubr.msk.bf16.mxu1 %vm696_vm3, %v6427_v11  ;;  %v2275_v13 = vor.u32 %v2274_v28, %v2270_v46  ;;  %v6478_v11 = vld [vmem:[%s6558_s28 + $0x88] sm:$0xf]  ;;  %v2271_v7 = vsel %vm6584_vm4, %v2266_v52, %v2270_v46 }
 0x137   : > { %v2316_v19 = vshll.u32 %v6478_v11, 16  ;;  %v2320_v41 = vshrl.u32 %v6478_v11, 16  ;;  %v2280_v0 = vrot.slane %v2278_v30, 5  ;;  %v2309_v36 = vrot.slane %v2307_v9, 4 }
 0x138   : > { %v2276_v39 = vrot.slane %v2275_v13, 4  ;;  %v2326_v30 = vshll.u32 %v6481_v17, 16  ;;  %v2333_v9 = vrot.slane %v2331_v23, 4  ;;  %v2360_v11 = vrot.slane %v2358_v47, 5 }
 0x139   : > { %v8123_v24 = vrot.slane %v2316_v19, 5  ;;  %v2322_v49 = vrot.slane %v2320_v41, 4  ;;  %v6432_v19 = vld [vmem:[%s6558_s28 + $0xc0] sm:$0xff]  }
 0x13a   : > { %v2281_v46 = vsel %vm6584_vm4, %v2276_v39, %v2280_v0  ;;  %v5327_v39 = vld [vmem:[%s6558_s28 + $0xa8] sm:$0xf] }
 0x13b   : > { %v2323_v13 = vor.u32 %v2322_v49, %v8123_v24  ;;  %v5345_v41 = vcombine.low %v2271_v7, %v2281_v46  ;;  %v2374_v7 = vshll.u32 %v6483_v25, 16  ;;  %v2382_v45 = vshll.u32 %v5327_v39, 16 }
 0x13c   : > { %6081 = vmatmul.mubr.msk.bf16.gmra.mrb[4].mxu0 %vm696_vm3, %v5616_v61  ;;  %v6479_v61 = vld [vmem:[%s6558_s28 + $0x94] sm:$0xf] }
 0x13d   : > { %5927 = vmatmul.mubr.msk.bf16.gmra.mrb[20].mxu1 %vm696_vm3, %v6428_v51  ;;  %6084 = vmatprep.mubr.msk.bf16.mxu0 %vm696_vm3, %v5617_v10  ;;  %v2312_v10 = vrot.slane %v2310_v18, 5  ;;  %v2340_v51 = vshll.u32 %v6479_v61, 16  ;;  %v2344_v28 = vshrl.u32 %v6479_v61, 16  ;;  %v2324_v0 = vrot.slane %v2323_v13, 4 }
 0x13e   : > { %5930 = vmatprep.mubr.msk.bf16.mxu1 %vm696_vm3, %v6429_v21  ;;  %v2355_v21 = vshrl.u32 %v5324_v35, 16  ;;  %v6482_v35 = vld [vmem:[%s6558_s28 + $0x98] sm:$0x1]  ;;  %v2379_v61 = vshrl.u32 %v5327_v39, 16  ;;  %v5333_v39 = vld [vmem:[%s6558_s28 + $0xc0] sm:$0xf] }
 0x13f   : > { %v2313_v15 = vor.u32 %v2312_v10, %v2309_v36  ;;  %v8143_v26 = vrot.slane %v2340_v51, 5  ;;  %v2328_v36 = vrot.slane %v2326_v30, 5  ;;  %v2337_v10 = vor.u32 %v2336_v14, %v2333_v9  ;;  %v5330_v51 = vld [vmem:[%s6558_s28 + $0xb4] sm:$0xf] }
 0x140   : > { %v2357_v18 = vrot.slane %v2355_v21, 4  ;;  %v2392_v21 = vshrl.u32 %v6484_v27, 16  ;;  %v2403_v20 = vshrl.u32 %v5330_v51, 16  ;;  %v2406_v42 = vshll.u32 %v5330_v51, 16 }
 0x141   : > { %v2314_v52 = vrot.slane %v2313_v15, 4  ;;  %v2329_v46 = vsel %vm6584_vm4, %v2324_v0, %v2328_v36  ;;  %v2338_v15 = vrot.slane %v2337_v10, 4  ;;  %v2376_v30 = vrot.slane %v2374_v7, 5 }
 0x142   : > { %v2361_v23 = vor.u32 %v2360_v11, %v2357_v18  ;;  %v2381_v9 = vrot.slane %v2379_v61, 4  ;;  %v2394_v11 = vrot.slane %v2392_v21, 4  ;;  %v6488_v61 = vld [vmem:[%s6558_s28 + $0xbc] sm:$0x1] }
 0x143   : > { %v2319_v47 = vsel %vm6584_vm4, %v2314_v52, %v8123_v24  ;;  %v2343_v0 = vsel %vm6584_vm4, %v2338_v15, %v8143_v26  ;;  %v2422_v22 = vshll.u32 %v6488_v61, 16 }
 0x144   : > { %6085 = vmatmul.mubr.msk.bf16.gmra.mrb[8].mxu0 %vm696_vm3, %v5618_v40  ;;  %v2368_v40 = vshrl.u32 %v6480_v60, 16  ;;  %v2362_v17 = vrot.slane %v2361_v23, 4  ;;  %v5347_v24 = vcombine.low %v2319_v47, %v2329_v46 }
 0x145   : > { %5931 = vmatmul.mubr.msk.bf16.gmra.mrb[24].mxu1 %vm696_vm3, %v6430_v2  ;;  %6088 = vmatprep.mubr.msk.bf16.mxu0 %vm696_vm3, %v5619_v54  ;;  %v2346_v54 = vrot.slane %v2344_v28, 4 }
 0x146   : > { %5934 = vmatprep.mubr.msk.bf16.mxu1 %vm696_vm3, %v6431_v34  ;;  %v2370_v2 = vrot.slane %v2368_v40, 4  ;;  %v2350_v34 = vshll.u32 %v6482_v35, 16  ;;  %v2367_v10 = vsel %vm6584_vm4, %v2362_v17, %v8146_v6  ;;  %v2448_v17 = vrot.slane %v2446_v57, 5 }
 0x147   : > { %v2347_v49 = vor.u32 %v2346_v54, %v8143_v26  ;;  %v2384_v54 = vrot.slane %v2382_v45, 5  ;;  %v6486_v26 = vld [vmem:[%s6558_s28 + $0xb0] sm:$0x1] }
 0x148   : > { %v2371_v28 = vor.u32 %v2370_v2, %v8146_v6  ;;  %v2352_v60 = vrot.slane %v2350_v34, 5  ;;  %v2398_v35 = vshll.u32 %v6486_v26, 16  ;;  %v2427_v34 = vshrl.u32 %v5333_v39, 16 }
 0x149   : > { %v2348_v13 = vrot.slane %v2347_v49, 4  ;;  %v2385_v38 = vor.u32 %v2384_v54, %v2381_v9  ;;  %v2430_v6 = vshll.u32 %v5333_v39, 16  ;;  %v6487_v49 = vld [vmem:[%s6558_s28 + $0xc4] sm:$0xf] }
 0x14a   : > { %v2372_v14 = vrot.slane %v2371_v28, 4  ;;  %v2436_v23 = vshll.u32 %v6487_v49, 16  ;;  %v2440_v25 = vshrl.u32 %v6487_v49, 16  ;;  %v2400_v45 = vrot.slane %v2398_v35, 5 }
 0x14b   : > { %v2353_v36 = vsel %vm6584_vm4, %v2348_v13, %v2352_v60  ;;  %v2386_v51 = vrot.slane %v2385_v38, 4  ;;  %v2424_v60 = vrot.slane %v2422_v22, 5 }
 0x14c   : > { %6089 = vmatmul.mubr.msk.bf16.gmra.mrb[12].mxu0 %vm696_vm3, %v5620_v53  ;;  %v2388_v53 = vshll.u32 %v6484_v27, 16  ;;  %v2377_v59 = vsel %vm6584_vm4, %v2372_v14, %v2376_v30  ;;  %v5348_v44 = vcombine.low %v2343_v0, %v2353_v36  ;;  %v2429_v27 = vrot.slane %v2427_v34, 4 }
 0x14d   : > { %5935 = vmatmul.mubr.msk.bf16.gmra.mrb[28].mxu1 %vm696_vm3, %v6432_v19  ;;  %6092 = vmatprep.mubr.msk.bf16.mxu0 %vm696_vm3, %v5621_v33  ;;  %v6485_v33 = vld [vmem:[%s6558_s28 + $0xb8] sm:$0xf]  ;;  %v2405_v19 = vrot.slane %v2403_v20, 4  ;;  %v2438_v21 = vrot.slane %v2436_v23, 5  ;;  %v2442_v47 = vrot.slane %v2440_v25, 4  ;;  %s208_s28 = scalar_lea.vmem %s8440_s4, %s5108_s25 }
 0x14e   : > { %5956 = vmatprep.mubr.msk.bf16.mxu1 %vm696_vm3, %v5345_v41  ;;  %v2412_v12 = vshll.u32 %v6485_v33, 16  ;;  %v2416_v40 = vshrl.u32 %v6485_v33, 16  ;;  %v2390_v18 = vrot.slane %v2388_v53, 5  ;;  %v2408_v41 = vrot.slane %v2406_v42, 5 }
 0x14f   : > { %v2432_v53 = vrot.slane %v2430_v6, 5 }
 0x150   : > { %v2414_v52 = vrot.slane %v2412_v12, 5  ;;  %v2418_v2 = vrot.slane %v2416_v40, 4  ;;  %v2391_v20 = vsel %vm6584_vm4, %v2386_v51, %v2390_v18  ;;  %v2443_v12 = vor.u32 %v2442_v47, %v2438_v21 }
 0x151   : > { %v2433_v33 = vor.u32 %v2432_v53, %v2429_v27 }
 0x152   : > { %v2419_v7 = vor.u32 %v2418_v2, %v2414_v52  ;;  %v2444_v13 = vrot.slane %v2443_v12, 4  ;;  %v8254_v2 = vld [vmem:[%s8438_s2] ss:$0 sm:$0xff] }
 0x153   : > { %v2434_v40 = vrot.slane %v2433_v33, 4 }
 0x154   : > { %6093 = vmatmul.mubr.msk.bf16.gmra.mrb[16].mxu0 %vm696_vm3, %v5622_v37  ;;  %v2395_v37 = vor.u32 %v2394_v11, %v2390_v18  ;;  %v2420_v15 = vrot.slane %v2419_v7, 4  ;;  %v2449_v9 = vsel %vm6584_vm4, %v2444_v13, %v2448_v17 }
 0x155   : > { %5957 = vmatmul.mubr.msk.bf16.vlgmr.msra.gmra.mrb[16].mxu1 %vm696_vm3, %v7952_v1  ;;  %6096 = vmatprep.mubr.msk.bf16.mxu0 %vm696_vm3, %v5623_v3  ;;  %v2409_v1 = vor.u32 %v2408_v41, %v2405_v19  ;;  %v5349_v3 = vcombine.low %v2367_v10, %v2377_v59  ;;  %v2439_v30 = vsel %vm6584_vm4, %v2434_v40, %v2438_v21 }
 0x156   : > { %5960 = vmatprep.mubr.msk.bf16.mxu1 %vm696_vm3, %v5347_v24  ;;  %v2396_v28 = vrot.slane %v2395_v37, 4  ;;  %v2425_v48 = vsel %vm6584_vm4, %v2420_v15, %v2424_v60  ;;  %v5352_v14 = vcombine.low %v2439_v30, %v2449_v9 }
 0x157   : > { %v2410_v46 = vrot.slane %v2409_v1, 4 }
 0x158   : > { %v2401_v42 = vsel %vm6584_vm4, %v2396_v28, %v2400_v45 }
 0x159   : > { %v5350_v62 = vcombine.low %v2391_v20, %v2401_v42 }
 0x15c   : > { %6097 = vmatmul.mubr.msk.bf16.gmra.mrb[20].mxu0 %vm696_vm3, %v5624_v8  ;;  %v2415_v8 = vsel %vm6584_vm4, %v2410_v46, %v2414_v52 }
 0x15d   : > { %5961 = vmatmul.mubr.msk.bf16.gmra.mrb[20].mxu1 %vm696_vm3, %v5348_v44  ;;  %6100 = vmatprep.mubr.msk.bf16.mxu0 %vm696_vm3, %v5625_v56  ;;  %v5351_v56 = vcombine.low %v2415_v8, %v2425_v48 }
 0x15e   : > { %5964 = vmatprep.mubr.msk.bf16.mxu1 %vm696_vm3, %v5349_v3 }
 0x164   : > { %6101 = vmatmul.mubr.msk.bf16.gmra.mrb[24].mxu0 %vm696_vm3, %v5626_v43 }
 0x165   : > { %5965 = vmatmul.mubr.msk.bf16.gmra.mrb[24].mxu1 %vm696_vm3, %v5350_v62  ;;  %6104 = vmatprep.mubr.msk.bf16.mxu0 %vm696_vm3, %v5627_v50 }
 0x166   : > { %5968 = vmatprep.mubr.msk.bf16.mxu1 %vm696_vm3, %v5351_v56 }
 0x16c   : > { %6105 = vmatmul.mubr.msk.bf16.gmra.mrb[28].mxu0 %vm696_vm3, %v5628_v29 }
 0x16d   : > { %5969 = vmatmul.mubr.msk.bf16.gmra.mrb[28].mxu1 %vm696_vm3, %v5352_v14 }
 0x1e8   : > { %v5908_v63 = vpop.f32.mrb[0].mxu1 }
 0x1e9   : > { %v1859_v4 = vpop.f32.mrb[1].mxu1 }
 0x1ea   : > { %v5909_v43 = vpop.f32.mrb[2].mxu1 }
 0x1eb   : > { %v1862_v16 = vpop.f32.mrb[3].mxu1 }
 0x1f0   : > { %v5912_v58 = vpop.f32.mrb[4].mxu1 }
 0x1f1   : > { %v1875_v50 = vpop.f32.mrb[5].mxu1 }
 0x1f2   : > { %v5913_v54 = vpop.f32.mrb[6].mxu1 }
 0x1f3   : > { %v1878_v18 = vpop.f32.mrb[7].mxu1 }
 0x1f8   : > { %v8234_v11 = vpop.f32.mrb[8].mxu1 }
 0x1f9   : > { %v8236_v32 = vpop.f32.mrb[9].mxu1 }
 0x1fa   : > { %v8238_v24 = vpop.f32.mrb[10].mxu1 }
 0x1fb   : > { %v8240_v5 = vpop.f32.mrb[11].mxu1 }
 0x200   : > { %v8242_v55 = vpop.f32.mrb[12].mxu1 }
 0x201   : > { %v8244_v29 = vpop.f32.mrb[13].mxu1 }
 0x202   : > { %v8246_v19 = vpop.f32.mrb[14].mxu1 }
 0x203   : > { %v8248_v41 = vpop.f32.mrb[15].mxu1 }
 0x207   : > { %v6078_v52 = vpop.f32.mrb[0].mxu0 }
 0x208   : > { %v6110_v39 = vadd.f32 %v6078_v52, %v5908_v63  ;;  %v4610_v0 = vpop.f32.mrb[1].mxu0 }
 0x209   : > { %v6111_v36 = vadd.f32 %v4610_v0, %v1859_v4  ;;  %v6079_v10 = vpop.f32.mrb[2].mxu0 }
 0x20a   : > { %v4778_v59 = vadd.f32 %v6110_v39, %v8254_v2  ;;  %v6112_v38 = vadd.f32 %v6079_v10, %v5909_v43  ;;  %v4613_v37 = vpop.f32.mrb[3].mxu0 }
 0x20b   : > { %v4776_v26 = vadd.f32 %v6111_v36, %v8254_v2  ;;  %v6113_v35 = vadd.f32 %v4613_v37, %v1862_v16 }
 0x20c   : > { %4811 = vst.msk [vmem:[%s8259_s24 + $0x10] sm:$0xff] %vm4808_vm8, %v4778_v59  ;;  %v4779_v34 = vadd.f32 %v6112_v38, %v8254_v2  ;;  %v4914_v23 = vmul.f32 %v4778_v59, %v4778_v59  ;;  %v4844_v28 = vsel %vm4808_vm8, %v4778_v59, 0.0 }
 0x20d   : > { %4809 = vst.msk [vmem:[%s8259_s24] sm:$0xff] %vm4808_vm8, %v4776_v26  ;;  %v4912_v6 = vmul.f32 %v4776_v26, %v4776_v26  ;;  %v4777_v49 = vadd.f32 %v6113_v35, %v8254_v2  ;;  %v4841_v25 = vsel %vm4808_vm8, %v4776_v26, 0.0 }
 0x20e   : > { %4812 = vst.msk [vmem:[%s8259_s24 + $0x18] sm:$0xff] %vm4808_vm8, %v4779_v34  ;;  %v4915_v22 = vmul.f32 %v4779_v34, %v4779_v34  ;;  %v4947_v42 = vsel %vm4808_vm8, %v4914_v23, 0.0  ;;  %v4846_v33 = vsel %vm4808_vm8, %v4779_v34, 0.0 }
 0x20f   : > { %4810 = vst.msk [vmem:[%s8259_s24 + $0x8] sm:$0xff] %vm4808_vm8, %v4777_v49  ;;  %v4842_v1 = vsel %vm4808_vm8, %v4777_v49, 0.0  ;;  %v4913_v7 = vmul.f32 %v4777_v49, %v4777_v49  ;;  %v6082_v61 = vpop.f32.mrb[4].mxu0  ;;  %v4944_v45 = vsel %vm4808_vm8, %v4912_v6, 0.0 }
 0x210   : > { %v4843_v44 = vadd.f32 %v4842_v1, %v4841_v25  ;;  %v6114_v3 = vadd.f32 %v6082_v61, %v5912_v58  ;;  %v4626_v51 = vpop.f32.mrb[5].mxu0  ;;  %v4949_v57 = vsel %vm4808_vm8, %v4915_v22, 0.0 }
 0x211   : > { %v4945_v27 = vsel %vm4808_vm8, %v4913_v7, 0.0  ;;  %v6115_v53 = vadd.f32 %v4626_v51, %v1875_v50  ;;  %v6083_v21 = vpop.f32.mrb[6].mxu0 }
 0x212   : > { %v4845_v47 = vadd.f32 %v4844_v28, %v4843_v44  ;;  %v4946_v46 = vadd.f32 %v4945_v27, %v4944_v45  ;;  %v4782_v15 = vadd.f32 %v6114_v3, %v8254_v2  ;;  %v6116_v60 = vadd.f32 %v6083_v21, %v5913_v54  ;;  %v4629_v20 = vpop.f32.mrb[7].mxu0 }
 0x213   : > { %v4780_v12 = vadd.f32 %v6115_v53, %v8254_v2  ;;  %v6117_v31 = vadd.f32 %v4629_v20, %v1878_v18 }
 0x214   : > { %v4948_v8 = vadd.f32 %v4947_v42, %v4946_v46  ;;  %4815 = vst.msk [vmem:[%s8259_s24 + $0x30] sm:$0xff] %vm4808_vm8, %v4782_v15  ;;  %v4847_v48 = vadd.f32 %v4846_v33, %v4845_v47  ;;  %v4783_v40 = vadd.f32 %v6116_v60, %v8254_v2  ;;  %v4918_v9 = vmul.f32 %v4782_v15, %v4782_v15 }
 0x215   : > { %4813 = vst.msk [vmem:[%s8259_s24 + $0x20] sm:$0xff] %vm4808_vm8, %v4780_v12  ;;  %v4848_v62 = vsel %vm4808_vm8, %v4780_v12, 0.0  ;;  %v4916_v56 = vmul.f32 %v4780_v12, %v4780_v12  ;;  %v4781_v13 = vadd.f32 %v6117_v31, %v8254_v2  ;;  %v4852_v18 = vsel %vm4808_vm8, %v4782_v15, 0.0 }
 0x216   : > { %v4849_v17 = vadd.f32 %v4848_v62, %v4847_v48  ;;  %v4950_v30 = vadd.f32 %v4949_v57, %v4948_v8  ;;  %4816 = vst.msk [vmem:[%s8259_s24 + $0x38] sm:$0xff] %vm4808_vm8, %v4783_v40  ;;  %v4919_v52 = vmul.f32 %v4783_v40, %v4783_v40 }
 0x217   : > { %v4951_v14 = vsel %vm4808_vm8, %v4916_v56, 0.0  ;;  %4814 = vst.msk [vmem:[%s8259_s24 + $0x28] sm:$0xff] %vm4808_vm8, %v4781_v13  ;;  %v4850_v63 = vsel %vm4808_vm8, %v4781_v13, 0.0  ;;  %v6086_v4 = vpop.f32.mrb[8].mxu0  ;;  %v4917_v58 = vmul.f32 %v4781_v13, %v4781_v13 }
 0x218   : > { %v4952_v43 = vadd.f32 %v4951_v14, %v4950_v30  ;;  %v4851_v16 = vadd.f32 %v4850_v63, %v4849_v17  ;;  %v6118_v50 = vadd.f32 %v6086_v4, %v8234_v11  ;;  %v4642_v54 = vpop.f32.mrb[9].mxu0  ;;  %v4854_v11 = vsel %vm4808_vm8, %v4783_v40, 0.0 }
 0x219   : > { %v6119_v39 = vadd.f32 %v4642_v54, %v8236_v32  ;;  %v6087_v0 = vpop.f32.mrb[10].mxu0  ;;  %v4953_v10 = vsel %vm4808_vm8, %v4917_v58, 0.0  ;;  %v4955_v32 = vsel %vm4808_vm8, %v4918_v9, 0.0  ;;  %v4957_v7 = vsel %vm4808_vm8, %v4919_v52, 0.0 }
 0x21a   : > { %v4853_v36 = vadd.f32 %v4852_v18, %v4851_v16  ;;  %v4786_v59 = vadd.f32 %v6118_v50, %v8254_v2  ;;  %v6120_v38 = vadd.f32 %v6087_v0, %v8238_v24  ;;  %v4645_v37 = vpop.f32.mrb[11].mxu0  ;;  %v4954_v26 = vadd.f32 %v4953_v10, %v4952_v43 }
 0x21b   : > { %v4784_v35 = vadd.f32 %v6119_v39, %v8254_v2  ;;  %v6121_v34 = vadd.f32 %v4645_v37, %v8240_v5 }
 0x21c   : > { %4819 = vst.msk [vmem:[%s8259_s24 + $0x50] sm:$0xff] %vm4808_vm8, %v4786_v59  ;;  %v4855_v6 = vadd.f32 %v4854_v11, %v4853_v36  ;;  %v4787_v49 = vadd.f32 %v6120_v38, %v8254_v2  ;;  %v4956_v23 = vadd.f32 %v4955_v32, %v4954_v26  ;;  %v4922_v28 = vmul.f32 %v4786_v59, %v4786_v59 }
 0x21d   : > { %4817 = vst.msk [vmem:[%s8259_s24 + $0x40] sm:$0xff] %vm4808_vm8, %v4784_v35  ;;  %v4856_v24 = vsel %vm4808_vm8, %v4784_v35, 0.0  ;;  %v4920_v25 = vmul.f32 %v4784_v35, %v4784_v35  ;;  %v4785_v1 = vadd.f32 %v6121_v34, %v8254_v2  ;;  %v4860_v21 = vsel %vm4808_vm8, %v4786_v59, 0.0 }
 0x21e   : > { %v4857_v61 = vadd.f32 %v4856_v24, %v4855_v6  ;;  %4820 = vst.msk [vmem:[%s8259_s24 + $0x58] sm:$0xff] %vm4808_vm8, %v4787_v49  ;;  %v4958_v5 = vadd.f32 %v4957_v7, %v4956_v23  ;;  %v4923_v20 = vmul.f32 %v4787_v49, %v4787_v49 }
 0x21f   : > { %v4959_v22 = vsel %vm4808_vm8, %v4920_v25, 0.0  ;;  %4818 = vst.msk [vmem:[%s8259_s24 + $0x48] sm:$0xff] %vm4808_vm8, %v4785_v1  ;;  %v4858_v44 = vsel %vm4808_vm8, %v4785_v1, 0.0  ;;  %v4921_v3 = vmul.f32 %v4785_v1, %v4785_v1  ;;  %v6090_v51 = vpop.f32.mrb[12].mxu0 }
 0x220   : > { %v4859_v45 = vadd.f32 %v4858_v44, %v4857_v61  ;;  %v6122_v27 = vadd.f32 %v6090_v51, %v8242_v55  ;;  %v4658_v53 = vpop.f32.mrb[13].mxu0  ;;  %v4960_v47 = vadd.f32 %v4959_v22, %v4958_v5  ;;  %v4862_v55 = vsel %vm4808_vm8, %v4787_v49, 0.0 }
 0x221   : > { %v4961_v46 = vsel %vm4808_vm8, %v4921_v3, 0.0  ;;  %v6123_v15 = vadd.f32 %v4658_v53, %v8244_v29  ;;  %v6091_v60 = vpop.f32.mrb[14].mxu0  ;;  %v4963_v29 = vsel %vm4808_vm8, %v4922_v28, 0.0  ;;  %v4965_v30 = vsel %vm4808_vm8, %v4923_v20, 0.0 }
 0x222   : > { %v4861_v42 = vadd.f32 %v4860_v21, %v4859_v45  ;;  %v4790_v33 = vadd.f32 %v6122_v27, %v8254_v2  ;;  %v6124_v12 = vadd.f32 %v6091_v60, %v8246_v19  ;;  %v4661_v31 = vpop.f32.mrb[15].mxu0  ;;  %v4962_v57 = vadd.f32 %v4961_v46, %v4960_v47 }
 0x223   : > { %v4788_v8 = vadd.f32 %v6123_v15, %v8254_v2  ;;  %v6125_v48 = vadd.f32 %v4661_v31, %v8248_v41 }
 0x224   : > { %4823 = vst.msk [vmem:[%s8259_s24 + $0x70] sm:$0xff] %vm4808_vm8, %v4790_v33  ;;  %v4863_v62 = vadd.f32 %v4862_v55, %v4861_v42  ;;  %v4791_v56 = vadd.f32 %v6124_v12, %v8254_v2  ;;  %v4964_v40 = vadd.f32 %v4963_v29, %v4962_v57  ;;  %v4926_v16 = vmul.f32 %v4790_v33, %v4790_v33 }
 0x225   : > { %4821 = vst.msk [vmem:[%s8259_s24 + $0x60] sm:$0xff] %vm4808_vm8, %v4788_v8  ;;  %v4864_v19 = vsel %vm4808_vm8, %v4788_v8, 0.0  ;;  %v4924_v13 = vmul.f32 %v4788_v8, %v4788_v8  ;;  %v4789_v17 = vadd.f32 %v6125_v48, %v8254_v2  ;;  %v4868_v18 = vsel %vm4808_vm8, %v4790_v33, 0.0 }
 0x226   : > { %v4865_v9 = vadd.f32 %v4864_v19, %v4863_v62  ;;  %4824 = vst.msk [vmem:[%s8259_s24 + $0x78] sm:$0xff] %vm4808_vm8, %v4791_v56  ;;  %v4966_v41 = vadd.f32 %v4965_v30, %v4964_v40  ;;  %v4927_v59 = vmul.f32 %v4791_v56, %v4791_v56  ;;  %v4870_v35 = vsel %vm4808_vm8, %v4791_v56, 0.0 }
 0x227   : > { %v4967_v14 = vsel %vm4808_vm8, %v4924_v13, 0.0  ;;  %4822 = vst.msk [vmem:[%s8259_s24 + $0x68] sm:$0xff] %vm4808_vm8, %v4789_v17  ;;  %v4866_v63 = vsel %vm4808_vm8, %v4789_v17, 0.0  ;;  %v4925_v4 = vmul.f32 %v4789_v17, %v4789_v17  ;;  %v6094_v43 = vpop.f32.mrb[16].mxu0  ;;  %v4971_v23 = vsel %vm4808_vm8, %v4926_v16, 0.0 }
 0x228   : > { %v4867_v58 = vadd.f32 %v4866_v63, %v4865_v9  ;;  %v5958_v50 = vpop.f32.mrb[16].mxu1  ;;  %v4674_v54 = vpop.f32.mrb[17].mxu0  ;;  %v4968_v52 = vadd.f32 %v4967_v14, %v4966_v41  ;;  %v4973_v5 = vsel %vm4808_vm8, %v4927_v59, 0.0 }
 0x229   : > { %v4969_v39 = vsel %vm4808_vm8, %v4925_v4, 0.0  ;;  %v6126_v0 = vadd.f32 %v6094_v43, %v5958_v50  ;;  %v2649_v36 = vpop.f32.mrb[17].mxu1  ;;  %v6095_v10 = vpop.f32.mrb[18].mxu0 }
 0x22a   : > { %v4869_v38 = vadd.f32 %v4868_v18, %v4867_v58  ;;  %v6127_v37 = vadd.f32 %v4674_v54, %v2649_v36  ;;  %v5959_v11 = vpop.f32.mrb[18].mxu1  ;;  %v4677_v26 = vpop.f32.mrb[19].mxu0  ;;  %v4970_v34 = vadd.f32 %v4969_v39, %v4968_v52 }
 0x22b   : > { %v4794_v32 = vadd.f32 %v6126_v0, %v8254_v2  ;;  %v6128_v6 = vadd.f32 %v6095_v10, %v5959_v11  ;;  %v2652_v49 = vpop.f32.mrb[19].mxu1 }
 0x22c   : > { %v4792_v24 = vadd.f32 %v6127_v37, %v8254_v2  ;;  %v4871_v25 = vadd.f32 %v4870_v35, %v4869_v38  ;;  %v6129_v1 = vadd.f32 %v4677_v26, %v2652_v49  ;;  %v4972_v7 = vadd.f32 %v4971_v23, %v4970_v34 }
 0x22d   : > { %4827 = vst.msk [vmem:[%s8259_s24 + $0x90] sm:$0xff] %vm4808_vm8, %v4794_v32  ;;  %v4795_v61 = vadd.f32 %v6128_v6, %v8254_v2  ;;  %v4930_v27 = vmul.f32 %v4794_v32, %v4794_v32  ;;  %v4876_v55 = vsel %vm4808_vm8, %v4794_v32, 0.0 }
 0x22e   : > { %4825 = vst.msk [vmem:[%s8259_s24 + $0x80] sm:$0xff] %vm4808_vm8, %v4792_v24  ;;  %v4872_v22 = vsel %vm4808_vm8, %v4792_v24, 0.0  ;;  %v4928_v44 = vmul.f32 %v4792_v24, %v4792_v24  ;;  %v4793_v3 = vadd.f32 %v6129_v1, %v8254_v2  ;;  %v4974_v28 = vadd.f32 %v4973_v5, %v4972_v7 }
 0x22f   : > { %v4873_v51 = vadd.f32 %v4872_v22, %v4871_v25  ;;  %4828 = vst.msk [vmem:[%s8259_s24 + $0x98] sm:$0xff] %vm4808_vm8, %v4795_v61  ;;  %v6098_v45 = vpop.f32.mrb[20].mxu0  ;;  %v4931_v20 = vmul.f32 %v4795_v61, %v4795_v61  ;;  %v4979_v17 = vsel %vm4808_vm8, %v4930_v27, 0.0  ;;  %v4878_v30 = vsel %vm4808_vm8, %v4795_v61, 0.0 }
 0x230   : > { %v4975_v53 = vsel %vm4808_vm8, %v4928_v44, 0.0  ;;  %4826 = vst.msk [vmem:[%s8259_s24 + $0x88] sm:$0xff] %vm4808_vm8, %v4793_v3  ;;  %v4874_v21 = vsel %vm4808_vm8, %v4793_v3, 0.0  ;;  %v4929_v47 = vmul.f32 %v4793_v3, %v4793_v3  ;;  %v5962_v46 = vpop.f32.mrb[20].mxu1  ;;  %v4690_v15 = vpop.f32.mrb[21].mxu0 }
 0x231   : > { %v4976_v60 = vadd.f32 %v4975_v53, %v4974_v28  ;;  %v4875_v42 = vadd.f32 %v4874_v21, %v4873_v51  ;;  %v6130_v33 = vadd.f32 %v6098_v45, %v5962_v46  ;;  %v2665_v12 = vpop.f32.mrb[21].mxu1  ;;  %v6099_v31 = vpop.f32.mrb[22].mxu0  ;;  %v4981_v14 = vsel %vm4808_vm8, %v4931_v20, 0.0 }
 0x232   : > { %v4977_v57 = vsel %vm4808_vm8, %v4929_v47, 0.0  ;;  %v6131_v8 = vadd.f32 %v4690_v15, %v2665_v12  ;;  %v5963_v48 = vpop.f32.mrb[22].mxu1  ;;  %v4693_v29 = vpop.f32.mrb[23].mxu0 }
 0x233   : > { %v4877_v62 = vadd.f32 %v4876_v55, %v4875_v42  ;;  %v4978_v56 = vadd.f32 %v4977_v57, %v4976_v60  ;;  %v4798_v40 = vadd.f32 %v6130_v33, %v8254_v2  ;;  %v6132_v19 = vadd.f32 %v6099_v31, %v5963_v48  ;;  %v2668_v13 = vpop.f32.mrb[23].mxu1 }
 0x234   : > { %v4796_v9 = vadd.f32 %v6131_v8, %v8254_v2  ;;  %v6133_v41 = vadd.f32 %v4693_v29, %v2668_v13 }
 0x235   : > { %v4980_v63 = vadd.f32 %v4979_v17, %v4978_v56  ;;  %4831 = vst.msk [vmem:[%s8259_s24 + $0xb0] sm:$0xff] %vm4808_vm8, %v4798_v40  ;;  %v4879_v4 = vadd.f32 %v4878_v30, %v4877_v62  ;;  %v4799_v58 = vadd.f32 %v6132_v19, %v8254_v2  ;;  %v4934_v39 = vmul.f32 %v4798_v40, %v4798_v40 }
 0x236   : > { %4829 = vst.msk [vmem:[%s8259_s24 + $0xa0] sm:$0xff] %vm4808_vm8, %v4796_v9  ;;  %v4880_v43 = vsel %vm4808_vm8, %v4796_v9, 0.0  ;;  %v4932_v16 = vmul.f32 %v4796_v9, %v4796_v9  ;;  %v4797_v50 = vadd.f32 %v6133_v41, %v8254_v2  ;;  %v4884_v32 = vsel %vm4808_vm8, %v4798_v40, 0.0 }
 0x237   : > { %v4881_v54 = vadd.f32 %v4880_v43, %v4879_v4  ;;  %v4982_v18 = vadd.f32 %v4981_v14, %v4980_v63  ;;  %v6102_v52 = vpop.f32.mrb[24].mxu0  ;;  %4832 = vst.msk [vmem:[%s8259_s24 + $0xb8] sm:$0xff] %vm4808_vm8, %v4799_v58  ;;  %v4935_v6 = vmul.f32 %v4799_v58, %v4799_v58  ;;  %v4886_v22 = vsel %vm4808_vm8, %v4799_v58, 0.0 }
 0x238   : > { %v4983_v0 = vsel %vm4808_vm8, %v4932_v16, 0.0  ;;  %4830 = vst.msk [vmem:[%s8259_s24 + $0xa8] sm:$0xff] %vm4808_vm8, %v4797_v50  ;;  %v4882_v36 = vsel %vm4808_vm8, %v4797_v50, 0.0  ;;  %v5966_v10 = vpop.f32.mrb[24].mxu1  ;;  %v4706_v59 = vpop.f32.mrb[25].mxu0  ;;  %v4933_v11 = vmul.f32 %v4797_v50, %v4797_v50  ;;  %v4987_v28 = vsel %vm4808_vm8, %v4934_v39, 0.0 }
 0x239   : > { %v4984_v38 = vadd.f32 %v4983_v0, %v4982_v18  ;;  %v4883_v37 = vadd.f32 %v4882_v36, %v4881_v54  ;;  %v6134_v26 = vadd.f32 %v6102_v52, %v5966_v10  ;;  %v2681_v35 = vpop.f32.mrb[25].mxu1  ;;  %v6103_v34 = vpop.f32.mrb[26].mxu0  ;;  %v4989_v15 = vsel %vm4808_vm8, %v4935_v6, 0.0 }
 0x23a   : > { %v6135_v49 = vadd.f32 %v4706_v59, %v2681_v35  ;;  %v5967_v23 = vpop.f32.mrb[26].mxu1  ;;  %v4709_v24 = vpop.f32.mrb[27].mxu0  ;;  %v4985_v1 = vsel %vm4808_vm8, %v4933_v11, 0.0 }
 0x23b   : > { %v4885_v25 = vadd.f32 %v4884_v32, %v4883_v37  ;;  %v4802_v7 = vadd.f32 %v6134_v26, %v8254_v2  ;;  %v6136_v61 = vadd.f32 %v6103_v34, %v5967_v23  ;;  %v2684_v5 = vpop.f32.mrb[27].mxu1  ;;  %v4986_v44 = vadd.f32 %v4985_v1, %v4984_v38 }
 0x23c   : > { %v4800_v3 = vadd.f32 %v6135_v49, %v8254_v2  ;;  %v6137_v51 = vadd.f32 %v4709_v24, %v2684_v5 }
 0x23d   : > { %4835 = vst.msk [vmem:[%s8259_s24 + $0xd0] sm:$0xff] %vm4808_vm8, %v4802_v7  ;;  %v4887_v45 = vadd.f32 %v4886_v22, %v4885_v25  ;;  %v4803_v27 = vadd.f32 %v6136_v61, %v8254_v2  ;;  %v4988_v53 = vadd.f32 %v4987_v28, %v4986_v44  ;;  %v4938_v60 = vmul.f32 %v4802_v7, %v4802_v7 }
 0x23e   : > { %4833 = vst.msk [vmem:[%s8259_s24 + $0xc0] sm:$0xff] %vm4808_vm8, %v4800_v3  ;;  %v4888_v21 = vsel %vm4808_vm8, %v4800_v3, 0.0  ;;  %v4936_v47 = vmul.f32 %v4800_v3, %v4800_v3  ;;  %v4801_v46 = vadd.f32 %v6137_v51, %v8254_v2  ;;  %v4892_v19 = vsel %vm4808_vm8, %v4802_v7, 0.0 }
 0x23f   : > { %v4889_v20 = vadd.f32 %v4888_v21, %v4887_v45  ;;  %4836 = vst.msk [vmem:[%s8259_s24 + $0xd8] sm:$0xff] %vm4808_vm8, %v4803_v27  ;;  %v6106_v42 = vpop.f32.mrb[28].mxu0  ;;  %v4990_v33 = vadd.f32 %v4989_v15, %v4988_v53  ;;  %v4939_v48 = vmul.f32 %v4803_v27, %v4803_v27  ;;  %v4995_v14 = vsel %vm4808_vm8, %v4938_v60, 0.0 }
 0x240   : > { %v4991_v12 = vsel %vm4808_vm8, %v4936_v47, 0.0  ;;  %4834 = vst.msk [vmem:[%s8259_s24 + $0xc8] sm:$0xff] %vm4808_vm8, %v4801_v46  ;;  %v4890_v31 = vsel %vm4808_vm8, %v4801_v46, 0.0  ;;  %v4937_v55 = vmul.f32 %v4801_v46, %v4801_v46  ;;  %v5970_v57 = vpop.f32.mrb[28].mxu1  ;;  %v4722_v8 = vpop.f32.mrb[29].mxu0  ;;  %v4894_v58 = vsel %vm4808_vm8, %v4803_v27, 0.0 }
 0x241   : > { %v4891_v29 = vadd.f32 %v4890_v31, %v4889_v20  ;;  %v6138_v62 = vadd.f32 %v6106_v42, %v5970_v57  ;;  %v2697_v56 = vpop.f32.mrb[29].mxu1  ;;  %v6107_v40 = vpop.f32.mrb[30].mxu0  ;;  %v4992_v13 = vadd.f32 %v4991_v12, %v4990_v33  ;;  %v4997_v52 = vsel %vm4808_vm8, %v4939_v48, 0.0 }
 0x242   : > { %v4993_v17 = vsel %vm4808_vm8, %v4937_v55, 0.0  ;;  %v6139_v30 = vadd.f32 %v4722_v8, %v2697_v56  ;;  %v5971_v9 = vpop.f32.mrb[30].mxu1  ;;  %v4725_v41 = vpop.f32.mrb[31].mxu0 }
 0x243   : > { %v4893_v63 = vadd.f32 %v4892_v19, %v4891_v29  ;;  %v4806_v4 = vadd.f32 %v6138_v62, %v8254_v2  ;;  %v6140_v43 = vadd.f32 %v6107_v40, %v5971_v9  ;;  %v2700_v16 = vpop.f32.mrb[31].mxu1  ;;  %v4994_v50 = vadd.f32 %v4993_v17, %v4992_v13 }
 0x244   : > { %v4804_v54 = vadd.f32 %v6139_v30, %v8254_v2  ;;  %v6141_v18 = vadd.f32 %v4725_v41, %v2700_v16 }
 0x245   : > { %4839 = vst.msk [vmem:[%s8259_s24 + $0xf0] sm:$0xff] %vm4808_vm8, %v4806_v4  ;;  %v4942_v39 = vmul.f32 %v4806_v4, %v4806_v4  ;;  %v4895_v0 = vadd.f32 %v4894_v58, %v4893_v63  ;;  %v4807_v36 = vadd.f32 %v6140_v43, %v8254_v2  ;;  %v4996_v10 = vadd.f32 %v4995_v14, %v4994_v50 }
 0x246   : > { %4837 = vst.msk [vmem:[%s8259_s24 + $0xe0] sm:$0xff] %vm4808_vm8, %v4804_v54  ;;  %v4896_v59 = vsel %vm4808_vm8, %v4804_v54, 0.0  ;;  %v4940_v38 = vmul.f32 %v4804_v54, %v4804_v54  ;;  %v4805_v37 = vadd.f32 %v6141_v18, %v8254_v2  ;;  %v4900_v25 = vsel %vm4808_vm8, %v4806_v4, 0.0 }
 0x247   : > { %v5003_v11 = vsel %vm4808_vm8, %v4942_v39, 0.0  ;;  %v4897_v26 = vadd.f32 %v4896_v59, %v4895_v0  ;;  %4840 = vst.msk [vmem:[%s8259_s24 + $0xf8] sm:$0xff] %vm4808_vm8, %v4807_v36  ;;  %v4902_v35 = vsel %vm4808_vm8, %v4807_v36, 0.0  ;;  %v4943_v34 = vmul.f32 %v4807_v36, %v4807_v36 }
 0x248   : > { %v4998_v32 = vadd.f32 %v4997_v52, %v4996_v10  ;;  %v4999_v6 = vsel %vm4808_vm8, %v4940_v38, 0.0  ;;  %4838 = vst.msk [vmem:[%s8259_s24 + $0xe8] sm:$0xff] %vm4808_vm8, %v4805_v37  ;;  %v4898_v49 = vsel %vm4808_vm8, %v4805_v37, 0.0  ;;  %v4941_v23 = vmul.f32 %v4805_v37, %v4805_v37 }
 0x249   : > { %v5005_v24 = vsel %vm4808_vm8, %v4943_v34, 0.0  ;;  %v4899_v2 = vadd.f32 %v4898_v49, %v4897_v26 }
 0x24a   : > { %v5000_v1 = vadd.f32 %v4999_v6, %v4998_v32  ;;  %v5001_v7 = vsel %vm4808_vm8, %v4941_v23, 0.0 }
 0x24b   : > { %v4901_v61 = vadd.f32 %v4900_v25, %v4899_v2 }
 0x24c   : > { %v5002_v5 = vadd.f32 %v5001_v7, %v5000_v1 }
 0x24d   : > { %v4903_v22 = vadd.f32 %v4902_v35, %v4901_v61 }
 0x24e   : > { %v5004_v44 = vadd.f32 %v5003_v11, %v5002_v5 }
 0x24f   : > { %v4904_v3 = vrot.slane %v4903_v22, 4 }
 0x250   : > { %v5006_v51 = vadd.f32 %v5005_v24, %v5004_v44 }
 0x251   : > { %v4905_v28 = vadd.f32 %v4904_v3, %v4903_v22 }
 0x252   : > { %v5007_v45 = vrot.slane %v5006_v51, 4 }
 0x253   : > { %v4906_v27 = vrot.slane %v4905_v28, 2 }
 0x254   : > { %v5008_v53 = vadd.f32 %v5007_v45, %v5006_v51 }
 0x255   : > { %v4907_v21 = vadd.f32 %v4906_v27, %v4905_v28 }
 0x256   : > { %v5009_v47 = vrot.slane %v5008_v53, 2 }
 0x257   : > { %v4908_v46 = vrot.slane %v4907_v21, 1 }
 0x258   : > { %v5010_v15 = vadd.f32 %v5009_v47, %v5008_v53 }
 0x259   : > { %v4909_v60 = vadd.f32 %v4908_v46, %v4907_v21 }
 0x25a   : > { %v5011_v20 = vrot.slane %v5010_v15, 1 }
 0x25b   : > { %4911 = vst.msk [vmem:[%s208_s28] sm:$0x1] %vm4910_vm9, %v4909_v60 }
 0x25c   : > { %v5012_v42 = vadd.f32 %v5011_v20, %v5010_v15 }
 0x25e   : > { %5013 = vst.msk [vmem:[%s208_s28 + $0x1] sm:$0x1] %vm4910_vm9, %v5012_v42 }
 0x25f PF: > { %s15_s15 = sadd.s32 1, %s6496_s15  }
 0x260   : > { %p12_p4 = scmp.ge.s32.totalorder %s15_s15, 4  }
 0x262   :  { %14 = sbr.rel (!%p12_p4) target bundleno = 1 (0x1), region = 84 }

</bundles_post_ra>
